<compile_context>
chip_gen: v7x
topology: tpu7x:2x2x1
jax: 0.10.0
libtpu: 0.0.40
codegen_flags: <defaults>
</compile_context>

<pallas_src>
import jax
import jax.numpy as jnp
from jax.experimental import pallas as pl
from jax.experimental.pallas import tpu as pltpu

SIZE = 512          # output feature size of every fc_* head
FEAT = 1024         # ViT backbone output ("num_classes=1024")

# ---- scaled-down ViT config ----
IMG = 32
PATCH = 8
IN_CH = 3
EMBED = 64
HEADS = 4
HEAD_DIM = EMBED // HEADS
DEPTH = 2
MLP_HIDDEN = 4 * EMBED
N_PATCH = (IMG // PATCH) ** 2
TOKENS = N_PATCH + 1
PATCH_DIM = PATCH * PATCH * IN_CH
LN_EPS = 1e-6
N_BACKBONES = 3     # pair, person (shared A/B), scene
N_FC = 4            # fc_pair, fc_A, fc_B, fc_scene


# ----------------------------------------------------------------------------
# In-kernel helpers
# ----------------------------------------------------------------------------
def _layernorm(x, g, b):
    mean = jnp.mean(x, axis=-1, keepdims=True)
    var = jnp.mean((x - mean) ** 2, axis=-1, keepdims=True)
    return (x - mean) * jax.lax.rsqrt(var + LN_EPS) * g + b


def _bf16_dot(x, w):
    return jnp.dot(x.astype(jnp.bfloat16), w, preferred_element_type=jnp.float32)


# ----------------------------------------------------------------------------
# Fused ViT (+ fc head) kernel: one image per grid step
# ----------------------------------------------------------------------------
def _fused_vit_kernel(
        bidx_ref, fidx_ref,                 # scalar prefetch (used by index maps)
        patches_ref,                        # (1, N_PATCH, PATCH_DIM) bf16
        patch_w_ref, patch_b_ref,           # (1, PATCH_DIM, E) bf16 / (1,1,E) f32
        cls_ref, pos_ref,                   # (1,1,E) / (1,T,E) f32
        ln1_g_ref, ln1_b_ref,               # (1, DEPTH, 1, E) f32
        qkv_w_ref, qkv_b_ref,               # (1, DEPTH, E, 3E) bf16 / f32
        proj_w_ref, proj_b_ref,
        ln2_g_ref, ln2_b_ref,
        fc1_w_ref, fc1_b_ref,
        fc2_w_ref, fc2_b_ref,
        lnf_g_ref, lnf_b_ref,               # (1, 1, E) f32
        head_w_ref, head_b_ref,             # (1, E, FEAT) bf16 / (1,1,FEAT) f32
        fc_w_ref, fc_b_ref,                 # (1, FEAT, SIZE) bf16 / (1,1,SIZE) f32
        out_ref):                           # (1, 1, SIZE) f32
    del bidx_ref, fidx_ref                  # only consumed by the index maps

    # --- patch embedding + cls token + positional embedding ---
    pe = _bf16_dot(patches_ref[0], patch_w_ref[0]) + patch_b_ref[0]     # (N_PATCH, E)
    x = jnp.concatenate([cls_ref[0], pe], axis=0) + pos_ref[0]          # (T, E) f32

    scale = HEAD_DIM ** -0.5
    for d in range(DEPTH):                                              # static unroll
        # --- attention block ---
        h = _layernorm(x, ln1_g_ref[0, d], ln1_b_ref[0, d])
        qkv = _bf16_dot(h, qkv_w_ref[0, d]) + qkv_b_ref[0, d]           # (T, 3E) f32
        q = qkv[:, 0:EMBED].astype(jnp.bfloat16)
        k = qkv[:, EMBED:2 * EMBED].astype(jnp.bfloat16)
        v = qkv[:, 2 * EMBED:3 * EMBED].astype(jnp.bfloat16)
        heads_out = []
        for hd in range(HEADS):                                         # static unroll
            sl = slice(hd * HEAD_DIM, (hd + 1) * HEAD_DIM)
            s = jax.lax.dot_general(
                q[:, sl], k[:, sl], (((1,), (1,)), ((), ())),
                preferred_element_type=jnp.float32) * scale             # (T, T) f32
            p = jax.nn.softmax(s, axis=-1)
            heads_out.append(_bf16_dot(p, v[:, sl]))                    # (T, HEAD_DIM)
        attn = jnp.concatenate(heads_out, axis=-1)                      # (T, E) f32
        x = x + _bf16_dot(attn, proj_w_ref[0, d]) + proj_b_ref[0, d]

        # --- MLP block ---
        h = _layernorm(x, ln2_g_ref[0, d], ln2_b_ref[0, d])
        h = _bf16_dot(h, fc1_w_ref[0, d]) + fc1_b_ref[0, d]
        # TODO(synk): PyTorch/timm ViT uses exact (erf) GELU; tanh approximation
        # is used here.
        h = jax.nn.gelu(h, approximate=True)
        h = _bf16_dot(h, fc2_w_ref[0, d]) + fc2_b_ref[0, d]
        x = x + h

    # --- final LN, 1024-d backbone head, per-stream 1024->512 fc head ---
    x = _layernorm(x, lnf_g_ref[0], lnf_b_ref[0])
    cls_tok = x[0:1, :]                                                 # (1, E)
    feat = _bf16_dot(cls_tok, head_w_ref[0]) + head_b_ref[0]            # (1, FEAT)
    out = _bf16_dot(feat, fc_w_ref[0]) + fc_b_ref[0]                    # (1, SIZE)
    out_ref[0] = out.astype(out_ref.dtype)


def _bmap3(i, b, f):
    return (b[i], 0, 0)


def _bmap4(i, b, f):
    return (b[i], 0, 0, 0)


def _fmap3(i, b, f):
    return (f[i], 0, 0)


def _imap3(i, b, f):
    return (i, 0, 0)


_WEIGHT_ORDER = [
    ("patch_w", _bmap3), ("patch_b", _bmap3),
    ("cls", _bmap3), ("pos", _bmap3),
    ("ln1_g", _bmap4), ("ln1_b", _bmap4),
    ("qkv_w", _bmap4), ("qkv_b", _bmap4),
    ("proj_w", _bmap4), ("proj_b", _bmap4),
    ("ln2_g", _bmap4), ("ln2_b", _bmap4),
    ("fc1_w", _bmap4), ("fc1_b", _bmap4),
    ("fc2_w", _bmap4), ("fc2_b", _bmap4),
    ("lnf_g", _bmap3), ("lnf_b", _bmap3),
    ("head_w", _bmap3), ("head_b", _bmap3),
    ("fc_w", _fmap3), ("fc_b", _fmap3),
]


def fused_vit_forward(packed, patches, bidx, fidx):
    """patches: (n_img, N_PATCH, PATCH_DIM) bf16 -> (n_img, SIZE) f32."""
    n_img = patches.shape[0]
    weight_arrays = [packed[name] for name, _ in _WEIGHT_ORDER]

    def spec(arr, idx_map):
        return pl.BlockSpec((1,) + tuple(arr.shape[1:]), idx_map)

    in_specs = [spec(patches, _imap3)] + [
        spec(arr, m) for arr, (_, m) in zip(weight_arrays, _WEIGHT_ORDER)]

    out = pl.pallas_call(
        _fused_vit_kernel,
        out_shape=jax.ShapeDtypeStruct((n_img, 1, SIZE), jnp.float32),
        grid_spec=pltpu.PrefetchScalarGridSpec(
            num_scalar_prefetch=2,
            grid=(n_img,),
            in_specs=in_specs,
            out_specs=pl.BlockSpec((1, 1, SIZE), _imap3),
        ),
        compiler_params=pltpu.CompilerParams(
            dimension_semantics=("parallel",)),
    )(bidx, fidx, patches, *weight_arrays)
    return out.reshape(n_img, SIZE)


# ----------------------------------------------------------------------------
# Tiny bbox linear kernel (10 -> 512)
# ----------------------------------------------------------------------------
def _linear_kernel(x_ref, w_ref, b_ref, o_ref):
    y = jnp.dot(x_ref[...], w_ref[...], preferred_element_type=jnp.float32)
    o_ref[...] = (y + b_ref[...]).astype(o_ref.dtype)


def linear(x, w, b):
    M, K = x.shape
    K2, N = w.shape
    assert K == K2
    return pl.pallas_call(
        _linear_kernel,
        grid=(1,),
        in_specs=[pl.BlockSpec((M, K), lambda i: (0, 0)),
                  pl.BlockSpec((K, N), lambda i: (0, 0)),
                  pl.BlockSpec((1, N), lambda i: (0, 0))],
        out_specs=pl.BlockSpec((M, N), lambda i: (0, 0)),
        out_shape=jax.ShapeDtypeStruct((M, N), jnp.float32),
    )(x, w, b.reshape(1, N))


# ----------------------------------------------------------------------------
# Parameter initialization (deterministic, synthetic)
# ----------------------------------------------------------------------------
def _dense_params(key, fan_in, fan_out):
    w = jax.random.normal(key, (fan_in, fan_out), jnp.float32) * 0.02
    b = jnp.zeros((fan_out,), jnp.float32)
    return w, b


def init_vit_params(key):
    keys = jax.random.split(key, 4 + DEPTH)
    p = {
        "patch_w": jax.random.normal(keys[0], (PATCH_DIM, EMBED), jnp.float32) * 0.02,
        "patch_b": jnp.zeros((EMBED,), jnp.float32),
        "cls": jax.random.normal(keys[1], (1, EMBED), jnp.float32) * 0.02,
        "pos": jax.random.normal(keys[2], (TOKENS, EMBED), jnp.float32) * 0.02,
        "ln_f_g": jnp.ones((EMBED,), jnp.float32),
        "ln_f_b": jnp.zeros((EMBED,), jnp.float32),
        "blocks": [],
    }
    p["head_w"], p["head_b"] = _dense_params(keys[3], EMBED, FEAT)
    for d in range(DEPTH):
        bk = jax.random.split(keys[4 + d], 4)
        qkv_w, qkv_b = _dense_params(bk[0], EMBED, 3 * EMBED)
        proj_w, proj_b = _dense_params(bk[1], EMBED, EMBED)
        fc1_w, fc1_b = _dense_params(bk[2], EMBED, MLP_HIDDEN)
        fc2_w, fc2_b = _dense_params(bk[3], MLP_HIDDEN, EMBED)
        p["blocks"].append({
            "ln1_g": jnp.ones((EMBED,), jnp.float32),
            "ln1_b": jnp.zeros((EMBED,), jnp.float32),
            "ln2_g": jnp.ones((EMBED,), jnp.float32),
            "ln2_b": jnp.zeros((EMBED,), jnp.float32),
            "qkv_w": qkv_w, "qkv_b": qkv_b,
            "proj_w": proj_w, "proj_b": proj_b,
            "fc1_w": fc1_w, "fc1_b": fc1_b,
            "fc2_w": fc2_w, "fc2_b": fc2_b,
        })
    return p


def init_person_pair_params(key):
    keys = jax.random.split(key, 8)
    params = {
        # three distinct backbones; person_a == person_b (shared weights)
        "pair": init_vit_params(keys[0]),
        "person": init_vit_params(keys[1]),
        "scene": init_vit_params(keys[2]),
    }
    params["bboxes_w"], params["bboxes_b"] = _dense_params(keys[3], 10, SIZE)
    params["fc_pair_w"], params["fc_pair_b"] = _dense_params(keys[4], FEAT, SIZE)
    params["fc_A_w"], params["fc_A_b"] = _dense_params(keys[5], FEAT, SIZE)
    params["fc_B_w"], params["fc_B_b"] = _dense_params(keys[6], FEAT, SIZE)
    params["fc_scene_w"], params["fc_scene_b"] = _dense_params(keys[7], FEAT, SIZE)
    return params


def pack_person_pair_params(params):
    """Stack the 3 backbone weight sets and 4 fc heads for the fused kernel."""
    vits = [params["pair"], params["person"], params["scene"]]

    def stack_top(name, dtype, add_row=False):
        out = jnp.stack([v[name] for v in vits])
        if add_row:
            out = out.reshape(out.shape[0], 1, out.shape[-1])
        return out.astype(dtype)

    def stack_blk(name, dtype, add_row=False):
        arrs = []
        for v in vits:
            per_d = jnp.stack([v["blocks"][d][name] for d in range(DEPTH)])
            if add_row:
                per_d = per_d.reshape(DEPTH, 1, per_d.shape[-1])
            arrs.append(per_d)
        return jnp.stack(arrs).astype(dtype)

    packed = {
        "patch_w": stack_top("patch_w", jnp.bfloat16),
        "patch_b": stack_top("patch_b", jnp.float32, add_row=True),
        "cls": stack_top("cls", jnp.float32),
        "pos": stack_top("pos", jnp.float32),
        "ln1_g": stack_blk("ln1_g", jnp.float32, add_row=True),
        "ln1_b": stack_blk("ln1_b", jnp.float32, add_row=True),
        "qkv_w": stack_blk("qkv_w", jnp.bfloat16),
        "qkv_b": stack_blk("qkv_b", jnp.float32, add_row=True),
        "proj_w": stack_blk("proj_w", jnp.bfloat16),
        "proj_b": stack_blk("proj_b", jnp.float32, add_row=True),
        "ln2_g": stack_blk("ln2_g", jnp.float32, add_row=True),
        "ln2_b": stack_blk("ln2_b", jnp.float32, add_row=True),
        "fc1_w": stack_blk("fc1_w", jnp.bfloat16),
        "fc1_b": stack_blk("fc1_b", jnp.float32, add_row=True),
        "fc2_w": stack_blk("fc2_w", jnp.bfloat16),
        "fc2_b": stack_blk("fc2_b", jnp.float32, add_row=True),
        "lnf_g": stack_top("ln_f_g", jnp.float32, add_row=True),
        "lnf_b": stack_top("ln_f_b", jnp.float32, add_row=True),
        "head_w": stack_top("head_w", jnp.bfloat16),
        "head_b": stack_top("head_b", jnp.float32, add_row=True),
        "fc_w": jnp.stack([params["fc_pair_w"], params["fc_A_w"],
                           params["fc_B_w"], params["fc_scene_w"]]
                          ).astype(jnp.bfloat16),
        "fc_b": jnp.stack([params["fc_pair_b"], params["fc_A_b"],
                           params["fc_B_b"], params["fc_scene_b"]]
                          ).reshape(N_FC, 1, SIZE).astype(jnp.float32),
    }
    return packed


# ----------------------------------------------------------------------------
# Forward pass
# ----------------------------------------------------------------------------
def _extract_patches(img_nchw):
    """NCHW -> (B, N_PATCH, PATCH*PATCH*C): conv with kernel==stride==PATCH."""
    # TODO(synk): patch extraction is a one-time XLA reshape/transpose on the
    # raw input images (not between pallas_calls).
    B = img_nchw.shape[0]
    x = jnp.transpose(img_nchw, (0, 2, 3, 1))           # NCHW -> NHWC
    hp = IMG // PATCH
    x = x.reshape(B, hp, PATCH, hp, PATCH, IN_CH)
    x = x.transpose(0, 1, 3, 2, 4, 5).reshape(B, N_PATCH, PATCH_DIM)
    return x


def person_pair_forward(params, pair, person_a, person_b, bbox, full_im):
    B = pair.shape[0]
    packed = pack_person_pair_params(params)

    # Flatten the 4 image streams into one batch of 4B images.
    imgs = jnp.concatenate([pair, person_a, person_b, full_im], axis=0)
    patches = _extract_patches(imgs).astype(jnp.bfloat16)        # (4B, 16, 192)

    # backbone index per image: pair->0, person_a & person_b->1 (shared), scene->2
    bidx = jnp.array([0] * B + [1] * (2 * B) + [2] * B, dtype=jnp.int32)
    # fc-head index per image: fc_pair, fc_A, fc_B, fc_scene
    fidx = jnp.array([0] * B + [1] * B + [2] * B + [3] * B, dtype=jnp.int32)

    feats = fused_vit_forward(packed, patches, bidx, fidx)       # (4B, 512)
    box = linear(bbox, params["bboxes_w"], params["bboxes_b"])   # (B, 512)

    person_pair_feat = feats[0:B]
    person_1 = feats[B:2 * B]
    person_2 = feats[2 * B:3 * B]
    scene = feats[3 * B:4 * B]
    return (person_pair_feat, person_1, person_2, box, scene)


# ----------------------------------------------------------------------------
if __name__ == "__main__":
    key = jax.random.PRNGKey(0)
    k_param, k_in = jax.random.split(key)
    params = init_person_pair_params(k_param)

    B = 2
    ks = jax.random.split(k_in, 5)
    pair = jax.random.normal(ks[0], (B, IN_CH, IMG, IMG), jnp.float32)
    person_a = jax.random.normal(ks[1], (B, IN_CH, IMG, IMG), jnp.float32)
    person_b = jax.random.normal(ks[2], (B, IN_CH, IMG, IMG), jnp.float32)
    bbox = jax.random.normal(ks[3], (B, 10), jnp.float32)
    full_im = jax.random.normal(ks[4], (B, IN_CH, IMG, IMG), jnp.float32)

    fwd = jax.jit(person_pair_forward)
    outs = jax.block_until_ready(fwd(params, pair, person_a, person_b, bbox, full_im))

    expected = [(B, SIZE)] * 5
    assert [tuple(o.shape) for o in outs] == expected, [o.shape for o in outs]
    assert all(bool(jnp.all(jnp.isfinite(o))) for o in outs)
    print("KERNEL_OK")
</pallas_src>

<mosaic_0001>
module attributes {stable_mosaic.version = 11 : i64} {
  func.func @_linear_kernel(%arg0: i32, %arg1: memref<2x10xf32, #tpu.memory_space<vmem>>, %arg2: memref<10x512xf32, #tpu.memory_space<vmem>>, %arg3: memref<1x512xf32, #tpu.memory_space<vmem>>, %arg4: memref<2x512xf32, #tpu.memory_space<vmem>>) attributes {dimension_semantics = [#tpu.dimension_semantics<arbitrary>], iteration_bounds = array<i64: 1>, scalar_prefetch = 0 : i64, scratch_operands = 0 : i64, tpu.core_type = #tpu.core_type<tc>, window_params = [{pipeline_mode = #tpu.pipeline_mode<synchronous>, transform_indices = @transform_0, window_bounds = array<i64: 2, 10>}, {pipeline_mode = #tpu.pipeline_mode<synchronous>, transform_indices = @transform_1, window_bounds = array<i64: 10, 512>}, {pipeline_mode = #tpu.pipeline_mode<synchronous>, transform_indices = @transform_2, window_bounds = array<i64: 1, 512>}, {pipeline_mode = #tpu.pipeline_mode<synchronous>, transform_indices = @transform_3, window_bounds = array<i64: 2, 512>}]} {
    %c0 = arith.constant 0 : index
    %c0_0 = arith.constant 0 : index
    %0 = vector.load %arg1[%c0, %c0_0] : memref<2x10xf32, #tpu.memory_space<vmem>>, vector<2x10xf32>
    %c0_1 = arith.constant 0 : index
    %c0_2 = arith.constant 0 : index
    %1 = vector.load %arg2[%c0_1, %c0_2] : memref<10x512xf32, #tpu.memory_space<vmem>>, vector<10x512xf32>
    %cst = arith.constant dense<0.000000e+00> : vector<2x512xf32>
    %2 = tpu.matmul %0, %1, %cst {dimension_numbers = #tpu.dot_dimension_numbers<[1], [0], [0], [1], [0, 0, 1, 1], [], []>} : vector<2x10xf32>, vector<10x512xf32>, vector<2x512xf32> -> vector<2x512xf32>
    %c0_3 = arith.constant 0 : index
    %c0_4 = arith.constant 0 : index
    %3 = vector.load %arg3[%c0_3, %c0_4] : memref<1x512xf32, #tpu.memory_space<vmem>>, vector<1x512xf32>
    %4 = vector.broadcast %3 : vector<1x512xf32> to vector<2x512xf32>
    %5 = arith.addf %2, %4 : vector<2x512xf32>
    %c0_5 = arith.constant 0 : index
    %c0_6 = arith.constant 0 : index
    %6 = vector.load %arg4[%c0_5, %c0_6] : memref<2x512xf32, #tpu.memory_space<vmem>>, vector<2x512xf32>
    tpu.vector_store %arg4[%c0_5, %c0_6], %5 {strides = array<i32>} : memref<2x512xf32, #tpu.memory_space<vmem>>, vector<2x512xf32>,
    return
  }
  func.func @transform_0(%arg0: i32) -> (i32, i32) {
    %c0_i32 = arith.constant 0 : i32
    %c0_i32_0 = arith.constant 0 : i32
    %c0_i32_1 = arith.constant 0 : i32
    return %c0_i32, %c0_i32_0 : i32, i32
  }
  func.func @transform_1(%arg0: i32) -> (i32, i32) {
    %c0_i32 = arith.constant 0 : i32
    %c0_i32_0 = arith.constant 0 : i32
    %c0_i32_1 = arith.constant 0 : i32
    return %c0_i32, %c0_i32_0 : i32, i32
  }
  func.func @transform_2(%arg0: i32) -> (i32, i32) {
    %c0_i32 = arith.constant 0 : i32
    %c0_i32_0 = arith.constant 0 : i32
    %c0_i32_1 = arith.constant 0 : i32
    return %c0_i32, %c0_i32_0 : i32, i32
  }
  func.func @transform_3(%arg0: i32) -> (i32, i32) {
    %c0_i32 = arith.constant 0 : i32
    %c0_i32_0 = arith.constant 0 : i32
    %c0_i32_1 = arith.constant 0 : i32
    return %c0_i32, %c0_i32_0 : i32, i32
  }
}

module attributes {stable_mosaic.version = 11 : i64} {
  func.func @_fused_vit_kernel(%arg0: i32, %arg1: memref<8xi32, #tpu.memory_space<smem>>, %arg2: memref<8xi32, #tpu.memory_space<smem>>, %arg3: memref<1x16x192xbf16, #tpu.memory_space<vmem>>, %arg4: memref<1x192x64xbf16, #tpu.memory_space<vmem>>, %arg5: memref<1x1x64xf32, #tpu.memory_space<vmem>>, %arg6: memref<1x1x64xf32, #tpu.memory_space<vmem>>, %arg7: memref<1x17x64xf32, #tpu.memory_space<vmem>>, %arg8: memref<1x2x1x64xf32, #tpu.memory_space<vmem>>, %arg9: memref<1x2x1x64xf32, #tpu.memory_space<vmem>>, %arg10: memref<1x2x64x192xbf16, #tpu.memory_space<vmem>>, %arg11: memref<1x2x1x192xf32, #tpu.memory_space<vmem>>, %arg12: memref<1x2x64x64xbf16, #tpu.memory_space<vmem>>, %arg13: memref<1x2x1x64xf32, #tpu.memory_space<vmem>>, %arg14: memref<1x2x1x64xf32, #tpu.memory_space<vmem>>, %arg15: memref<1x2x1x64xf32, #tpu.memory_space<vmem>>, %arg16: memref<1x2x64x256xbf16, #tpu.memory_space<vmem>>, %arg17: memref<1x2x1x256xf32, #tpu.memory_space<vmem>>, %arg18: memref<1x2x256x64xbf16, #tpu.memory_space<vmem>>, %arg19: memref<1x2x1x64xf32, #tpu.memory_space<vmem>>, %arg20: memref<1x1x64xf32, #tpu.memory_space<vmem>>, %arg21: memref<1x1x64xf32, #tpu.memory_space<vmem>>, %arg22: memref<1x64x1024xbf16, #tpu.memory_space<vmem>>, %arg23: memref<1x1x1024xf32, #tpu.memory_space<vmem>>, %arg24: memref<1x1024x512xbf16, #tpu.memory_space<vmem>>, %arg25: memref<1x1x512xf32, #tpu.memory_space<vmem>>, %arg26: memref<1x1x512xf32, #tpu.memory_space<vmem>>) attributes {dimension_semantics = [#tpu.dimension_semantics<parallel>], iteration_bounds = array<i64: 8>, scalar_prefetch = 2 : i64, scratch_operands = 0 : i64, tpu.core_type = #tpu.core_type<tc>, window_params = [{transform_indices = @transform_0, window_bounds = array<i64: 1, 16, 192>}, {transform_indices = @transform_1, window_bounds = array<i64: 1, 192, 64>}, {transform_indices = @transform_2, window_bounds = array<i64: 1, 1, 64>}, {transform_indices = @transform_3, window_bounds = array<i64: 1, 1, 64>}, {transform_indices = @transform_4, window_bounds = array<i64: 1, 17, 64>}, {transform_indices = @transform_5, window_bounds = array<i64: 1, 2, 1, 64>}, {transform_indices = @transform_6, window_bounds = array<i64: 1, 2, 1, 64>}, {transform_indices = @transform_7, window_bounds = array<i64: 1, 2, 64, 192>}, {transform_indices = @transform_8, window_bounds = array<i64: 1, 2, 1, 192>}, {transform_indices = @transform_9, window_bounds = array<i64: 1, 2, 64, 64>}, {transform_indices = @transform_10, window_bounds = array<i64: 1, 2, 1, 64>}, {transform_indices = @transform_11, window_bounds = array<i64: 1, 2, 1, 64>}, {transform_indices = @transform_12, window_bounds = array<i64: 1, 2, 1, 64>}, {transform_indices = @transform_13, window_bounds = array<i64: 1, 2, 64, 256>}, {transform_indices = @transform_14, window_bounds = array<i64: 1, 2, 1, 256>}, {transform_indices = @transform_15, window_bounds = array<i64: 1, 2, 256, 64>}, {transform_indices = @transform_16, window_bounds = array<i64: 1, 2, 1, 64>}, {transform_indices = @transform_17, window_bounds = array<i64: 1, 1, 64>}, {transform_indices = @transform_18, window_bounds = array<i64: 1, 1, 64>}, {transform_indices = @transform_19, window_bounds = array<i64: 1, 64, 1024>}, {transform_indices = @transform_20, window_bounds = array<i64: 1, 1, 1024>}, {transform_indices = @transform_21, window_bounds = array<i64: 1, 1024, 512>}, {transform_indices = @transform_22, window_bounds = array<i64: 1, 1, 512>}, {transform_indices = @transform_23, window_bounds = array<i64: 1, 1, 512>}]} {
    %c0 = arith.constant 0 : index
    %c0_0 = arith.constant 0 : index
    %c0_1 = arith.constant 0 : index
    %0 = vector.load %arg3[%c0, %c0_0, %c0_1] : memref<1x16x192xbf16, #tpu.memory_space<vmem>>, vector<1x16x192xbf16>
    %1 = vector.shape_cast %0 : vector<1x16x192xbf16> to vector<16x192xbf16>
    %c0_2 = arith.constant 0 : index
    %c0_3 = arith.constant 0 : index
    %c0_4 = arith.constant 0 : index
    %2 = vector.load %arg4[%c0_2, %c0_3, %c0_4] : memref<1x192x64xbf16, #tpu.memory_space<vmem>>, vector<1x192x64xbf16>
    %3 = vector.shape_cast %2 : vector<1x192x64xbf16> to vector<192x64xbf16>
    %cst = arith.constant dense<0.000000e+00> : vector<16x64xf32>
    %4 = tpu.matmul %1, %3, %cst {dimension_numbers = #tpu.dot_dimension_numbers<[1], [0], [0], [1], [0, 0, 1, 1], [], []>} : vector<16x192xbf16>, vector<192x64xbf16>, vector<16x64xf32> -> vector<16x64xf32>
    %c0_5 = arith.constant 0 : index
    %c0_6 = arith.constant 0 : index
    %c0_7 = arith.constant 0 : index
    %5 = vector.load %arg5[%c0_5, %c0_6, %c0_7] : memref<1x1x64xf32, #tpu.memory_space<vmem>>, vector<1x1x64xf32>
    %6 = vector.shape_cast %5 : vector<1x1x64xf32> to vector<1x64xf32>
    %7 = vector.broadcast %6 : vector<1x64xf32> to vector<16x64xf32>
    %8 = arith.addf %4, %7 : vector<16x64xf32>
    %c0_8 = arith.constant 0 : index
    %c0_9 = arith.constant 0 : index
    %c0_10 = arith.constant 0 : index
    %9 = vector.load %arg6[%c0_8, %c0_9, %c0_10] : memref<1x1x64xf32, #tpu.memory_space<vmem>>, vector<1x1x64xf32>
    %10 = vector.shape_cast %9 : vector<1x1x64xf32> to vector<1x64xf32>
    %11 = tpu.concatenate %10, %8 in 0 : vector<1x64xf32>, vector<16x64xf32> -> vector<17x64xf32>
    %c0_11 = arith.constant 0 : index
    %c0_12 = arith.constant 0 : index
    %c0_13 = arith.constant 0 : index
    %12 = vector.load %arg7[%c0_11, %c0_12, %c0_13] : memref<1x17x64xf32, #tpu.memory_space<vmem>>, vector<1x17x64xf32>
    %13 = vector.shape_cast %12 : vector<1x17x64xf32> to vector<17x64xf32>
    %14 = arith.addf %11, %13 : vector<17x64xf32>
    %c0_14 = arith.constant 0 : index
    %c0_15 = arith.constant 0 : index
    %c0_16 = arith.constant 0 : index
    %c0_17 = arith.constant 0 : index
    %15 = vector.load %arg8[%c0_14, %c0_15, %c0_16, %c0_17] : memref<1x2x1x64xf32, #tpu.memory_space<vmem>>, vector<1x1x1x64xf32>
    %16 = vector.shape_cast %15 : vector<1x1x1x64xf32> to vector<1x64xf32>
    %c0_18 = arith.constant 0 : index
    %c0_19 = arith.constant 0 : index
    %c0_20 = arith.constant 0 : index
    %c0_21 = arith.constant 0 : index
    %17 = vector.load %arg9[%c0_18, %c0_19, %c0_20, %c0_21] : memref<1x2x1x64xf32, #tpu.memory_space<vmem>>, vector<1x1x1x64xf32>
    %18 = vector.shape_cast %17 : vector<1x1x1x64xf32> to vector<1x64xf32>
    %cst_22 = arith.constant dense<0.000000e+00> : vector<17xf32>
    %19 = vector.multi_reduction <add>, %14, %cst_22 [1] : vector<17x64xf32> to vector<17xf32>
    %20 = vector.shape_cast %19 : vector<17xf32> to vector<17x1xf32>
    %cst_23 = arith.constant 6.400000e+01 : f32
    %21 = vector.broadcast %cst_23 : f32 to vector<17x1xf32>
    %22 = arith.divf %20, %21 : vector<17x1xf32>
    %23 = vector.broadcast %22 : vector<17x1xf32> to vector<17x64xf32>
    %24 = arith.subf %14, %23 : vector<17x64xf32>
    %25 = arith.mulf %24, %24 : vector<17x64xf32>
    %cst_24 = arith.constant dense<0.000000e+00> : vector<17xf32>
    %26 = vector.multi_reduction <add>, %25, %cst_24 [1] : vector<17x64xf32> to vector<17xf32>
    %27 = vector.shape_cast %26 : vector<17xf32> to vector<17x1xf32>
    %cst_25 = arith.constant 6.400000e+01 : f32
    %28 = vector.broadcast %cst_25 : f32 to vector<17x1xf32>
    %29 = arith.divf %27, %28 : vector<17x1xf32>
    %30 = vector.broadcast %22 : vector<17x1xf32> to vector<17x64xf32>
    %31 = arith.subf %14, %30 : vector<17x64xf32>
    %cst_26 = arith.constant 9.99999997E-7 : f32
    %32 = vector.broadcast %cst_26 : f32 to vector<17x1xf32>
    %33 = arith.addf %29, %32 : vector<17x1xf32>
    %34 = math.rsqrt %33 : vector<17x1xf32>
    %35 = vector.broadcast %34 : vector<17x1xf32> to vector<17x64xf32>
    %36 = arith.mulf %31, %35 : vector<17x64xf32>
    %37 = vector.broadcast %16 : vector<1x64xf32> to vector<17x64xf32>
    %38 = arith.mulf %36, %37 : vector<17x64xf32>
    %39 = vector.broadcast %18 : vector<1x64xf32> to vector<17x64xf32>
    %40 = arith.addf %38, %39 : vector<17x64xf32>
    %c0_27 = arith.constant 0 : index
    %c0_28 = arith.constant 0 : index
    %c0_29 = arith.constant 0 : index
    %c0_30 = arith.constant 0 : index
    %41 = vector.load %arg10[%c0_27, %c0_28, %c0_29, %c0_30] : memref<1x2x64x192xbf16, #tpu.memory_space<vmem>>, vector<1x1x64x192xbf16>
    %42 = vector.shape_cast %41 : vector<1x1x64x192xbf16> to vector<64x192xbf16>
    %43 = arith.truncf %40 : vector<17x64xf32> to vector<17x64xbf16>
    %cst_31 = arith.constant dense<0.000000e+00> : vector<17x192xf32>
    %44 = tpu.matmul %43, %42, %cst_31 {dimension_numbers = #tpu.dot_dimension_numbers<[1], [0], [0], [1], [0, 0, 1, 1], [], []>} : vector<17x64xbf16>, vector<64x192xbf16>, vector<17x192xf32> -> vector<17x192xf32>
    %c0_32 = arith.constant 0 : index
    %c0_33 = arith.constant 0 : index
    %c0_34 = arith.constant 0 : index
    %c0_35 = arith.constant 0 : index
    %45 = vector.load %arg11[%c0_32, %c0_33, %c0_34, %c0_35] : memref<1x2x1x192xf32, #tpu.memory_space<vmem>>, vector<1x1x1x192xf32>
    %46 = vector.shape_cast %45 : vector<1x1x1x192xf32> to vector<1x192xf32>
    %47 = vector.broadcast %46 : vector<1x192xf32> to vector<17x192xf32>
    %48 = arith.addf %44, %47 : vector<17x192xf32>
    %49 = vector.extract_strided_slice %48 {offsets = [0, 0], sizes = [17, 64], strides = [1, 1]} : vector<17x192xf32> to vector<17x64xf32>
    %50 = arith.truncf %49 : vector<17x64xf32> to vector<17x64xbf16>
    %51 = vector.extract_strided_slice %48 {offsets = [0, 64], sizes = [17, 64], strides = [1, 1]} : vector<17x192xf32> to vector<17x64xf32>
    %52 = arith.truncf %51 : vector<17x64xf32> to vector<17x64xbf16>
    %53 = vector.extract_strided_slice %48 {offsets = [0, 128], sizes = [17, 64], strides = [1, 1]} : vector<17x192xf32> to vector<17x64xf32>
    %54 = arith.truncf %53 : vector<17x64xf32> to vector<17x64xbf16>
    %55 = vector.extract_strided_slice %50 {offsets = [0, 0], sizes = [17, 16], strides = [1, 1]} : vector<17x64xbf16> to vector<17x16xbf16>
    %56 = vector.extract_strided_slice %52 {offsets = [0, 0], sizes = [17, 16], strides = [1, 1]} : vector<17x64xbf16> to vector<17x16xbf16>
    %cst_36 = arith.constant dense<0.000000e+00> : vector<17x17xf32>
    %57 = tpu.matmul %55, %56, %cst_36 {dimension_numbers = #tpu.dot_dimension_numbers<[1], [1], [0], [0], [0, 0, 1, 0], [], []>} : vector<17x16xbf16>, vector<17x16xbf16>, vector<17x17xf32> -> vector<17x17xf32>
    %cst_37 = arith.constant 2.500000e-01 : f32
    %58 = vector.broadcast %cst_37 : f32 to vector<17x17xf32>
    %59 = arith.mulf %57, %58 : vector<17x17xf32>
    %cst_38 = arith.constant dense<0xFF800000> : vector<17xf32>
    %60 = vector.multi_reduction <maximumf>, %59, %cst_38 [1] : vector<17x17xf32> to vector<17xf32>
    %cst_39 = arith.constant 0xFF800000 : f32
    %61 = vector.broadcast %cst_39 : f32 to vector<17xf32>
    %62 = arith.maximumf %61, %60 : vector<17xf32>
    %63 = vector.shape_cast %62 : vector<17xf32> to vector<17x1xf32>
    %64 = vector.broadcast %63 : vector<17x1xf32> to vector<17x17xf32>
    %65 = arith.subf %59, %64 : vector<17x17xf32>
    %66 = math.exp %65 : vector<17x17xf32>
    %cst_40 = arith.constant dense<0.000000e+00> : vector<17xf32>
    %67 = vector.multi_reduction <add>, %66, %cst_40 [1] : vector<17x17xf32> to vector<17xf32>
    %68 = vector.shape_cast %67 : vector<17xf32> to vector<17x1xf32>
    %69 = vector.broadcast %68 : vector<17x1xf32> to vector<17x17xf32>
    %70 = arith.divf %66, %69 : vector<17x17xf32>
    %71 = vector.extract_strided_slice %54 {offsets = [0, 0], sizes = [17, 16], strides = [1, 1]} : vector<17x64xbf16> to vector<17x16xbf16>
    %72 = arith.truncf %70 : vector<17x17xf32> to vector<17x17xbf16>
    %cst_41 = arith.constant dense<0.000000e+00> : vector<17x16xf32>
    %73 = tpu.matmul %72, %71, %cst_41 {dimension_numbers = #tpu.dot_dimension_numbers<[1], [0], [0], [1], [0, 0, 1, 1], [], []>} : vector<17x17xbf16>, vector<17x16xbf16>, vector<17x16xf32> -> vector<17x16xf32>
    %74 = vector.extract_strided_slice %50 {offsets = [0, 16], sizes = [17, 16], strides = [1, 1]} : vector<17x64xbf16> to vector<17x16xbf16>
    %75 = vector.extract_strided_slice %52 {offsets = [0, 16], sizes = [17, 16], strides = [1, 1]} : vector<17x64xbf16> to vector<17x16xbf16>
    %cst_42 = arith.constant dense<0.000000e+00> : vector<17x17xf32>
    %76 = tpu.matmul %74, %75, %cst_42 {dimension_numbers = #tpu.dot_dimension_numbers<[1], [1], [0], [0], [0, 0, 1, 0], [], []>} : vector<17x16xbf16>, vector<17x16xbf16>, vector<17x17xf32> -> vector<17x17xf32>
    %cst_43 = arith.constant 2.500000e-01 : f32
    %77 = vector.broadcast %cst_43 : f32 to vector<17x17xf32>
    %78 = arith.mulf %76, %77 : vector<17x17xf32>
    %cst_44 = arith.constant dense<0xFF800000> : vector<17xf32>
    %79 = vector.multi_reduction <maximumf>, %78, %cst_44 [1] : vector<17x17xf32> to vector<17xf32>
    %cst_45 = arith.constant 0xFF800000 : f32
    %80 = vector.broadcast %cst_45 : f32 to vector<17xf32>
    %81 = arith.maximumf %80, %79 : vector<17xf32>
    %82 = vector.shape_cast %81 : vector<17xf32> to vector<17x1xf32>
    %83 = vector.broadcast %82 : vector<17x1xf32> to vector<17x17xf32>
    %84 = arith.subf %78, %83 : vector<17x17xf32>
    %85 = math.exp %84 : vector<17x17xf32>
    %cst_46 = arith.constant dense<0.000000e+00> : vector<17xf32>
    %86 = vector.multi_reduction <add>, %85, %cst_46 [1] : vector<17x17xf32> to vector<17xf32>
    %87 = vector.shape_cast %86 : vector<17xf32> to vector<17x1xf32>
    %88 = vector.broadcast %87 : vector<17x1xf32> to vector<17x17xf32>
    %89 = arith.divf %85, %88 : vector<17x17xf32>
    %90 = vector.extract_strided_slice %54 {offsets = [0, 16], sizes = [17, 16], strides = [1, 1]} : vector<17x64xbf16> to vector<17x16xbf16>
    %91 = arith.truncf %89 : vector<17x17xf32> to vector<17x17xbf16>
    %cst_47 = arith.constant dense<0.000000e+00> : vector<17x16xf32>
    %92 = tpu.matmul %91, %90, %cst_47 {dimension_numbers = #tpu.dot_dimension_numbers<[1], [0], [0], [1], [0, 0, 1, 1], [], []>} : vector<17x17xbf16>, vector<17x16xbf16>, vector<17x16xf32> -> vector<17x16xf32>
    %93 = vector.extract_strided_slice %50 {offsets = [0, 32], sizes = [17, 16], strides = [1, 1]} : vector<17x64xbf16> to vector<17x16xbf16>
    %94 = vector.extract_strided_slice %52 {offsets = [0, 32], sizes = [17, 16], strides = [1, 1]} : vector<17x64xbf16> to vector<17x16xbf16>
    %cst_48 = arith.constant dense<0.000000e+00> : vector<17x17xf32>
    %95 = tpu.matmul %93, %94, %cst_48 {dimension_numbers = #tpu.dot_dimension_numbers<[1], [1], [0], [0], [0, 0, 1, 0], [], []>} : vector<17x16xbf16>, vector<17x16xbf16>, vector<17x17xf32> -> vector<17x17xf32>
    %cst_49 = arith.constant 2.500000e-01 : f32
    %96 = vector.broadcast %cst_49 : f32 to vector<17x17xf32>
    %97 = arith.mulf %95, %96 : vector<17x17xf32>
    %cst_50 = arith.constant dense<0xFF800000> : vector<17xf32>
    %98 = vector.multi_reduction <maximumf>, %97, %cst_50 [1] : vector<17x17xf32> to vector<17xf32>
    %cst_51 = arith.constant 0xFF800000 : f32
    %99 = vector.broadcast %cst_51 : f32 to vector<17xf32>
    %100 = arith.maximumf %99, %98 : vector<17xf32>
    %101 = vector.shape_cast %100 : vector<17xf32> to vector<17x1xf32>
    %102 = vector.broadcast %101 : vector<17x1xf32> to vector<17x17xf32>
    %103 = arith.subf %97, %102 : vector<17x17xf32>
    %104 = math.exp %103 : vector<17x17xf32>
    %cst_52 = arith.constant dense<0.000000e+00> : vector<17xf32>
    %105 = vector.multi_reduction <add>, %104, %cst_52 [1] : vector<17x17xf32> to vector<17xf32>
    %106 = vector.shape_cast %105 : vector<17xf32> to vector<17x1xf32>
    %107 = vector.broadcast %106 : vector<17x1xf32> to vector<17x17xf32>
    %108 = arith.divf %104, %107 : vector<17x17xf32>
    %109 = vector.extract_strided_slice %54 {offsets = [0, 32], sizes = [17, 16], strides = [1, 1]} : vector<17x64xbf16> to vector<17x16xbf16>
    %110 = arith.truncf %108 : vector<17x17xf32> to vector<17x17xbf16>
    %cst_53 = arith.constant dense<0.000000e+00> : vector<17x16xf32>
    %111 = tpu.matmul %110, %109, %cst_53 {dimension_numbers = #tpu.dot_dimension_numbers<[1], [0], [0], [1], [0, 0, 1, 1], [], []>} : vector<17x17xbf16>, vector<17x16xbf16>, vector<17x16xf32> -> vector<17x16xf32>
    %112 = vector.extract_strided_slice %50 {offsets = [0, 48], sizes = [17, 16], strides = [1, 1]} : vector<17x64xbf16> to vector<17x16xbf16>
    %113 = vector.extract_strided_slice %52 {offsets = [0, 48], sizes = [17, 16], strides = [1, 1]} : vector<17x64xbf16> to vector<17x16xbf16>
    %cst_54 = arith.constant dense<0.000000e+00> : vector<17x17xf32>
    %114 = tpu.matmul %112, %113, %cst_54 {dimension_numbers = #tpu.dot_dimension_numbers<[1], [1], [0], [0], [0, 0, 1, 0], [], []>} : vector<17x16xbf16>, vector<17x16xbf16>, vector<17x17xf32> -> vector<17x17xf32>
    %cst_55 = arith.constant 2.500000e-01 : f32
    %115 = vector.broadcast %cst_55 : f32 to vector<17x17xf32>
    %116 = arith.mulf %114, %115 : vector<17x17xf32>
    %cst_56 = arith.constant dense<0xFF800000> : vector<17xf32>
    %117 = vector.multi_reduction <maximumf>, %116, %cst_56 [1] : vector<17x17xf32> to vector<17xf32>
    %cst_57 = arith.constant 0xFF800000 : f32
    %118 = vector.broadcast %cst_57 : f32 to vector<17xf32>
    %119 = arith.maximumf %118, %117 : vector<17xf32>
    %120 = vector.shape_cast %119 : vector<17xf32> to vector<17x1xf32>
    %121 = vector.broadcast %120 : vector<17x1xf32> to vector<17x17xf32>
    %122 = arith.subf %116, %121 : vector<17x17xf32>
    %123 = math.exp %122 : vector<17x17xf32>
    %cst_58 = arith.constant dense<0.000000e+00> : vector<17xf32>
    %124 = vector.multi_reduction <add>, %123, %cst_58 [1] : vector<17x17xf32> to vector<17xf32>
    %125 = vector.shape_cast %124 : vector<17xf32> to vector<17x1xf32>
    %126 = vector.broadcast %125 : vector<17x1xf32> to vector<17x17xf32>
    %127 = arith.divf %123, %126 : vector<17x17xf32>
    %128 = vector.extract_strided_slice %54 {offsets = [0, 48], sizes = [17, 16], strides = [1, 1]} : vector<17x64xbf16> to vector<17x16xbf16>
    %129 = arith.truncf %127 : vector<17x17xf32> to vector<17x17xbf16>
    %cst_59 = arith.constant dense<0.000000e+00> : vector<17x16xf32>
    %130 = tpu.matmul %129, %128, %cst_59 {dimension_numbers = #tpu.dot_dimension_numbers<[1], [0], [0], [1], [0, 0, 1, 1], [], []>} : vector<17x17xbf16>, vector<17x16xbf16>, vector<17x16xf32> -> vector<17x16xf32>
    %131 = tpu.concatenate %73, %92, %111, %130 in 1 : vector<17x16xf32>, vector<17x16xf32>, vector<17x16xf32>, vector<17x16xf32> -> vector<17x64xf32>
    %c0_60 = arith.constant 0 : index
    %c0_61 = arith.constant 0 : index
    %c0_62 = arith.constant 0 : index
    %c0_63 = arith.constant 0 : index
    %132 = vector.load %arg12[%c0_60, %c0_61, %c0_62, %c0_63] : memref<1x2x64x64xbf16, #tpu.memory_space<vmem>>, vector<1x1x64x64xbf16>
    %133 = vector.shape_cast %132 : vector<1x1x64x64xbf16> to vector<64x64xbf16>
    %134 = arith.truncf %131 : vector<17x64xf32> to vector<17x64xbf16>
    %cst_64 = arith.constant dense<0.000000e+00> : vector<17x64xf32>
    %135 = tpu.matmul %134, %133, %cst_64 {dimension_numbers = #tpu.dot_dimension_numbers<[1], [0], [0], [1], [0, 0, 1, 1], [], []>} : vector<17x64xbf16>, vector<64x64xbf16>, vector<17x64xf32> -> vector<17x64xf32>
    %136 = arith.addf %14, %135 : vector<17x64xf32>
    %c0_65 = arith.constant 0 : index
    %c0_66 = arith.constant 0 : index
    %c0_67 = arith.constant 0 : index
    %c0_68 = arith.constant 0 : index
    %137 = vector.load %arg13[%c0_65, %c0_66, %c0_67, %c0_68] : memref<1x2x1x64xf32, #tpu.memory_space<vmem>>, vector<1x1x1x64xf32>
    %138 = vector.shape_cast %137 : vector<1x1x1x64xf32> to vector<1x64xf32>
    %139 = vector.broadcast %138 : vector<1x64xf32> to vector<17x64xf32>
    %140 = arith.addf %136, %139 : vector<17x64xf32>
    %c0_69 = arith.constant 0 : index
    %c0_70 = arith.constant 0 : index
    %c0_71 = arith.constant 0 : index
    %c0_72 = arith.constant 0 : index
    %141 = vector.load %arg14[%c0_69, %c0_70, %c0_71, %c0_72] : memref<1x2x1x64xf32, #tpu.memory_space<vmem>>, vector<1x1x1x64xf32>
    %142 = vector.shape_cast %141 : vector<1x1x1x64xf32> to vector<1x64xf32>
    %c0_73 = arith.constant 0 : index
    %c0_74 = arith.constant 0 : index
    %c0_75 = arith.constant 0 : index
    %c0_76 = arith.constant 0 : index
    %143 = vector.load %arg15[%c0_73, %c0_74, %c0_75, %c0_76] : memref<1x2x1x64xf32, #tpu.memory_space<vmem>>, vector<1x1x1x64xf32>
    %144 = vector.shape_cast %143 : vector<1x1x1x64xf32> to vector<1x64xf32>
    %cst_77 = arith.constant dense<0.000000e+00> : vector<17xf32>
    %145 = vector.multi_reduction <add>, %140, %cst_77 [1] : vector<17x64xf32> to vector<17xf32>
    %146 = vector.shape_cast %145 : vector<17xf32> to vector<17x1xf32>
    %cst_78 = arith.constant 6.400000e+01 : f32
    %147 = vector.broadcast %cst_78 : f32 to vector<17x1xf32>
    %148 = arith.divf %146, %147 : vector<17x1xf32>
    %149 = vector.broadcast %148 : vector<17x1xf32> to vector<17x64xf32>
    %150 = arith.subf %140, %149 : vector<17x64xf32>
    %151 = arith.mulf %150, %150 : vector<17x64xf32>
    %cst_79 = arith.constant dense<0.000000e+00> : vector<17xf32>
    %152 = vector.multi_reduction <add>, %151, %cst_79 [1] : vector<17x64xf32> to vector<17xf32>
    %153 = vector.shape_cast %152 : vector<17xf32> to vector<17x1xf32>
    %cst_80 = arith.constant 6.400000e+01 : f32
    %154 = vector.broadcast %cst_80 : f32 to vector<17x1xf32>
    %155 = arith.divf %153, %154 : vector<17x1xf32>
    %156 = vector.broadcast %148 : vector<17x1xf32> to vector<17x64xf32>
    %157 = arith.subf %140, %156 : vector<17x64xf32>
    %cst_81 = arith.constant 9.99999997E-7 : f32
    %158 = vector.broadcast %cst_81 : f32 to vector<17x1xf32>
    %159 = arith.addf %155, %158 : vector<17x1xf32>
    %160 = math.rsqrt %159 : vector<17x1xf32>
    %161 = vector.broadcast %160 : vector<17x1xf32> to vector<17x64xf32>
    %162 = arith.mulf %157, %161 : vector<17x64xf32>
    %163 = vector.broadcast %142 : vector<1x64xf32> to vector<17x64xf32>
    %164 = arith.mulf %162, %163 : vector<17x64xf32>
    %165 = vector.broadcast %144 : vector<1x64xf32> to vector<17x64xf32>
    %166 = arith.addf %164, %165 : vector<17x64xf32>
    %c0_82 = arith.constant 0 : index
    %c0_83 = arith.constant 0 : index
    %c0_84 = arith.constant 0 : index
    %c0_85 = arith.constant 0 : index
    %167 = vector.load %arg16[%c0_82, %c0_83, %c0_84, %c0_85] : memref<1x2x64x256xbf16, #tpu.memory_space<vmem>>, vector<1x1x64x256xbf16>
    %168 = vector.shape_cast %167 : vector<1x1x64x256xbf16> to vector<64x256xbf16>
    %169 = arith.truncf %166 : vector<17x64xf32> to vector<17x64xbf16>
    %cst_86 = arith.constant dense<0.000000e+00> : vector<17x256xf32>
    %170 = tpu.matmul %169, %168, %cst_86 {dimension_numbers = #tpu.dot_dimension_numbers<[1], [0], [0], [1], [0, 0, 1, 1], [], []>} : vector<17x64xbf16>, vector<64x256xbf16>, vector<17x256xf32> -> vector<17x256xf32>
    %c0_87 = arith.constant 0 : index
    %c0_88 = arith.constant 0 : index
    %c0_89 = arith.constant 0 : index
    %c0_90 = arith.constant 0 : index
    %171 = vector.load %arg17[%c0_87, %c0_88, %c0_89, %c0_90] : memref<1x2x1x256xf32, #tpu.memory_space<vmem>>, vector<1x1x1x256xf32>
    %172 = vector.shape_cast %171 : vector<1x1x1x256xf32> to vector<1x256xf32>
    %173 = vector.broadcast %172 : vector<1x256xf32> to vector<17x256xf32>
    %174 = arith.addf %170, %173 : vector<17x256xf32>
    %175 = arith.mulf %174, %174 : vector<17x256xf32>
    %176 = arith.mulf %174, %175 : vector<17x256xf32>
    %cst_91 = arith.constant 4.471500e-02 : f32
    %177 = vector.broadcast %cst_91 : f32 to vector<17x256xf32>
    %178 = arith.mulf %177, %176 : vector<17x256xf32>
    %179 = arith.addf %174, %178 : vector<17x256xf32>
    %cst_92 = arith.constant 0.797884583 : f32
    %180 = vector.broadcast %cst_92 : f32 to vector<17x256xf32>
    %181 = arith.mulf %180, %179 : vector<17x256xf32>
    %182 = math.tanh %181 : vector<17x256xf32>
    %cst_93 = arith.constant 1.000000e+00 : f32
    %183 = vector.broadcast %cst_93 : f32 to vector<17x256xf32>
    %184 = arith.addf %183, %182 : vector<17x256xf32>
    %cst_94 = arith.constant 5.000000e-01 : f32
    %185 = vector.broadcast %cst_94 : f32 to vector<17x256xf32>
    %186 = arith.mulf %185, %184 : vector<17x256xf32>
    %187 = arith.mulf %174, %186 : vector<17x256xf32>
    %c0_95 = arith.constant 0 : index
    %c0_96 = arith.constant 0 : index
    %c0_97 = arith.constant 0 : index
    %c0_98 = arith.constant 0 : index
    %188 = vector.load %arg18[%c0_95, %c0_96, %c0_97, %c0_98] : memref<1x2x256x64xbf16, #tpu.memory_space<vmem>>, vector<1x1x256x64xbf16>
    %189 = vector.shape_cast %188 : vector<1x1x256x64xbf16> to vector<256x64xbf16>
    %190 = arith.truncf %187 : vector<17x256xf32> to vector<17x256xbf16>
    %cst_99 = arith.constant dense<0.000000e+00> : vector<17x64xf32>
    %191 = tpu.matmul %190, %189, %cst_99 {dimension_numbers = #tpu.dot_dimension_numbers<[1], [0], [0], [1], [0, 0, 1, 1], [], []>} : vector<17x256xbf16>, vector<256x64xbf16>, vector<17x64xf32> -> vector<17x64xf32>
    %c0_100 = arith.constant 0 : index
    %c0_101 = arith.constant 0 : index
    %c0_102 = arith.constant 0 : index
    %c0_103 = arith.constant 0 : index
    %192 = vector.load %arg19[%c0_100, %c0_101, %c0_102, %c0_103] : memref<1x2x1x64xf32, #tpu.memory_space<vmem>>, vector<1x1x1x64xf32>
    %193 = vector.shape_cast %192 : vector<1x1x1x64xf32> to vector<1x64xf32>
    %194 = vector.broadcast %193 : vector<1x64xf32> to vector<17x64xf32>
    %195 = arith.addf %191, %194 : vector<17x64xf32>
    %196 = arith.addf %140, %195 : vector<17x64xf32>
    %c0_104 = arith.constant 0 : index
    %c1 = arith.constant 1 : index
    %c0_105 = arith.constant 0 : index
    %c0_106 = arith.constant 0 : index
    %197 = vector.load %arg8[%c0_104, %c1, %c0_105, %c0_106] : memref<1x2x1x64xf32, #tpu.memory_space<vmem>>, vector<1x1x1x64xf32>
    %198 = vector.shape_cast %197 : vector<1x1x1x64xf32> to vector<1x64xf32>
    %c0_107 = arith.constant 0 : index
    %c1_108 = arith.constant 1 : index
    %c0_109 = arith.constant 0 : index
    %c0_110 = arith.constant 0 : index
    %199 = vector.load %arg9[%c0_107, %c1_108, %c0_109, %c0_110] : memref<1x2x1x64xf32, #tpu.memory_space<vmem>>, vector<1x1x1x64xf32>
    %200 = vector.shape_cast %199 : vector<1x1x1x64xf32> to vector<1x64xf32>
    %cst_111 = arith.constant dense<0.000000e+00> : vector<17xf32>
    %201 = vector.multi_reduction <add>, %196, %cst_111 [1] : vector<17x64xf32> to vector<17xf32>
    %202 = vector.shape_cast %201 : vector<17xf32> to vector<17x1xf32>
    %cst_112 = arith.constant 6.400000e+01 : f32
    %203 = vector.broadcast %cst_112 : f32 to vector<17x1xf32>
    %204 = arith.divf %202, %203 : vector<17x1xf32>
    %205 = vector.broadcast %204 : vector<17x1xf32> to vector<17x64xf32>
    %206 = arith.subf %196, %205 : vector<17x64xf32>
    %207 = arith.mulf %206, %206 : vector<17x64xf32>
    %cst_113 = arith.constant dense<0.000000e+00> : vector<17xf32>
    %208 = vector.multi_reduction <add>, %207, %cst_113 [1] : vector<17x64xf32> to vector<17xf32>
    %209 = vector.shape_cast %208 : vector<17xf32> to vector<17x1xf32>
    %cst_114 = arith.constant 6.400000e+01 : f32
    %210 = vector.broadcast %cst_114 : f32 to vector<17x1xf32>
    %211 = arith.divf %209, %210 : vector<17x1xf32>
    %212 = vector.broadcast %204 : vector<17x1xf32> to vector<17x64xf32>
    %213 = arith.subf %196, %212 : vector<17x64xf32>
    %cst_115 = arith.constant 9.99999997E-7 : f32
    %214 = vector.broadcast %cst_115 : f32 to vector<17x1xf32>
    %215 = arith.addf %211, %214 : vector<17x1xf32>
    %216 = math.rsqrt %215 : vector<17x1xf32>
    %217 = vector.broadcast %216 : vector<17x1xf32> to vector<17x64xf32>
    %218 = arith.mulf %213, %217 : vector<17x64xf32>
    %219 = vector.broadcast %198 : vector<1x64xf32> to vector<17x64xf32>
    %220 = arith.mulf %218, %219 : vector<17x64xf32>
    %221 = vector.broadcast %200 : vector<1x64xf32> to vector<17x64xf32>
    %222 = arith.addf %220, %221 : vector<17x64xf32>
    %c0_116 = arith.constant 0 : index
    %c1_117 = arith.constant 1 : index
    %c0_118 = arith.constant 0 : index
    %c0_119 = arith.constant 0 : index
    %223 = vector.load %arg10[%c0_116, %c1_117, %c0_118, %c0_119] : memref<1x2x64x192xbf16, #tpu.memory_space<vmem>>, vector<1x1x64x192xbf16>
    %224 = vector.shape_cast %223 : vector<1x1x64x192xbf16> to vector<64x192xbf16>
    %225 = arith.truncf %222 : vector<17x64xf32> to vector<17x64xbf16>
    %cst_120 = arith.constant dense<0.000000e+00> : vector<17x192xf32>
    %226 = tpu.matmul %225, %224, %cst_120 {dimension_numbers = #tpu.dot_dimension_numbers<[1], [0], [0], [1], [0, 0, 1, 1], [], []>} : vector<17x64xbf16>, vector<64x192xbf16>, vector<17x192xf32> -> vector<17x192xf32>
    %c0_121 = arith.constant 0 : index
    %c1_122 = arith.constant 1 : index
    %c0_123 = arith.constant 0 : index
    %c0_124 = arith.constant 0 : index
    %227 = vector.load %arg11[%c0_121, %c1_122, %c0_123, %c0_124] : memref<1x2x1x192xf32, #tpu.memory_space<vmem>>, vector<1x1x1x192xf32>
    %228 = vector.shape_cast %227 : vector<1x1x1x192xf32> to vector<1x192xf32>
    %229 = vector.broadcast %228 : vector<1x192xf32> to vector<17x192xf32>
    %230 = arith.addf %226, %229 : vector<17x192xf32>
    %231 = vector.extract_strided_slice %230 {offsets = [0, 0], sizes = [17, 64], strides = [1, 1]} : vector<17x192xf32> to vector<17x64xf32>
    %232 = arith.truncf %231 : vector<17x64xf32> to vector<17x64xbf16>
    %233 = vector.extract_strided_slice %230 {offsets = [0, 64], sizes = [17, 64], strides = [1, 1]} : vector<17x192xf32> to vector<17x64xf32>
    %234 = arith.truncf %233 : vector<17x64xf32> to vector<17x64xbf16>
    %235 = vector.extract_strided_slice %230 {offsets = [0, 128], sizes = [17, 64], strides = [1, 1]} : vector<17x192xf32> to vector<17x64xf32>
    %236 = arith.truncf %235 : vector<17x64xf32> to vector<17x64xbf16>
    %237 = vector.extract_strided_slice %232 {offsets = [0, 0], sizes = [17, 16], strides = [1, 1]} : vector<17x64xbf16> to vector<17x16xbf16>
    %238 = vector.extract_strided_slice %234 {offsets = [0, 0], sizes = [17, 16], strides = [1, 1]} : vector<17x64xbf16> to vector<17x16xbf16>
    %cst_125 = arith.constant dense<0.000000e+00> : vector<17x17xf32>
    %239 = tpu.matmul %237, %238, %cst_125 {dimension_numbers = #tpu.dot_dimension_numbers<[1], [1], [0], [0], [0, 0, 1, 0], [], []>} : vector<17x16xbf16>, vector<17x16xbf16>, vector<17x17xf32> -> vector<17x17xf32>
    %cst_126 = arith.constant 2.500000e-01 : f32
    %240 = vector.broadcast %cst_126 : f32 to vector<17x17xf32>
    %241 = arith.mulf %239, %240 : vector<17x17xf32>
    %cst_127 = arith.constant dense<0xFF800000> : vector<17xf32>
    %242 = vector.multi_reduction <maximumf>, %241, %cst_127 [1] : vector<17x17xf32> to vector<17xf32>
    %cst_128 = arith.constant 0xFF800000 : f32
    %243 = vector.broadcast %cst_128 : f32 to vector<17xf32>
    %244 = arith.maximumf %243, %242 : vector<17xf32>
    %245 = vector.shape_cast %244 : vector<17xf32> to vector<17x1xf32>
    %246 = vector.broadcast %245 : vector<17x1xf32> to vector<17x17xf32>
    %247 = arith.subf %241, %246 : vector<17x17xf32>
    %248 = math.exp %247 : vector<17x17xf32>
    %cst_129 = arith.constant dense<0.000000e+00> : vector<17xf32>
    %249 = vector.multi_reduction <add>, %248, %cst_129 [1] : vector<17x17xf32> to vector<17xf32>
    %250 = vector.shape_cast %249 : vector<17xf32> to vector<17x1xf32>
    %251 = vector.broadcast %250 : vector<17x1xf32> to vector<17x17xf32>
    %252 = arith.divf %248, %251 : vector<17x17xf32>
    %253 = vector.extract_strided_slice %236 {offsets = [0, 0], sizes = [17, 16], strides = [1, 1]} : vector<17x64xbf16> to vector<17x16xbf16>
    %254 = arith.truncf %252 : vector<17x17xf32> to vector<17x17xbf16>
    %cst_130 = arith.constant dense<0.000000e+00> : vector<17x16xf32>
    %255 = tpu.matmul %254, %253, %cst_130 {dimension_numbers = #tpu.dot_dimension_numbers<[1], [0], [0], [1], [0, 0, 1, 1], [], []>} : vector<17x17xbf16>, vector<17x16xbf16>, vector<17x16xf32> -> vector<17x16xf32>
    %256 = vector.extract_strided_slice %232 {offsets = [0, 16], sizes = [17, 16], strides = [1, 1]} : vector<17x64xbf16> to vector<17x16xbf16>
    %257 = vector.extract_strided_slice %234 {offsets = [0, 16], sizes = [17, 16], strides = [1, 1]} : vector<17x64xbf16> to vector<17x16xbf16>
    %cst_131 = arith.constant dense<0.000000e+00> : vector<17x17xf32>
    %258 = tpu.matmul %256, %257, %cst_131 {dimension_numbers = #tpu.dot_dimension_numbers<[1], [1], [0], [0], [0, 0, 1, 0], [], []>} : vector<17x16xbf16>, vector<17x16xbf16>, vector<17x17xf32> -> vector<17x17xf32>
    %cst_132 = arith.constant 2.500000e-01 : f32
    %259 = vector.broadcast %cst_132 : f32 to vector<17x17xf32>
    %260 = arith.mulf %258, %259 : vector<17x17xf32>
    %cst_133 = arith.constant dense<0xFF800000> : vector<17xf32>
    %261 = vector.multi_reduction <maximumf>, %260, %cst_133 [1] : vector<17x17xf32> to vector<17xf32>
    %cst_134 = arith.constant 0xFF800000 : f32
    %262 = vector.broadcast %cst_134 : f32 to vector<17xf32>
    %263 = arith.maximumf %262, %261 : vector<17xf32>
    %264 = vector.shape_cast %263 : vector<17xf32> to vector<17x1xf32>
    %265 = vector.broadcast %264 : vector<17x1xf32> to vector<17x17xf32>
    %266 = arith.subf %260, %265 : vector<17x17xf32>
    %267 = math.exp %266 : vector<17x17xf32>
    %cst_135 = arith.constant dense<0.000000e+00> : vector<17xf32>
    %268 = vector.multi_reduction <add>, %267, %cst_135 [1] : vector<17x17xf32> to vector<17xf32>
    %269 = vector.shape_cast %268 : vector<17xf32> to vector<17x1xf32>
    %270 = vector.broadcast %269 : vector<17x1xf32> to vector<17x17xf32>
    %271 = arith.divf %267, %270 : vector<17x17xf32>
    %272 = vector.extract_strided_slice %236 {offsets = [0, 16], sizes = [17, 16], strides = [1, 1]} : vector<17x64xbf16> to vector<17x16xbf16>
    %273 = arith.truncf %271 : vector<17x17xf32> to vector<17x17xbf16>
    %cst_136 = arith.constant dense<0.000000e+00> : vector<17x16xf32>
    %274 = tpu.matmul %273, %272, %cst_136 {dimension_numbers = #tpu.dot_dimension_numbers<[1], [0], [0], [1], [0, 0, 1, 1], [], []>} : vector<17x17xbf16>, vector<17x16xbf16>, vector<17x16xf32> -> vector<17x16xf32>
    %275 = vector.extract_strided_slice %232 {offsets = [0, 32], sizes = [17, 16], strides = [1, 1]} : vector<17x64xbf16> to vector<17x16xbf16>
    %276 = vector.extract_strided_slice %234 {offsets = [0, 32], sizes = [17, 16], strides = [1, 1]} : vector<17x64xbf16> to vector<17x16xbf16>
    %cst_137 = arith.constant dense<0.000000e+00> : vector<17x17xf32>
    %277 = tpu.matmul %275, %276, %cst_137 {dimension_numbers = #tpu.dot_dimension_numbers<[1], [1], [0], [0], [0, 0, 1, 0], [], []>} : vector<17x16xbf16>, vector<17x16xbf16>, vector<17x17xf32> -> vector<17x17xf32>
    %cst_138 = arith.constant 2.500000e-01 : f32
    %278 = vector.broadcast %cst_138 : f32 to vector<17x17xf32>
    %279 = arith.mulf %277, %278 : vector<17x17xf32>
    %cst_139 = arith.constant dense<0xFF800000> : vector<17xf32>
    %280 = vector.multi_reduction <maximumf>, %279, %cst_139 [1] : vector<17x17xf32> to vector<17xf32>
    %cst_140 = arith.constant 0xFF800000 : f32
    %281 = vector.broadcast %cst_140 : f32 to vector<17xf32>
    %282 = arith.maximumf %281, %280 : vector<17xf32>
    %283 = vector.shape_cast %282 : vector<17xf32> to vector<17x1xf32>
    %284 = vector.broadcast %283 : vector<17x1xf32> to vector<17x17xf32>
    %285 = arith.subf %279, %284 : vector<17x17xf32>
    %286 = math.exp %285 : vector<17x17xf32>
    %cst_141 = arith.constant dense<0.000000e+00> : vector<17xf32>
    %287 = vector.multi_reduction <add>, %286, %cst_141 [1] : vector<17x17xf32> to vector<17xf32>
    %288 = vector.shape_cast %287 : vector<17xf32> to vector<17x1xf32>
    %289 = vector.broadcast %288 : vector<17x1xf32> to vector<17x17xf32>
    %290 = arith.divf %286, %289 : vector<17x17xf32>
    %291 = vector.extract_strided_slice %236 {offsets = [0, 32], sizes = [17, 16], strides = [1, 1]} : vector<17x64xbf16> to vector<17x16xbf16>
    %292 = arith.truncf %290 : vector<17x17xf32> to vector<17x17xbf16>
    %cst_142 = arith.constant dense<0.000000e+00> : vector<17x16xf32>
    %293 = tpu.matmul %292, %291, %cst_142 {dimension_numbers = #tpu.dot_dimension_numbers<[1], [0], [0], [1], [0, 0, 1, 1], [], []>} : vector<17x17xbf16>, vector<17x16xbf16>, vector<17x16xf32> -> vector<17x16xf32>
    %294 = vector.extract_strided_slice %232 {offsets = [0, 48], sizes = [17, 16], strides = [1, 1]} : vector<17x64xbf16> to vector<17x16xbf16>
    %295 = vector.extract_strided_slice %234 {offsets = [0, 48], sizes = [17, 16], strides = [1, 1]} : vector<17x64xbf16> to vector<17x16xbf16>
    %cst_143 = arith.constant dense<0.000000e+00> : vector<17x17xf32>
    %296 = tpu.matmul %294, %295, %cst_143 {dimension_numbers = #tpu.dot_dimension_numbers<[1], [1], [0], [0], [0, 0, 1, 0], [], []>} : vector<17x16xbf16>, vector<17x16xbf16>, vector<17x17xf32> -> vector<17x17xf32>
    %cst_144 = arith.constant 2.500000e-01 : f32
    %297 = vector.broadcast %cst_144 : f32 to vector<17x17xf32>
    %298 = arith.mulf %296, %297 : vector<17x17xf32>
    %cst_145 = arith.constant dense<0xFF800000> : vector<17xf32>
    %299 = vector.multi_reduction <maximumf>, %298, %cst_145 [1] : vector<17x17xf32> to vector<17xf32>
    %cst_146 = arith.constant 0xFF800000 : f32
    %300 = vector.broadcast %cst_146 : f32 to vector<17xf32>
    %301 = arith.maximumf %300, %299 : vector<17xf32>
    %302 = vector.shape_cast %301 : vector<17xf32> to vector<17x1xf32>
    %303 = vector.broadcast %302 : vector<17x1xf32> to vector<17x17xf32>
    %304 = arith.subf %298, %303 : vector<17x17xf32>
    %305 = math.exp %304 : vector<17x17xf32>
    %cst_147 = arith.constant dense<0.000000e+00> : vector<17xf32>
    %306 = vector.multi_reduction <add>, %305, %cst_147 [1] : vector<17x17xf32> to vector<17xf32>
    %307 = vector.shape_cast %306 : vector<17xf32> to vector<17x1xf32>
    %308 = vector.broadcast %307 : vector<17x1xf32> to vector<17x17xf32>
    %309 = arith.divf %305, %308 : vector<17x17xf32>
    %310 = vector.extract_strided_slice %236 {offsets = [0, 48], sizes = [17, 16], strides = [1, 1]} : vector<17x64xbf16> to vector<17x16xbf16>
    %311 = arith.truncf %309 : vector<17x17xf32> to vector<17x17xbf16>
    %cst_148 = arith.constant dense<0.000000e+00> : vector<17x16xf32>
    %312 = tpu.matmul %311, %310, %cst_148 {dimension_numbers = #tpu.dot_dimension_numbers<[1], [0], [0], [1], [0, 0, 1, 1], [], []>} : vector<17x17xbf16>, vector<17x16xbf16>, vector<17x16xf32> -> vector<17x16xf32>
    %313 = tpu.concatenate %255, %274, %293, %312 in 1 : vector<17x16xf32>, vector<17x16xf32>, vector<17x16xf32>, vector<17x16xf32> -> vector<17x64xf32>
    %c0_149 = arith.constant 0 : index
    %c1_150 = arith.constant 1 : index
    %c0_151 = arith.constant 0 : index
    %c0_152 = arith.constant 0 : index
    %314 = vector.load %arg12[%c0_149, %c1_150, %c0_151, %c0_152] : memref<1x2x64x64xbf16, #tpu.memory_space<vmem>>, vector<1x1x64x64xbf16>
    %315 = vector.shape_cast %314 : vector<1x1x64x64xbf16> to vector<64x64xbf16>
    %316 = arith.truncf %313 : vector<17x64xf32> to vector<17x64xbf16>
    %cst_153 = arith.constant dense<0.000000e+00> : vector<17x64xf32>
    %317 = tpu.matmul %316, %315, %cst_153 {dimension_numbers = #tpu.dot_dimension_numbers<[1], [0], [0], [1], [0, 0, 1, 1], [], []>} : vector<17x64xbf16>, vector<64x64xbf16>, vector<17x64xf32> -> vector<17x64xf32>
    %318 = arith.addf %196, %317 : vector<17x64xf32>
    %c0_154 = arith.constant 0 : index
    %c1_155 = arith.constant 1 : index
    %c0_156 = arith.constant 0 : index
    %c0_157 = arith.constant 0 : index
    %319 = vector.load %arg13[%c0_154, %c1_155, %c0_156, %c0_157] : memref<1x2x1x64xf32, #tpu.memory_space<vmem>>, vector<1x1x1x64xf32>
    %320 = vector.shape_cast %319 : vector<1x1x1x64xf32> to vector<1x64xf32>
    %321 = vector.broadcast %320 : vector<1x64xf32> to vector<17x64xf32>
    %322 = arith.addf %318, %321 : vector<17x64xf32>
    %c0_158 = arith.constant 0 : index
    %c1_159 = arith.constant 1 : index
    %c0_160 = arith.constant 0 : index
    %c0_161 = arith.constant 0 : index
    %323 = vector.load %arg14[%c0_158, %c1_159, %c0_160, %c0_161] : memref<1x2x1x64xf32, #tpu.memory_space<vmem>>, vector<1x1x1x64xf32>
    %324 = vector.shape_cast %323 : vector<1x1x1x64xf32> to vector<1x64xf32>
    %c0_162 = arith.constant 0 : index
    %c1_163 = arith.constant 1 : index
    %c0_164 = arith.constant 0 : index
    %c0_165 = arith.constant 0 : index
    %325 = vector.load %arg15[%c0_162, %c1_163, %c0_164, %c0_165] : memref<1x2x1x64xf32, #tpu.memory_space<vmem>>, vector<1x1x1x64xf32>
    %326 = vector.shape_cast %325 : vector<1x1x1x64xf32> to vector<1x64xf32>
    %cst_166 = arith.constant dense<0.000000e+00> : vector<17xf32>
    %327 = vector.multi_reduction <add>, %322, %cst_166 [1] : vector<17x64xf32> to vector<17xf32>
    %328 = vector.shape_cast %327 : vector<17xf32> to vector<17x1xf32>
    %cst_167 = arith.constant 6.400000e+01 : f32
    %329 = vector.broadcast %cst_167 : f32 to vector<17x1xf32>
    %330 = arith.divf %328, %329 : vector<17x1xf32>
    %331 = vector.broadcast %330 : vector<17x1xf32> to vector<17x64xf32>
    %332 = arith.subf %322, %331 : vector<17x64xf32>
    %333 = arith.mulf %332, %332 : vector<17x64xf32>
    %cst_168 = arith.constant dense<0.000000e+00> : vector<17xf32>
    %334 = vector.multi_reduction <add>, %333, %cst_168 [1] : vector<17x64xf32> to vector<17xf32>
    %335 = vector.shape_cast %334 : vector<17xf32> to vector<17x1xf32>
    %cst_169 = arith.constant 6.400000e+01 : f32
    %336 = vector.broadcast %cst_169 : f32 to vector<17x1xf32>
    %337 = arith.divf %335, %336 : vector<17x1xf32>
    %338 = vector.broadcast %330 : vector<17x1xf32> to vector<17x64xf32>
    %339 = arith.subf %322, %338 : vector<17x64xf32>
    %cst_170 = arith.constant 9.99999997E-7 : f32
    %340 = vector.broadcast %cst_170 : f32 to vector<17x1xf32>
    %341 = arith.addf %337, %340 : vector<17x1xf32>
    %342 = math.rsqrt %341 : vector<17x1xf32>
    %343 = vector.broadcast %342 : vector<17x1xf32> to vector<17x64xf32>
    %344 = arith.mulf %339, %343 : vector<17x64xf32>
    %345 = vector.broadcast %324 : vector<1x64xf32> to vector<17x64xf32>
    %346 = arith.mulf %344, %345 : vector<17x64xf32>
    %347 = vector.broadcast %326 : vector<1x64xf32> to vector<17x64xf32>
    %348 = arith.addf %346, %347 : vector<17x64xf32>
    %c0_171 = arith.constant 0 : index
    %c1_172 = arith.constant 1 : index
    %c0_173 = arith.constant 0 : index
    %c0_174 = arith.constant 0 : index
    %349 = vector.load %arg16[%c0_171, %c1_172, %c0_173, %c0_174] : memref<1x2x64x256xbf16, #tpu.memory_space<vmem>>, vector<1x1x64x256xbf16>
    %350 = vector.shape_cast %349 : vector<1x1x64x256xbf16> to vector<64x256xbf16>
    %351 = arith.truncf %348 : vector<17x64xf32> to vector<17x64xbf16>
    %cst_175 = arith.constant dense<0.000000e+00> : vector<17x256xf32>
    %352 = tpu.matmul %351, %350, %cst_175 {dimension_numbers = #tpu.dot_dimension_numbers<[1], [0], [0], [1], [0, 0, 1, 1], [], []>} : vector<17x64xbf16>, vector<64x256xbf16>, vector<17x256xf32> -> vector<17x256xf32>
    %c0_176 = arith.constant 0 : index
    %c1_177 = arith.constant 1 : index
    %c0_178 = arith.constant 0 : index
    %c0_179 = arith.constant 0 : index
    %353 = vector.load %arg17[%c0_176, %c1_177, %c0_178, %c0_179] : memref<1x2x1x256xf32, #tpu.memory_space<vmem>>, vector<1x1x1x256xf32>
    %354 = vector.shape_cast %353 : vector<1x1x1x256xf32> to vector<1x256xf32>
    %355 = vector.broadcast %354 : vector<1x256xf32> to vector<17x256xf32>
    %356 = arith.addf %352, %355 : vector<17x256xf32>
    %357 = arith.mulf %356, %356 : vector<17x256xf32>
    %358 = arith.mulf %356, %357 : vector<17x256xf32>
    %cst_180 = arith.constant 4.471500e-02 : f32
    %359 = vector.broadcast %cst_180 : f32 to vector<17x256xf32>
    %360 = arith.mulf %359, %358 : vector<17x256xf32>
    %361 = arith.addf %356, %360 : vector<17x256xf32>
    %cst_181 = arith.constant 0.797884583 : f32
    %362 = vector.broadcast %cst_181 : f32 to vector<17x256xf32>
    %363 = arith.mulf %362, %361 : vector<17x256xf32>
    %364 = math.tanh %363 : vector<17x256xf32>
    %cst_182 = arith.constant 1.000000e+00 : f32
    %365 = vector.broadcast %cst_182 : f32 to vector<17x256xf32>
    %366 = arith.addf %365, %364 : vector<17x256xf32>
    %cst_183 = arith.constant 5.000000e-01 : f32
    %367 = vector.broadcast %cst_183 : f32 to vector<17x256xf32>
    %368 = arith.mulf %367, %366 : vector<17x256xf32>
    %369 = arith.mulf %356, %368 : vector<17x256xf32>
    %c0_184 = arith.constant 0 : index
    %c1_185 = arith.constant 1 : index
    %c0_186 = arith.constant 0 : index
    %c0_187 = arith.constant 0 : index
    %370 = vector.load %arg18[%c0_184, %c1_185, %c0_186, %c0_187] : memref<1x2x256x64xbf16, #tpu.memory_space<vmem>>, vector<1x1x256x64xbf16>
    %371 = vector.shape_cast %370 : vector<1x1x256x64xbf16> to vector<256x64xbf16>
    %372 = arith.truncf %369 : vector<17x256xf32> to vector<17x256xbf16>
    %cst_188 = arith.constant dense<0.000000e+00> : vector<17x64xf32>
    %373 = tpu.matmul %372, %371, %cst_188 {dimension_numbers = #tpu.dot_dimension_numbers<[1], [0], [0], [1], [0, 0, 1, 1], [], []>} : vector<17x256xbf16>, vector<256x64xbf16>, vector<17x64xf32> -> vector<17x64xf32>
    %c0_189 = arith.constant 0 : index
    %c1_190 = arith.constant 1 : index
    %c0_191 = arith.constant 0 : index
    %c0_192 = arith.constant 0 : index
    %374 = vector.load %arg19[%c0_189, %c1_190, %c0_191, %c0_192] : memref<1x2x1x64xf32, #tpu.memory_space<vmem>>, vector<1x1x1x64xf32>
    %375 = vector.shape_cast %374 : vector<1x1x1x64xf32> to vector<1x64xf32>
    %376 = vector.broadcast %375 : vector<1x64xf32> to vector<17x64xf32>
    %377 = arith.addf %373, %376 : vector<17x64xf32>
    %378 = arith.addf %322, %377 : vector<17x64xf32>
    %c0_193 = arith.constant 0 : index
    %c0_194 = arith.constant 0 : index
    %c0_195 = arith.constant 0 : index
    %379 = vector.load %arg20[%c0_193, %c0_194, %c0_195] : memref<1x1x64xf32, #tpu.memory_space<vmem>>, vector<1x1x64xf32>
    %380 = vector.shape_cast %379 : vector<1x1x64xf32> to vector<1x64xf32>
    %c0_196 = arith.constant 0 : index
    %c0_197 = arith.constant 0 : index
    %c0_198 = arith.constant 0 : index
    %381 = vector.load %arg21[%c0_196, %c0_197, %c0_198] : memref<1x1x64xf32, #tpu.memory_space<vmem>>, vector<1x1x64xf32>
    %382 = vector.shape_cast %381 : vector<1x1x64xf32> to vector<1x64xf32>
    %cst_199 = arith.constant dense<0.000000e+00> : vector<17xf32>
    %383 = vector.multi_reduction <add>, %378, %cst_199 [1] : vector<17x64xf32> to vector<17xf32>
    %384 = vector.shape_cast %383 : vector<17xf32> to vector<17x1xf32>
    %cst_200 = arith.constant 6.400000e+01 : f32
    %385 = vector.broadcast %cst_200 : f32 to vector<17x1xf32>
    %386 = arith.divf %384, %385 : vector<17x1xf32>
    %387 = vector.broadcast %386 : vector<17x1xf32> to vector<17x64xf32>
    %388 = arith.subf %378, %387 : vector<17x64xf32>
    %389 = arith.mulf %388, %388 : vector<17x64xf32>
    %cst_201 = arith.constant dense<0.000000e+00> : vector<17xf32>
    %390 = vector.multi_reduction <add>, %389, %cst_201 [1] : vector<17x64xf32> to vector<17xf32>
    %391 = vector.shape_cast %390 : vector<17xf32> to vector<17x1xf32>
    %cst_202 = arith.constant 6.400000e+01 : f32
    %392 = vector.broadcast %cst_202 : f32 to vector<17x1xf32>
    %393 = arith.divf %391, %392 : vector<17x1xf32>
    %394 = vector.broadcast %386 : vector<17x1xf32> to vector<17x64xf32>
    %395 = arith.subf %378, %394 : vector<17x64xf32>
    %cst_203 = arith.constant 9.99999997E-7 : f32
    %396 = vector.broadcast %cst_203 : f32 to vector<17x1xf32>
    %397 = arith.addf %393, %396 : vector<17x1xf32>
    %398 = math.rsqrt %397 : vector<17x1xf32>
    %399 = vector.broadcast %398 : vector<17x1xf32> to vector<17x64xf32>
    %400 = arith.mulf %395, %399 : vector<17x64xf32>
    %401 = vector.broadcast %380 : vector<1x64xf32> to vector<17x64xf32>
    %402 = arith.mulf %400, %401 : vector<17x64xf32>
    %403 = vector.broadcast %382 : vector<1x64xf32> to vector<17x64xf32>
    %404 = arith.addf %402, %403 : vector<17x64xf32>
    %405 = vector.extract_strided_slice %404 {offsets = [0, 0], sizes = [1, 64], strides = [1, 1]} : vector<17x64xf32> to vector<1x64xf32>
    %c0_204 = arith.constant 0 : index
    %c0_205 = arith.constant 0 : index
    %c0_206 = arith.constant 0 : index
    %406 = vector.load %arg22[%c0_204, %c0_205, %c0_206] : memref<1x64x1024xbf16, #tpu.memory_space<vmem>>, vector<1x64x1024xbf16>
    %407 = vector.shape_cast %406 : vector<1x64x1024xbf16> to vector<64x1024xbf16>
    %408 = arith.truncf %405 : vector<1x64xf32> to vector<1x64xbf16>
    %cst_207 = arith.constant dense<0.000000e+00> : vector<1x1024xf32>
    %409 = tpu.matmul %408, %407, %cst_207 {dimension_numbers = #tpu.dot_dimension_numbers<[1], [0], [0], [1], [0, 0, 1, 1], [], []>} : vector<1x64xbf16>, vector<64x1024xbf16>, vector<1x1024xf32> -> vector<1x1024xf32>
    %c0_208 = arith.constant 0 : index
    %c0_209 = arith.constant 0 : index
    %c0_210 = arith.constant 0 : index
    %410 = vector.load %arg23[%c0_208, %c0_209, %c0_210] : memref<1x1x1024xf32, #tpu.memory_space<vmem>>, vector<1x1x1024xf32>
    %411 = vector.shape_cast %410 : vector<1x1x1024xf32> to vector<1x1024xf32>
    %412 = arith.addf %409, %411 : vector<1x1024xf32>
    %c0_211 = arith.constant 0 : index
    %c0_212 = arith.constant 0 : index
    %c0_213 = arith.constant 0 : index
    %413 = vector.load %arg24[%c0_211, %c0_212, %c0_213] : memref<1x1024x512xbf16, #tpu.memory_space<vmem>>, vector<1x1024x512xbf16>
    %414 = vector.shape_cast %413 : vector<1x1024x512xbf16> to vector<1024x512xbf16>
    %415 = arith.truncf %412 : vector<1x1024xf32> to vector<1x1024xbf16>
    %cst_214 = arith.constant dense<0.000000e+00> : vector<1x512xf32>
    %416 = tpu.matmul %415, %414, %cst_214 {dimension_numbers = #tpu.dot_dimension_numbers<[1], [0], [0], [1], [0, 0, 1, 1], [], []>} : vector<1x1024xbf16>, vector<1024x512xbf16>, vector<1x512xf32> -> vector<1x512xf32>
    %c0_215 = arith.constant 0 : index
    %c0_216 = arith.constant 0 : index
    %c0_217 = arith.constant 0 : index
    %417 = vector.load %arg25[%c0_215, %c0_216, %c0_217] : memref<1x1x512xf32, #tpu.memory_space<vmem>>, vector<1x1x512xf32>
    %418 = vector.shape_cast %417 : vector<1x1x512xf32> to vector<1x512xf32>
    %419 = arith.addf %416, %418 : vector<1x512xf32>
    %c0_218 = arith.constant 0 : index
    %c0_219 = arith.constant 0 : index
    %c0_220 = arith.constant 0 : index
    %420 = vector.load %arg26[%c0_218, %c0_219, %c0_220] : memref<1x1x512xf32, #tpu.memory_space<vmem>>, vector<1x1x512xf32>
    %421 = vector.shape_cast %420 : vector<1x1x512xf32> to vector<1x512xf32>
    %422 = vector.shape_cast %419 : vector<1x512xf32> to vector<1x1x512xf32>
    tpu.vector_store %arg26[%c0_218, %c0_219, %c0_220], %422 {strides = array<i32>} : memref<1x1x512xf32, #tpu.memory_space<vmem>>, vector<1x1x512xf32>,
    return
  }
  func.func @transform_0(%arg0: i32, %arg1: memref<8xi32, #tpu.memory_space<smem>>, %arg2: memref<8xi32, #tpu.memory_space<smem>>) -> (i32, i32, i32) {
    %c0_i32 = arith.constant 0 : i32
    %c0_i32_0 = arith.constant 0 : i32
    %c0_i32_1 = arith.constant 0 : i32
    return %arg0, %c0_i32, %c0_i32_0 : i32, i32, i32
  }
  func.func @transform_1(%arg0: i32, %arg1: memref<8xi32, #tpu.memory_space<smem>>, %arg2: memref<8xi32, #tpu.memory_space<smem>>) -> (i32, i32, i32) {
    %0 = arith.index_cast %arg0 : i32 to index
    %1 = memref.load %arg1[%0] : memref<8xi32, #tpu.memory_space<smem>>
    %c0_i32 = arith.constant 0 : i32
    %c0_i32_0 = arith.constant 0 : i32
    %c0_i32_1 = arith.constant 0 : i32
    return %1, %c0_i32, %c0_i32_0 : i32, i32, i32
  }
  func.func @transform_2(%arg0: i32, %arg1: memref<8xi32, #tpu.memory_space<smem>>, %arg2: memref<8xi32, #tpu.memory_space<smem>>) -> (i32, i32, i32) {
    %0 = arith.index_cast %arg0 : i32 to index
    %1 = memref.load %arg1[%0] : memref<8xi32, #tpu.memory_space<smem>>
    %c0_i32 = arith.constant 0 : i32
    %c0_i32_0 = arith.constant 0 : i32
    %c0_i32_1 = arith.constant 0 : i32
    return %1, %c0_i32, %c0_i32_0 : i32, i32, i32
  }
  func.func @transform_3(%arg0: i32, %arg1: memref<8xi32, #tpu.memory_space<smem>>, %arg2: memref<8xi32, #tpu.memory_space<smem>>) -> (i32, i32, i32) {
    %0 = arith.index_cast %arg0 : i32 to index
    %1 = memref.load %arg1[%0] : memref<8xi32, #tpu.memory_space<smem>>
    %c0_i32 = arith.constant 0 : i32
    %c0_i32_0 = arith.constant 0 : i32
    %c0_i32_1 = arith.constant 0 : i32
    return %1, %c0_i32, %c0_i32_0 : i32, i32, i32
  }
  func.func @transform_4(%arg0: i32, %arg1: memref<8xi32, #tpu.memory_space<smem>>, %arg2: memref<8xi32, #tpu.memory_space<smem>>) -> (i32, i32, i32) {
    %0 = arith.index_cast %arg0 : i32 to index
    %1 = memref.load %arg1[%0] : memref<8xi32, #tpu.memory_space<smem>>
    %c0_i32 = arith.constant 0 : i32
    %c0_i32_0 = arith.constant 0 : i32
    %c0_i32_1 = arith.constant 0 : i32
    return %1, %c0_i32, %c0_i32_0 : i32, i32, i32
  }
  func.func @transform_5(%arg0: i32, %arg1: memref<8xi32, #tpu.memory_space<smem>>, %arg2: memref<8xi32, #tpu.memory_space<smem>>) -> (i32, i32, i32, i32) {
    %0 = arith.index_cast %arg0 : i32 to index
    %1 = memref.load %arg1[%0] : memref<8xi32, #tpu.memory_space<smem>>
    %c0_i32 = arith.constant 0 : i32
    %c0_i32_0 = arith.constant 0 : i32
    %c0_i32_1 = arith.constant 0 : i32
    %c0_i32_2 = arith.constant 0 : i32
    return %1, %c0_i32, %c0_i32_0, %c0_i32_1 : i32, i32, i32, i32
  }
  func.func @transform_6(%arg0: i32, %arg1: memref<8xi32, #tpu.memory_space<smem>>, %arg2: memref<8xi32, #tpu.memory_space<smem>>) -> (i32, i32, i32, i32) {
    %0 = arith.index_cast %arg0 : i32 to index
    %1 = memref.load %arg1[%0] : memref<8xi32, #tpu.memory_space<smem>>
    %c0_i32 = arith.constant 0 : i32
    %c0_i32_0 = arith.constant 0 : i32
    %c0_i32_1 = arith.constant 0 : i32
    %c0_i32_2 = arith.constant 0 : i32
    return %1, %c0_i32, %c0_i32_0, %c0_i32_1 : i32, i32, i32, i32
  }
  func.func @transform_7(%arg0: i32, %arg1: memref<8xi32, #tpu.memory_space<smem>>, %arg2: memref<8xi32, #tpu.memory_space<smem>>) -> (i32, i32, i32, i32) {
    %0 = arith.index_cast %arg0 : i32 to index
    %1 = memref.load %arg1[%0] : memref<8xi32, #tpu.memory_space<smem>>
    %c0_i32 = arith.constant 0 : i32
    %c0_i32_0 = arith.constant 0 : i32
    %c0_i32_1 = arith.constant 0 : i32
    %c0_i32_2 = arith.constant 0 : i32
    return %1, %c0_i32, %c0_i32_0, %c0_i32_1 : i32, i32, i32, i32
  }
  func.func @transform_8(%arg0: i32, %arg1: memref<8xi32, #tpu.memory_space<smem>>, %arg2: memref<8xi32, #tpu.memory_space<smem>>) -> (i32, i32, i32, i32) {
    %0 = arith.index_cast %arg0 : i32 to index
    %1 = memref.load %arg1[%0] : memref<8xi32, #tpu.memory_space<smem>>
    %c0_i32 = arith.constant 0 : i32
    %c0_i32_0 = arith.constant 0 : i32
    %c0_i32_1 = arith.constant 0 : i32
    %c0_i32_2 = arith.constant 0 : i32
    return %1, %c0_i32, %c0_i32_0, %c0_i32_1 : i32, i32, i32, i32
  }
  func.func @transform_9(%arg0: i32, %arg1: memref<8xi32, #tpu.memory_space<smem>>, %arg2: memref<8xi32, #tpu.memory_space<smem>>) -> (i32, i32, i32, i32) {
    %0 = arith.index_cast %arg0 : i32 to index
    %1 = memref.load %arg1[%0] : memref<8xi32, #tpu.memory_space<smem>>
    %c0_i32 = arith.constant 0 : i32
    %c0_i32_0 = arith.constant 0 : i32
    %c0_i32_1 = arith.constant 0 : i32
    %c0_i32_2 = arith.constant 0 : i32
    return %1, %c0_i32, %c0_i32_0, %c0_i32_1 : i32, i32, i32, i32
  }
  func.func @transform_10(%arg0: i32, %arg1: memref<8xi32, #tpu.memory_space<smem>>, %arg2: memref<8xi32, #tpu.memory_space<smem>>) -> (i32, i32, i32, i32) {
    %0 = arith.index_cast %arg0 : i32 to index
    %1 = memref.load %arg1[%0] : memref<8xi32, #tpu.memory_space<smem>>
    %c0_i32 = arith.constant 0 : i32
    %c0_i32_0 = arith.constant 0 : i32
    %c0_i32_1 = arith.constant 0 : i32
    %c0_i32_2 = arith.constant 0 : i32
    return %1, %c0_i32, %c0_i32_0, %c0_i32_1 : i32, i32, i32, i32
  }
  func.func @transform_11(%arg0: i32, %arg1: memref<8xi32, #tpu.memory_space<smem>>, %arg2: memref<8xi32, #tpu.memory_space<smem>>) -> (i32, i32, i32, i32) {
    %0 = arith.index_cast %arg0 : i32 to index
    %1 = memref.load %arg1[%0] : memref<8xi32, #tpu.memory_space<smem>>
    %c0_i32 = arith.constant 0 : i32
    %c0_i32_0 = arith.constant 0 : i32
    %c0_i32_1 = arith.constant 0 : i32
    %c0_i32_2 = arith.constant 0 : i32
    return %1, %c0_i32, %c0_i32_0, %c0_i32_1 : i32, i32, i32, i32
  }
  func.func @transform_12(%arg0: i32, %arg1: memref<8xi32, #tpu.memory_space<smem>>, %arg2: memref<8xi32, #tpu.memory_space<smem>>) -> (i32, i32, i32, i32) {
    %0 = arith.index_cast %arg0 : i32 to index
    %1 = memref.load %arg1[%0] : memref<8xi32, #tpu.memory_space<smem>>
    %c0_i32 = arith.constant 0 : i32
    %c0_i32_0 = arith.constant 0 : i32
    %c0_i32_1 = arith.constant 0 : i32
    %c0_i32_2 = arith.constant 0 : i32
    return %1, %c0_i32, %c0_i32_0, %c0_i32_1 : i32, i32, i32, i32
  }
  func.func @transform_13(%arg0: i32, %arg1: memref<8xi32, #tpu.memory_space<smem>>, %arg2: memref<8xi32, #tpu.memory_space<smem>>) -> (i32, i32, i32, i32) {
    %0 = arith.index_cast %arg0 : i32 to index
    %1 = memref.load %arg1[%0] : memref<8xi32, #tpu.memory_space<smem>>
    %c0_i32 = arith.constant 0 : i32
    %c0_i32_0 = arith.constant 0 : i32
    %c0_i32_1 = arith.constant 0 : i32
    %c0_i32_2 = arith.constant 0 : i32
    return %1, %c0_i32, %c0_i32_0, %c0_i32_1 : i32, i32, i32, i32
  }
  func.func @transform_14(%arg0: i32, %arg1: memref<8xi32, #tpu.memory_space<smem>>, %arg2: memref<8xi32, #tpu.memory_space<smem>>) -> (i32, i32, i32, i32) {
    %0 = arith.index_cast %arg0 : i32 to index
    %1 = memref.load %arg1[%0] : memref<8xi32, #tpu.memory_space<smem>>
    %c0_i32 = arith.constant 0 : i32
    %c0_i32_0 = arith.constant 0 : i32
    %c0_i32_1 = arith.constant 0 : i32
    %c0_i32_2 = arith.constant 0 : i32
    return %1, %c0_i32, %c0_i32_0, %c0_i32_1 : i32, i32, i32, i32
  }
  func.func @transform_15(%arg0: i32, %arg1: memref<8xi32, #tpu.memory_space<smem>>, %arg2: memref<8xi32, #tpu.memory_space<smem>>) -> (i32, i32, i32, i32) {
    %0 = arith.index_cast %arg0 : i32 to index
    %1 = memref.load %arg1[%0] : memref<8xi32, #tpu.memory_space<smem>>
    %c0_i32 = arith.constant 0 : i32
    %c0_i32_0 = arith.constant 0 : i32
    %c0_i32_1 = arith.constant 0 : i32
    %c0_i32_2 = arith.constant 0 : i32
    return %1, %c0_i32, %c0_i32_0, %c0_i32_1 : i32, i32, i32, i32
  }
  func.func @transform_16(%arg0: i32, %arg1: memref<8xi32, #tpu.memory_space<smem>>, %arg2: memref<8xi32, #tpu.memory_space<smem>>) -> (i32, i32, i32, i32) {
    %0 = arith.index_cast %arg0 : i32 to index
    %1 = memref.load %arg1[%0] : memref<8xi32, #tpu.memory_space<smem>>
    %c0_i32 = arith.constant 0 : i32
    %c0_i32_0 = arith.constant 0 : i32
    %c0_i32_1 = arith.constant 0 : i32
    %c0_i32_2 = arith.constant 0 : i32
    return %1, %c0_i32, %c0_i32_0, %c0_i32_1 : i32, i32, i32, i32
  }
  func.func @transform_17(%arg0: i32, %arg1: memref<8xi32, #tpu.memory_space<smem>>, %arg2: memref<8xi32, #tpu.memory_space<smem>>) -> (i32, i32, i32) {
    %0 = arith.index_cast %arg0 : i32 to index
    %1 = memref.load %arg1[%0] : memref<8xi32, #tpu.memory_space<smem>>
    %c0_i32 = arith.constant 0 : i32
    %c0_i32_0 = arith.constant 0 : i32
    %c0_i32_1 = arith.constant 0 : i32
    return %1, %c0_i32, %c0_i32_0 : i32, i32, i32
  }
  func.func @transform_18(%arg0: i32, %arg1: memref<8xi32, #tpu.memory_space<smem>>, %arg2: memref<8xi32, #tpu.memory_space<smem>>) -> (i32, i32, i32) {
    %0 = arith.index_cast %arg0 : i32 to index
    %1 = memref.load %arg1[%0] : memref<8xi32, #tpu.memory_space<smem>>
    %c0_i32 = arith.constant 0 : i32
    %c0_i32_0 = arith.constant 0 : i32
    %c0_i32_1 = arith.constant 0 : i32
    return %1, %c0_i32, %c0_i32_0 : i32, i32, i32
  }
  func.func @transform_19(%arg0: i32, %arg1: memref<8xi32, #tpu.memory_space<smem>>, %arg2: memref<8xi32, #tpu.memory_space<smem>>) -> (i32, i32, i32) {
    %0 = arith.index_cast %arg0 : i32 to index
    %1 = memref.load %arg1[%0] : memref<8xi32, #tpu.memory_space<smem>>
    %c0_i32 = arith.constant 0 : i32
    %c0_i32_0 = arith.constant 0 : i32
    %c0_i32_1 = arith.constant 0 : i32
    return %1, %c0_i32, %c0_i32_0 : i32, i32, i32
  }
  func.func @transform_20(%arg0: i32, %arg1: memref<8xi32, #tpu.memory_space<smem>>, %arg2: memref<8xi32, #tpu.memory_space<smem>>) -> (i32, i32, i32) {
    %0 = arith.index_cast %arg0 : i32 to index
    %1 = memref.load %arg1[%0] : memref<8xi32, #tpu.memory_space<smem>>
    %c0_i32 = arith.constant 0 : i32
    %c0_i32_0 = arith.constant 0 : i32
    %c0_i32_1 = arith.constant 0 : i32
    return %1, %c0_i32, %c0_i32_0 : i32, i32, i32
  }
  func.func @transform_21(%arg0: i32, %arg1: memref<8xi32, #tpu.memory_space<smem>>, %arg2: memref<8xi32, #tpu.memory_space<smem>>) -> (i32, i32, i32) {
    %0 = arith.index_cast %arg0 : i32 to index
    %1 = memref.load %arg2[%0] : memref<8xi32, #tpu.memory_space<smem>>
    %c0_i32 = arith.constant 0 : i32
    %c0_i32_0 = arith.constant 0 : i32
    %c0_i32_1 = arith.constant 0 : i32
    return %1, %c0_i32, %c0_i32_0 : i32, i32, i32
  }
  func.func @transform_22(%arg0: i32, %arg1: memref<8xi32, #tpu.memory_space<smem>>, %arg2: memref<8xi32, #tpu.memory_space<smem>>) -> (i32, i32, i32) {
    %0 = arith.index_cast %arg0 : i32 to index
    %1 = memref.load %arg2[%0] : memref<8xi32, #tpu.memory_space<smem>>
    %c0_i32 = arith.constant 0 : i32
    %c0_i32_0 = arith.constant 0 : i32
    %c0_i32_1 = arith.constant 0 : i32
    return %1, %c0_i32, %c0_i32_0 : i32, i32, i32
  }
  func.func @transform_23(%arg0: i32, %arg1: memref<8xi32, #tpu.memory_space<smem>>, %arg2: memref<8xi32, #tpu.memory_space<smem>>) -> (i32, i32, i32) {
    %c0_i32 = arith.constant 0 : i32
    %c0_i32_0 = arith.constant 0 : i32
    %c0_i32_1 = arith.constant 0 : i32
    return %arg0, %c0_i32, %c0_i32_0 : i32, i32, i32
  }
}

</mosaic_0001>

<bundles_post_ra>
// kernel: person_pair_forward.3
= control target key start
LH: loop header
LB: loop body
LE: loop exit
PB: predicated region body
PF: predicated region fallthrough
CT: control target
= control target key end

     0   :  { %vm50_vm0 = vcmask 1041408   ;;  %vm288_vm1 = vmmov 1   ;;  %v289_v11 = vmov 0.0   ;;  %s366_s0 = inlined_call_operand.vmem [shape: f32[2,10], index: 0, kind: input, shape index: {}]   ;;  %s367_s1 = inlined_call_operand.vmem [shape: f32[10,512], index: 1, kind: input, shape index: {}]   ;;  %s368_s2 = inlined_call_operand.vmem [shape: f32[1,512], index: 2, kind: input, shape index: {}]   ;;  %s369_s3 = inlined_call_operand.hbm [shape: f32[2,512], index: 3, kind: output, shape index: {}]  }
   0x1   :  { %v17_v0 = vld [vmem:[%s367_s1 + $0x8] sm:$0xff]  ;;  %v19_v2 = vld [vmem:[%s367_s1 + $0x18] sm:$0xff]  ;;  %vm321_vm2 = vmpackc.low %vm50_vm0, %vm288_vm1  ;;  %127 = vmatprep.mubr.f32.mxu0 %v289_v11  ;;  %198 = vmatprep.mubr.f32.mxu1 %v289_v11 }
   0x2   :  { %v21_v1 = vld [vmem:[%s367_s1 + $0x28] sm:$0x3]  ;;  %v23_v5 = vld [vmem:[%s367_s1 + $0x38] sm:$0x3]  ;;  %v16_v6 = vld [vmem:[%s367_s1] sm:$0xff] }
   0x3   :  { %v248_v3 = vpack.c.bf16 %v21_v1, %v17_v0  ;;  %v254_v7 = vpack.c.bf16 %v23_v5, %v19_v2  ;;  %v20_v8 = vld [vmem:[%s367_s1 + $0x20] sm:$0x3]  ;;  %v18_v9 = vld [vmem:[%s367_s1 + $0x10] sm:$0xff] }
   0x4   :  { %v22_v10 = vld [vmem:[%s367_s1 + $0x30] sm:$0x3]  ;;  %v251_v12 = vpack.c.bf16 %v20_v8, %v16_v6 }
   0x5   :  { %250 = vmatprep.subr.msk.bf16.mxu0 %vm321_vm2, %v248_v3  ;;  %v257_v13 = vpack.c.bf16 %v22_v10, %v18_v9 }
   0x6   :  { %8 = vsyncpa [#allocation3], 0  ;;  %256 = vmatprep.subr.msk.bf16.mxu1 %vm321_vm2, %v254_v7  ;;  %253 = vmatpush1.bf16.msk.msra.mxu0 %vm321_vm2, %v251_v12  ;;  %v15_v14 = vld [vmem:[%s366_s0] sm:$0x3]  ;;  %vm46_vm3 = vcmask 80896   ;;  %v26_v15 = vlaneseq  ;;  %s291_s0 = smov [#allocation2]  }
   0x7   :  { %259 = vmatpush1.bf16.msk.msra.mxu1 %vm321_vm2, %v257_v13  ;;  %v24_v19 = vld [vmem:[%s368_s2] sm:$0xf]  ;;  %v290_v22 = vmov 1983009808   ;;  %s234_s2 = sshll.u32 %s291_s0, 4  ;;  %s235_s2 = int_to_ptr.vmem [resolvable:$true] %s234_s2 }
   0x8   :  { %v27_v16 = vshrl.u32 %v26_v15, 7  ;;  %v212_v23 = vunpack.c.l.s4 %v290_v22  ;;  %s264_s4 = scalar_lea.vmem %s235_s2, 128  ;;  %p269_p1 = scmp.lt.s32.totalorder %s235_s2, %s235_s2 }
   0x9   :  { %244 = vmatmul.mubr.msk.f32.vlgmr.msra.gmra.mrb[0].mxu0 %vm46_vm3, %v15_v14  ;;  %p265_p0 = scmp.ne.s32.totalorder %s235_s2, %s264_s4  ;;  %p270_p2 = scmp.lt.s32.totalorder %s264_s4, %s264_s4 }
   0xa   :  { %247 = vmatmul.mubr.msk.f32.vlgmr.msra.gmra.mrb[0].mxu1 %vm46_vm3, %v15_v14  ;;  %v28_v17 = vsub.s32 0, %v27_v16  ;;  %v36_v18 = vsub.s32 2, %v27_v16  ;;  %v32_v20 = vsub.s32 1, %v27_v16  ;;  %v40_v21 = vsub.s32 3, %v27_v16 }
   0xb   :  { %v213_v28 = vunpack.c.0.s8 %v212_v23  ;;  %p271_p3 = por %p270_p2, %p269_p1 }
   0xc   :  { %v29_v24 = vrot.slane %v24_v19, %v28_v17  ;;  %v37_v25 = vrot.slane %v24_v19, %v36_v18  ;;  %v33_v26 = vrot.slane %v24_v19, %v32_v20  ;;  %v41_v27 = vrot.slane %v24_v19, %v40_v21 }
   0xd   :  { %v216_v37 = vsub.s32 %v213_v28, %v27_v16  ;;  %p272_p4 = pnand %p271_p3, %p265_p0 }
  0xdc   :  { %v129_v29 = vpop.f32.mrb[0].mxu0 }
  0xdd   :  { %v200_v30 = vpop.f32.mrb[0].mxu1  ;;  %v130_v31 = vadd.f32 %v129_v29, %v29_v24  ;;  %v131_v33 = vpop.f32.mrb[1].mxu0 }
  0xde   :  { %v201_v32 = vadd.f32 %v200_v30, %v37_v25  ;;  %v202_v34 = vpop.f32.mrb[1].mxu1  ;;  %v132_v35 = vadd.f32 %v131_v33, %v33_v26 }
  0xdf   :  { %v203_v36 = vadd.f32 %v202_v34, %v41_v27 }
  0xe0   :  { %v209_v38 = vcombine.low %v130_v31, %v132_v35 }
  0xe1   :  { %v210_v39 = vcombine.low %v201_v32, %v203_v36 }
  0xe2   :  { %v217_v40 = vrot.slane %v209_v38, %v216_v37 }
  0xe3   :  { %v224_v41 = vrot.slane %v210_v39, %v216_v37 }
  0xe5   :  { %v225_v42 = vcombine.low %v217_v40, %v224_v41 }
  0xe7   :  { %227 = vst [vmem:[#allocation2] sm:$0xff] %v225_v42 }
  0xe8   :  { %275 = shalt.err (!%p272_p4)
}
  0xe9   :  { %s276_s7 = scalar_lea.hbm %s369_s3, 128 }
  0xea   :  { %p277_p5 = scmp.ne.s32.totalorder %s369_s3, %s276_s7  ;;  %p280_p6 = scmp.lt.u32.totalorder %s276_s7, %s369_s3 }
  0xec   :  { %p282_p7 = pnand %p280_p6, %p277_p5 }
  0xee   :  { %285 = shalt.err (!%p282_p7)
}
  0xef   :  { %237 = dma.vmem_to_hbm [thread:$0]  %s235_s2, 128, %s369_s3, [#allocation3]  }
  0xf0   :  { %286 = dma.done.wait [#allocation3], 128  }
  0xf1   :  { %287 = vsyncadd [#allocation3], 4294967168 }
  0xf2   :  { %241 = vsyncpa [#allocation3], 1 }

// kernel: person_pair_forward.2
= control target key start
LH: loop header
LB: loop body
LE: loop exit
PB: predicated region body
PF: predicated region fallthrough
CT: control target
= control target key end

     0   :  { %s9739_s0 = inlined_call_operand.vmem [shape: s32[8], index: 0, kind: input, shape index: {}]   ;;  %s9740_s2 = inlined_call_operand.vmem [shape: bf16[8,16,192], index: 2, kind: input, shape index: {}]   ;;  %s9741_s3 = inlined_call_operand.vmem [shape: bf16[3,192,64], index: 3, kind: input, shape index: {}]   ;;  %s9742_s4 = inlined_call_operand.vmem [shape: f32[3,1,64], index: 4, kind: input, shape index: {}]   ;;  %s9743_s5 = inlined_call_operand.vmem [shape: f32[3,1,64], index: 5, kind: input, shape index: {}]   ;;  %s9744_s6 = inlined_call_operand.vmem [shape: f32[3,17,64], index: 6, kind: input, shape index: {}]   ;;  %s9745_s7 = inlined_call_operand.vmem [shape: f32[3,2,1,64], index: 7, kind: input, shape index: {}]   ;;  %s9746_s8 = inlined_call_operand.vmem [shape: f32[3,2,1,64], index: 8, kind: input, shape index: {}]   ;;  %s9747_s9 = inlined_call_operand.vmem [shape: bf16[3,2,64,192], index: 9, kind: input, shape index: {}]   ;;  %s9748_s10 = inlined_call_operand.vmem [shape: f32[3,2,1,192], index: 10, kind: input, shape index: {}]   ;;  %s9749_s11 = inlined_call_operand.vmem [shape: bf16[3,2,64,64], index: 11, kind: input, shape index: {}]   ;;  %s9750_s12 = inlined_call_operand.vmem [shape: f32[3,2,1,64], index: 12, kind: input, shape index: {}]   ;;  %s9751_s13 = inlined_call_operand.vmem [shape: f32[3,2,1,64], index: 13, kind: input, shape index: {}]   ;;  %s9752_s14 = inlined_call_operand.vmem [shape: f32[3,2,1,64], index: 14, kind: input, shape index: {}]   ;;  %s9753_s15 = inlined_call_operand.vmem [shape: bf16[3,2,64,256], index: 15, kind: input, shape index: {}]   ;;  %s9754_s16 = inlined_call_operand.vmem [shape: f32[3,2,1,256], index: 16, kind: input, shape index: {}]   ;;  %s9755_s17 = inlined_call_operand.vmem [shape: bf16[3,2,256,64], index: 17, kind: input, shape index: {}]   ;;  %s9756_s18 = inlined_call_operand.vmem [shape: f32[3,2,1,64], index: 18, kind: input, shape index: {}]   ;;  %s9757_s19 = inlined_call_operand.vmem [shape: f32[3,1,64], index: 19, kind: input, shape index: {}]   ;;  %s9758_s20 = inlined_call_operand.vmem [shape: f32[3,1,64], index: 20, kind: input, shape index: {}]   ;;  %s9759_s21 = inlined_call_operand.vmem [shape: bf16[3,64,1024], index: 21, kind: input, shape index: {}]   ;;  %s9760_s22 = inlined_call_operand.vmem [shape: f32[3,1,1024], index: 22, kind: input, shape index: {}]   ;;  %s9761_s23 = inlined_call_operand.vmem [shape: bf16[4,1024,512], index: 23, kind: input, shape index: {}]   ;;  %s9762_s24 = inlined_call_operand.vmem [shape: f32[4,1,512], index: 24, kind: input, shape index: {}]   ;;  %s9763_s25 = inlined_call_operand.vmem [shape: f32[8,1,512], index: 25, kind: output, shape index: {}]   ;;  %s9764_s1 = inlined_call_operand.vmem [shape: s32[8], index: 1, kind: input, shape index: {}]  }
   0x1   :  { %9780 = sst [smem:[#allocation7_spill]] %s9739_s0 }
   0x2   :  { %9781 = sst [smem:[#allocation8_spill]] %s9740_s2 }
   0x3   :  { %9782 = sst [smem:[#allocation9_spill]] %s9741_s3 }
   0x4   :  { %9783 = sst [smem:[#allocation10_spill]] %s9742_s4  ;;  %s34_s4 = sshll.u32 %s9764_s1, 4  ;;  %s35_s4 = int_to_ptr.vmem [resolvable:$true] %s34_s4 }
   0x5   :  { %9784 = sst [smem:[#allocation11_spill]] %s9743_s5 }
   0x6   :  { %9785 = sst [smem:[#allocation12_spill]] %s9744_s6 }
   0x7   :  { %9786 = sst [smem:[#allocation13_spill]] %s9745_s7  ;;  %s9793_s7 = sld [smem:[#allocation7_spill]] }
   0x8   :  { %9787 = sst [smem:[#allocation14_spill]] %s9746_s8 }
   0x9   :  { %9788 = sst [smem:[#allocation15_spill]] %s9747_s9 }
   0xa   :  { %9789 = sst [smem:[#allocation16_spill]] %s9748_s10 }
   0xb   :  { %9790 = sst [smem:[#allocation17_spill]] %s9749_s11 }
   0xc   :  { %9791 = sst [smem:[#allocation18_spill]] %s9758_s20 }
   0xd   :  { %9792 = sst [smem:[#allocation19_spill]] %s9763_s25  ;;  %s30_s20 = sshll.u32 %s9793_s7, 4  ;;  %s31_s20 = int_to_ptr.vmem [resolvable:$true] %s30_s20 }
   0xe   :  { %s8508_s26 = scalar_lea.vmem %s31_s20, 16  ;;  %p8513_p1 = scmp.lt.s32.totalorder %s31_s20, %s31_s20 }
   0xf   :  { %p8509_p0 = scmp.ne.s32.totalorder %s31_s20, %s8508_s26  ;;  %p8514_p2 = scmp.lt.s32.totalorder %s8508_s26, %s8508_s26 }
  0x11   :  { %p8515_p3 = por %p8514_p2, %p8513_p1 }
  0x13   :  { %p8516_p4 = pnand %p8515_p3, %p8509_p0 }
  0x15   :  { %8519 = shalt.err (!%p8516_p4)  }
  0x16   :  { %s8542_s2 = smov [#allocation3]   ;;  %s8520_s9 = scalar_lea.vmem %s35_s4, 16 }
  0x17   :  { %33 = dma.vmem_to_smem %s31_s20, 16, %s8542_s2, [#allocation2] }
  0x18   :  { %p8521_p5 = scmp.ne.s32.totalorder %s35_s4, %s8520_s9  ;;  %p8525_p6 = scmp.lt.s32.totalorder %s35_s4, %s35_s4 }
  0x19   :  { %p8526_p7 = scmp.lt.s32.totalorder %s8520_s9, %s8520_s9 }
  0x1b   :  { %p8527_p8 = por %p8526_p7, %p8525_p6 }
  0x1d   :  { %p8528_p9 = pnand %p8527_p8, %p8521_p5 }
  0x1f   :  { %8531 = shalt.err (!%p8528_p9)  }
  0x20   :  { %s8543_s27 = smov [#allocation4]  }
  0x21   :  { %37 = dma.vmem_to_smem %s35_s4, 16, %s8543_s27, [#allocation2] }
  0x22   :  { %8536 = dma.done.wait [#allocation2], 32 }
  0x23   :  { %8537 = vsyncadd [#allocation2], 4294967264 }
  0x24   :  { %39 = sfence }
  0x25   :  { %s8689_s1 = smov 0  }
  0x26 LB: > { %9794 = sst [smem:[#allocation6_spill]] %s8540_s1  ;;  %s8695_s20 = sadd.s32 4294967295, %s8540_s1   ;;  %s8540_s1 = sphi %s8689_s1, %s45_s1  }
  0x27   : > { %p6957_p10 = scmp.ge.s32.totalorder %s8540_s1, 1  ;;  %p939_p11 = scmp.lt.s32.totalorder %s8540_s1, 9 }
  0x29   : > { %p940_p12 = pnand %p6957_p10, %p939_p11 }
  0x2a   : > { %s1121_s5 = sld [smem:[#allocation3 + %s8695_s20]] (!%p940_p12)  ;;  %p1116_p13 = scmp.lt.s32.totalorder (!%p940_p12), %s8695_s20, 7  ;;  %v8544_v0 = vmov (!%p940_p12), 0   ;;  %vm1376_vm0 = vcmask (!%p940_p12), 523264   ;;  %vm1424_vm1 = vcmask (!%p940_p12), 1040384   ;;  %vm1446_vm2 = vcmask (!%p940_p12), 516096  }
  0x2b   : > { %943 = sbr.rel (%p940_p12) target bundleno = 8644 (0x21c4), region = 112  ;;  %1380 = vmatprep.subr.bf16.mxu0 (!%p940_p12), %v8544_v0  ;;  %1599 = vmatprep.mubr.bf16.mxu1 (!%p940_p12), %v8544_v0  ;;  %s9795_s29 = sld [smem:[#allocation8_spill]] (!%p940_p12)  ;;  %vm1628_vm3 = vcmask (!%p940_p12), 130048   ;;  %vm1692_vm4 = vcmask (!%p940_p12), 138240   ;;  %vm1699_vm5 = vcmask (!%p940_p12), 131072   ;;  %vm2333_vm6 = vcmask (!%p940_p12), 261120  }
  0x2c   : > { %s9796_s4 = sld [smem:[#allocation9_spill]] (!%p940_p12)  ;;  %s9797_s6 = sld [smem:[#allocation10_spill]] (!%p940_p12)  ;;  %vm2337_vm7 = vcmask (!%p940_p12), 392192  }
  0x2d   : > { %s1128_s2 = sld [smem:[#allocation3 + %s8695_s20]] (!%p940_p12) }
  0x2e   : > { %s1138_s9 = sld [smem:[#allocation3 + %s8695_s20]] (!%p940_p12) }
  0x2f   : > { %s1133_s27 = sld [smem:[#allocation3 + %s8695_s20]] (!%p940_p12) }
  0x30   : > { %p1122_p0 = scmp.lt.s32.totalorder (!%p940_p12), %s1121_s5, 2  ;;  %s9799_s1 = sld [smem:[#allocation12_spill]] (!%p940_p12) }
  0x31   : > { %s9801_s30 = sld [smem:[#allocation13_spill]] (!%p940_p12)  ;;  %s9804_s11 = sld [smem:[#allocation17_spill]] (!%p940_p12) }
  0x32   : > { %s8704_s28 = scalar_select %p1116_p13, %s8695_s20, 7 }
  0x33   : > { %s9816_s5 = smov (!%p1122_p0, %s1121_s5), 2  ;;  %p1129_p1 = scmp.lt.s32.totalorder %s1128_s2, 2 }
  0x34   : > { %s7489_s10 = sshll.u32 %s8704_s28, 4  ;;  %s7824_s7 = smul.u32 96, %s9816_s5 }
  0x35   : > { %s8710_s3 = scalar_lea.vmem %s9795_s29, %s7489_s10  ;;  %p1139_p2 = scmp.lt.s32.totalorder %s1138_s9, 2 }
  0x36   : > { %v7889_v1 = vld [vmem:[%s8710_s3 + $0x4] ss:$8 sps:$4 sm:$0xff]   ;;  %s8717_s26 = scalar_lea.vmem %s9796_s4, %s7824_s7  ;;  %v7887_v14 = vld [vmem:[%s8710_s3] ss:$8 sps:$4 sm:$0xff]   ;;  %s9818_s2 = smov (!%p1129_p1, %s1128_s2), 2 }
  0x37   : > { %7000 = vmatprep.mubr.msk.bf16.mxu0 %vm1376_vm0, %v7889_v1  ;;  %v7875_v2 = vld [vmem:[%s8717_s26] sm:$0xff]   ;;  %v7876_v3 = vld [vmem:[%s8717_s26 + $0x8] sm:$0xff]   ;;  %v7877_v4 = vld [vmem:[%s8717_s26 + $0x10] sm:$0xff]   ;;  %p1134_p3 = scmp.lt.s32.totalorder %s1133_s27, 2  ;;  %s9820_s9 = smov (!%p1139_p2, %s1138_s9), 2 }
  0x38   : > { %1381 = vmatpush1.bf16.msra.mxu0 %v7875_v2  ;;  %v7878_v5 = vld [vmem:[%s8717_s26 + $0x18] sm:$0xff]   ;;  %v7879_v6 = vld [vmem:[%s8717_s26 + $0x20] sm:$0xff]   ;;  %v7880_v7 = vld [vmem:[%s8717_s26 + $0x28] sm:$0xff]   ;;  %s1131_s0 = scalar_lea.vmem %s9797_s6, %s9818_s2  ;;  %s7825_s29 = smul.u32 24, %s9820_s9 }
  0x39   : > { %1382 = vmatprep.subr.bf16.mxu0 %v8544_v0  ;;  %v7881_v8 = vld [vmem:[%s8717_s26 + $0x30] sm:$0xff]   ;;  %v7882_v9 = vld [vmem:[%s8717_s26 + $0x38] sm:$0xff]   ;;  %v7883_v10 = vld [vmem:[%s8717_s26 + $0x40] sm:$0xff]   ;;  %s9822_s27 = smov (!%p1134_p3, %s1133_s27), 2  ;;  %s9798_s3 = sld [smem:[#allocation11_spill]] }
  0x3a   : > { %v7884_v11 = vld [vmem:[%s8717_s26 + $0x48] sm:$0xff]   ;;  %v7885_v12 = vld [vmem:[%s8717_s26 + $0x50] sm:$0xff]   ;;  %v7886_v13 = vld [vmem:[%s8717_s26 + $0x58] sm:$0xff]   ;;  %s1143_s25 = scalar_lea.vmem %s9799_s1, %s7825_s29  ;;  %s1145_s10 = sld [smem:[#allocation3 + %s8695_s20]] }
  0x3b   : > { %v6985_v15 = vld [vmem:[%s1131_s0] ss:$0 sm:$0xff]  ;;  %v1434_v25 = vld [vmem:[%s1143_s25 + $0x10] sm:$0x1]  ;;  %v1433_v28 = vld [vmem:[%s1143_s25 + $0x8] sm:$0xff]  ;;  %s1151_s6 = sld [smem:[#allocation3 + %s8695_s20]] }
  0x3c   : > { %1383 = vmatpush1.bf16.msra.mxu0 %v7876_v3  ;;  %v1432_v24 = vld [vmem:[%s1143_s25] sm:$0xff]  ;;  %s1157_s25 = sld [smem:[#allocation3 + %s8695_s20]]  ;;  %s9776_s29 = smov 64  }
  0x3d   : > { %1384 = vmatprep.subr.bf16.mxu0 %v8544_v0  ;;  %s1164_s2 = sld [smem:[#allocation3 + %s8695_s20]]  ;;  %s9778_s7 = smov 48  }
  0x3e   : > { %s9772_s4 = smov 96   ;;  %s9768_s26 = smov 16  }
  0x3f   : > { %s1136_s8 = scalar_lea.vmem %s9798_s3, %s9822_s27  ;;  %s9800_s27 = sld [smem:[#allocation15_spill]] }
  0x40   : > { %1385 = vmatpush1.bf16.msra.mxu0 %v7877_v4  ;;  %v1421_v20 = vld [vmem:[%s1136_s8] sm:$0x1]  ;;  %p1146_p5 = scmp.lt.s32.totalorder %s1145_s10, 2 }
  0x41   : > { %1386 = vmatprep.subr.bf16.mxu0 %v8544_v0  ;;  %p1152_p6 = scmp.lt.s32.totalorder %s1151_s6, 2 }
  0x42   : > { %p1158_p4 = scmp.lt.s32.totalorder %s1157_s25, 2  ;;  %s9826_s10 = smov (!%p1146_p5, %s1145_s10), 2 }
  0x43   : > { %s6962_s0 = sshll.u32 %s9826_s10, 1  ;;  %s9828_s6 = smov (!%p1152_p6, %s1151_s6), 2 }
  0x44   : > { %1387 = vmatpush1.bf16.msra.mxu0 %v7878_v5  ;;  %s9824_s25 = smov (!%p1158_p4, %s1157_s25), 2  ;;  %s8798_s3 = scalar_lea.vmem %s9801_s30, %s6962_s0 }
  0x45   : > { %1388 = vmatprep.subr.bf16.mxu0 %v8544_v0  ;;  %s7490_s1 = sshll.u32 %s9824_s25, 7  ;;  %s6963_s8 = sshll.u32 %s9828_s6, 1 }
  0x46   : > { %s8783_s5 = scalar_lea.vmem %s9800_s27, %s7490_s1  ;;  %s9802_s25 = sld [smem:[#allocation14_spill]] }
  0x47   : > { %v7890_v51 = vld [vmem:[%s8783_s5 + $0x4] ss:$8 sps:$4 sm:$0xff]   ;;  %v7892_v52 = vld [vmem:[%s8783_s5] ss:$8 sps:$4 sm:$0xff]   ;;  %v7893_v53 = vld [vmem:[%s8783_s5 + $0x14] ss:$8 sps:$4 sm:$0xff]  }
  0x48   : > { %1389 = vmatpush1.bf16.msra.mxu0 %v7879_v6  ;;  %1567 = vmatprep.subr.bf16.mxu1 %v7890_v51  ;;  %v7895_v54 = vld [vmem:[%s8783_s5 + $0x10] ss:$8 sps:$4 sm:$0xff]   ;;  %v7896_v55 = vld [vmem:[%s8783_s5 + $0x24] ss:$8 sps:$4 sm:$0xff]   ;;  %v7898_v56 = vld [vmem:[%s8783_s5 + $0x20] ss:$8 sps:$4 sm:$0xff]  }
  0x49   : > { %1390 = vmatprep.subr.bf16.mxu0 %v8544_v0  ;;  %1568 = vmatpush1.bf16.msra.mxu1 %v7892_v52  ;;  %v7899_v57 = vld [vmem:[%s8783_s5 + $0x34] ss:$8 sps:$4 sm:$0xff]   ;;  %v7901_v58 = vld [vmem:[%s8783_s5 + $0x30] ss:$8 sps:$4 sm:$0xff]   ;;  %p1165_p7 = scmp.lt.s32.totalorder %s1164_s2, 2  ;;  %s9803_s6 = sld [smem:[#allocation16_spill]] }
  0x4a   : > { %1569 = vmatprep.subr.bf16.mxu1 %v7893_v53  ;;  %v8850_v53 = vsel %vm1424_vm1, 65535, %v8544_v0  ;;  %s9774_s30 = smov 112  }
  0x4b   : > { %s9830_s2 = smov (!%p1165_p7, %s1164_s2), 2 }
  0x4c   : > { %1391 = vmatpush1.bf16.msra.mxu0 %v7880_v7  ;;  %v7001_v7 = vld [vmem:[%s8798_s3] ss:$0 sm:$0xff]  ;;  %s8804_s1 = scalar_lea.vmem %s9802_s25, %s6963_s8  ;;  %s6966_s9 = sshll.u32 %s9830_s2, 2 }
  0x4d   : > { %1392 = vmatprep.subr.bf16.mxu0 %v8544_v0  ;;  %1570 = vmatpush1.bf16.msra.mxu1 %v7895_v54  ;;  %s9770_s8 = smov 32   ;;  %s9766_s25 = smov 80  }
  0x4e   : > { %1571 = vmatprep.subr.bf16.mxu1 %v7896_v55  ;;  %s1170_s2 = sld [smem:[#allocation3 + %s8695_s20]] }
  0x4f   : > { %s8818_s0 = scalar_lea.vmem %s9803_s6, %s6966_s9 }
  0x50   : > { %1393 = vmatpush1.bf16.msra.mxu0 %v7881_v8 }
  0x51   : > { %1394 = vmatprep.subr.bf16.mxu0 %v8544_v0  ;;  %1572 = vmatpush1.bf16.msra.mxu1 %v7898_v56 }
  0x52   : > { %1573 = vmatprep.subr.bf16.mxu1 %v7899_v57 }
  0x54   : > { %1395 = vmatpush1.bf16.msra.mxu0 %v7882_v9  ;;  %p1171_p8 = scmp.lt.s32.totalorder %s1170_s2, 2 }
  0x55   : > { %1396 = vmatprep.subr.bf16.mxu0 %v8544_v0  ;;  %1574 = vmatpush1.bf16.msra.mxu1 %v7901_v58 }
  0x56   : > { %s9832_s2 = smov (!%p1171_p8, %s1170_s2), 2 }
  0x57   : > { %s7491_s9 = sshll.u32 %s9832_s2, 6  ;;  %s1177_s2 = sld [smem:[#allocation3 + %s8695_s20]] }
  0x58   : > { %1397 = vmatpush1.bf16.msra.mxu0 %v7883_v10  ;;  %s8973_s6 = scalar_lea.vmem %s9804_s11, %s7491_s9 }
  0x59   : > { %1398 = vmatprep.subr.bf16.mxu0 %v8544_v0 }
  0x5c   : > { %1399 = vmatpush1.bf16.msra.mxu0 %v7884_v11 }
  0x5d   : > { %1400 = vmatprep.subr.bf16.mxu0 %v8544_v0  ;;  %p1178_p9 = scmp.lt.s32.totalorder %s1177_s2, 2 }
  0x5f   : > { %s9834_s2 = smov (!%p1178_p9, %s1177_s2), 2 }
  0x60   : > { %1401 = vmatpush1.bf16.msra.mxu0 %v7885_v12  ;;  %v7002_v12 = vld [vmem:[%s8804_s1] ss:$0 sm:$0xff]  ;;  %s6969_s9 = sshll.u32 %s9834_s2, 1  ;;  %s1195_s2 = sld [smem:[#allocation3 + %s8695_s20]] }
  0x61   : > { %1402 = vmatprep.subr.bf16.mxu0 %v8544_v0 }
  0x64   : > { %1403 = vmatpush1.bf16.msra.mxu0 %v7886_v13 }
  0x66   : > { %p1196_p10 = scmp.lt.s32.totalorder %s1195_s2, 2 }
  0x67   : > { %1413 = vmatmul.mubr.bf16.vlgmr.msra.gmra.mrb[0].mxu0 %v7887_v14 }
  0x68   : > { %s9836_s2 = smov (!%p1196_p10, %s1195_s2), 2 }
 0x13a   : > { %v1414_v16 = vpop.f32.mrb[0].mxu0 }
 0x13b   : > { %v1415_v17 = vadd.f32 %v6985_v15, %v1414_v16  ;;  %v1416_v18 = vpop.f32.mrb[1].mxu0 }
 0x13c   : > { %v1417_v19 = vpop.f32.mrb[2].mxu0 }
 0x13d   : > { %v1425_v21 = vrot.slane %v1415_v17, 7  ;;  %v1418_v22 = vadd.f32 %v6985_v15, %v1417_v19  ;;  %v1419_v23 = vpop.f32.mrb[3].mxu0 }
 0x13f   : > { %v1426_v26 = vrot.slane %v1418_v22, 7  ;;  %v1431_v27 = vsel %vm1424_vm1, %v1421_v20, %v1425_v21 }
 0x140   : > { %v8756_v29 = vadd.f32 %v1432_v24, %v1431_v27  ;;  %v1509_v24 = vld [vmem:[%s8818_s0] sm:$0x3] }
 0x141   : > { %v1427_v30 = vsel %vm1424_vm1, %v1425_v21, %v1426_v26  ;;  %v8759_v31 = vadd.f32 %v1434_v25, %v1426_v26  ;;  %v1511_v21 = vlaneseq }
 0x142   : > { %v1440_v32 = vsel %vm1376_vm0, %v8756_v29, 0.0  ;;  %v8763_v33 = vadd.f32 %v1433_v28, %v1427_v30 }
 0x143   : > { %1441 = vadd.xlane.f32.xlu0 %v1440_v32  ;;  %v1447_v34 = vsel %vm1446_vm2, %v8759_v31, 0.0  ;;  %v8813_v22 = vshrl.u32 %v1511_v21, 7  ;;  %vm6645_vm8 = vcmp.lt.s32.totalorder %v1511_v21, 512 }
 0x144   : > { %1448 = vadd.xlane.f32.xlu1 %v1447_v34  ;;  %v1443_v35 = vsel %vm1376_vm0, %v8763_v33, 0.0 }
 0x145   : > { %v8821_v23 = vsub.s32 0, %v8813_v22  ;;  %v8825_v25 = vsub.s32 1, %v8813_v22 }
 0x147   : > { %1444 = vadd.xlane.f32.xlu0 %v1443_v35  ;;  %v1514_v26 = vrot.slane %v1509_v24, %v8821_v23  ;;  %v1518_v28 = vrot.slane %v1509_v24, %v8825_v25 }
 0x1d0   : > { %v1442_v36 = vpop.xlane.xlu0 %1441 }
 0x1d1   : > { %v1451_v37 = vmul.f32 0.015625, %v1442_v36  ;;  %v1449_v38 = vpop.xlane.xlu1 %1448 }
 0x1d2   : > { %v1453_v39 = vmul.f32 0.015625, %v1449_v38 }
 0x1d3   : > { %v1454_v40 = vsub.f32 %v8756_v29, %v1451_v37 }
 0x1d4   : > { %v8771_v41 = vsub.f32 %v8759_v31, %v1453_v39  ;;  %v1445_v42 = vpop.xlane.xlu0 %1444 }
 0x1d5   : > { %v1452_v43 = vmul.f32 0.015625, %v1445_v42  ;;  %v1457_v44 = vmul.f32 %v1454_v40, %v1454_v40 }
 0x1d6   : > { %v1459_v47 = vmul.f32 %v8771_v41, %v8771_v41 }
 0x1d7   : > { %v1455_v45 = vsub.f32 %v8763_v33, %v1452_v43  ;;  %v1460_v46 = vsel %vm1376_vm0, %v1457_v44, 0.0 }
 0x1d8   : > { %1461 = vadd.xlane.f32.xlu1 %v1460_v46  ;;  %v1466_v49 = vsel %vm1446_vm2, %v1459_v47, 0.0 }
 0x1d9   : > { %v1458_v48 = vmul.f32 %v1455_v45, %v1455_v45 }
 0x1db   : > { %v1463_v50 = vsel %vm1376_vm0, %v1458_v48, 0.0 }
 0x1dc   : > { %1467 = vadd.xlane.f32.xlu1 %v1466_v49  ;;  %1464 = vadd.xlane.f32.xlu0 %v1463_v50 }
 0x265   : > { %v1462_v59 = vpop.xlane.xlu1 %1461 }
 0x266   : > { %v1469_v60 = vmul.f32 0.015625, %v1462_v59 }
 0x268   : > { %v1472_v61 = vadd.f32 1e-06, %v1469_v60 }
 0x269   : > { %v1468_v62 = vpop.xlane.xlu1 %1467  ;;  %v1465_v63 = vpop.xlane.xlu0 %1464 }
 0x26a   : > { %8362 = vrsqrt.f32 %v1472_v61  ;;  %v1471_v1 = vmul.f32 0.015625, %v1468_v62  ;;  %v1470_v2 = vmul.f32 0.015625, %v1465_v63 }
 0x26c   : > { %v1474_v3 = vadd.f32 1e-06, %v1471_v1  ;;  %v1473_v4 = vadd.f32 1e-06, %v1470_v2 }
 0x26e   : > { %8364 = vrsqrt.f32 %v1474_v3 }
 0x26f   : > { %8366 = vrsqrt.f32 %v1473_v4 }
 0x274   : > { %v8363_v5 = vpop.eup %8362 }
 0x275   : > { %v1478_v6 = vmul.f32 %v8363_v5, %v1454_v40 }
 0x277   : > { %v1487_v11 = vmul.f32 %v7001_v7, %v1478_v6 }
 0x278   : > { %v8365_v8 = vpop.eup %8364 }
 0x279   : > { %v8367_v9 = vpop.eup %8366  ;;  %v1480_v14 = vmul.f32 %v8365_v8, %v8771_v41  ;;  %v1496_v15 = vadd.f32 %v7002_v12, %v1487_v11 }
 0x27a   : > { %v1479_v10 = vmul.f32 %v8367_v9, %v1455_v45 }
 0x27b   : > { %v1489_v18 = vmul.f32 %v7001_v7, %v1480_v14 }
 0x27c   : > { %v1488_v13 = vmul.f32 %v7001_v7, %v1479_v10 }
 0x27d   : > { %v1498_v19 = vadd.f32 %v7002_v12, %v1489_v18 }
 0x27e   : > { %v1497_v16 = vadd.f32 %v7002_v12, %v1488_v13 }
 0x27f   : > { %v1508_v20 = vpack.c.bf16 %v1498_v19, %v1498_v19 }
 0x280   : > { %v1507_v17 = vpack.c.bf16 %v1497_v16, %v1496_v15 }
 0x282   : > { %7011 = vmatmul.mubr.msk.bf16.vlgmr.msra.gmra.mrb[0].mxu1 %vm1376_vm0, %v1507_v17 }
 0x283   : > { %1609 = vmatprep.mubr.bf16.mxu1 %v8544_v0 }
 0x28a   : > { %7012 = vmatmul.mubr.msk.bf16.gmra.mrb[4].mxu1 %vm1376_vm0, %v1508_v20 }
 0x355   : > { %v1601_v27 = vpop.f32.mrb[0].mxu1 }
 0x356   : > { %v1603_v30 = vpop.f32.mrb[1].mxu1  ;;  %v1602_v34 = vadd.f32 %v1601_v27, %v1514_v26 }
 0x357   : > { %v1605_v32 = vpop.f32.mrb[2].mxu1  ;;  %v1604_v37 = vadd.f32 %v1603_v30, %v1518_v28 }
 0x358   : > { %v1606_v35 = vadd.f32 %v1605_v32, %v1514_v26  ;;  %v1607_v36 = vpop.f32.mrb[3].mxu1 }
 0x359   : > { %v1608_v38 = vadd.f32 %v1607_v36, %v1518_v28 }
 0x35a   : > { %v8829_v39 = vpack.c.bf16 %v1606_v35, %v1602_v34 }
 0x35b   : > { %v8831_v40 = vpack.c.bf16 %v1608_v38, %v1604_v37 }
 0x35c   : > { %1624 = vrot.lane.b32.xlu0 %v8829_v39, %s9776_s29  ;;  %7632 = vmatprep.mubr.msk.bf16.mxu1 %vm1628_vm3, %v8829_v39 }
 0x35d   : > { %v1611_v41 = vpop.f32.mrb[4].mxu1 }
 0x35e   : > { %v1612_v42 = vadd.f32 %v1611_v41, %v1514_v26  ;;  %v1613_v43 = vpop.f32.mrb[5].mxu1 }
 0x35f   : > { %v1615_v44 = vpop.f32.mrb[6].mxu1  ;;  %v1614_v50 = vadd.f32 %v1613_v43, %v1518_v28 }
 0x360   : > { %v8837_v45 = vpack.c.bf16 %v1612_v42, %v1612_v42  ;;  %v1616_v46 = vpop.f32.mrb[7].mxu1 }
 0x361   : > { %v8846_v52 = vpack.c.bf16 %v1614_v50, %v1614_v50 }
 0x362   : > { %1626 = vrot.lane.b32.xlu1 %v8837_v45, %s9776_s29  ;;  %s1208_s29 = sld [smem:[#allocation3 + %s8695_s20]] }
 0x363   : > { %v1738_v54 = vand.u32 %v8850_v53, %v8846_v52 }
 0x368   : > { %p1209_p13 = scmp.lt.s32.totalorder %s1208_s29, 2 }
 0x36a   : > { %s9842_s29 = smov (!%p1209_p13, %s1208_s29), 2 }
 0x3ce   : > { %v1625_v47 = vpop.permute.xlu0 %1624 }
 0x3cf   : > { %7808 = vmatprep.subr.msk.bf16.mxu1 %vm1628_vm3, %v1625_v47  ;;  %v1636_v48 = vsel %vm1628_vm3, %v1625_v47, 0 }
 0x3d0   : > { %7629 = vmatpush3.bf16.xpose.msra.mxu1 %v1636_v48 }
 0x3d4   : > { %v1627_v49 = vpop.permute.xlu1 %1626 }
 0x3d5   : > { %7809 = vmatprep.subr.msk.bf16.mxu1 %vm1628_vm3, %v1627_v49  ;;  %v1639_v51 = vsel %vm1628_vm3, %v1627_v49, 0 }
 0x3d8   : > { %7631 = vmatpush3.bf16.xpose.msra.mxu1 %v1639_v51 }
 0x3d9   : > { %7636 = vmatprep.subr.bf16.mxu1 %v8831_v40 }
 0x3df   : > { %7633 = vmatmul.mubr.msk.bf16.vlgmr.msra.gmra.mrb[8].mxu1 %vm1628_vm3, %v8837_v45 }
 0x3e0   : > { %7637 = vmatpush3.bf16.msra.mxu1 %v8831_v40 }
 0x3e1   : > { %7638 = vmatprep.subr.bf16.mxu1 %v1738_v54 }
 0x3e4   : > { %7639 = vmatpush3.bf16.msra.mxu1 %v1738_v54 }
 0x4b2   : > { %v7634_v55 = vpop.f32.mrb[8].mxu1 }
 0x4b3   : > { %v1675_v56 = vpop.f32.mrb[9].mxu1  ;;  %v1691_v62 = vmul.f32 0.25, %v7634_v55 }
 0x4b4   : > { %v1689_v57 = vmul.f32 0.25, %v1675_v56  ;;  %v7635_v58 = vpop.f32.mrb[10].mxu1 }
 0x4b5   : > { %v1678_v59 = vpop.f32.mrb[11].mxu1  ;;  %v1700_v1 = vsel %vm1699_vm5, %v1691_v62, -inf }
 0x4b6   : > { %v1690_v60 = vmul.f32 0.25, %v1678_v59  ;;  %v1693_v61 = vsel %vm1692_vm4, %v1689_v57, -inf }
 0x4b7   : > { %1694 = vmax.xlane.f32.xlu1 %v1693_v61 }
 0x4b8   : > { %v1696_v63 = vsel %vm1692_vm4, %v1690_v60, -inf }
 0x4b9   : > { %1697 = vmax.xlane.f32.xlu0 %v1696_v63 }
 0x4bd   : > { %1701 = vmax.xlane.f32.xlu0 %v1700_v1 }
 0x544   : > { %v1695_v2 = vpop.xlane.xlu1 %1694 }
 0x545   : > { %v1703_v3 = vsub.f32 %v1689_v57, %v1695_v2 }
 0x546   : > { %v1698_v4 = vpop.xlane.xlu0 %1697 }
 0x547   : > { %v1706_v5 = vmul.f32 1.442695, %v1703_v3  ;;  %v1704_v6 = vsub.f32 %v1690_v60, %v1698_v4 }
 0x549   : > { %8368 = vpow2.f32 %v1706_v5  ;;  %v1708_v7 = vmul.f32 1.442695, %v1704_v6 }
 0x54a   : > { %v1702_v8 = vpop.xlane.xlu0 %1701 }
 0x54b   : > { %8370 = vpow2.f32 %v1708_v7  ;;  %v1705_v9 = vsub.f32 %v1691_v62, %v1702_v8 }
 0x54d   : > { %v1710_v10 = vmul.f32 1.442695, %v1705_v9 }
 0x54f   : > { %8372 = vpow2.f32 %v1710_v10 }
 0x553   : > { %v8369_v11 = vpop.eup %8368 }
 0x554   : > { %v1712_v12 = vsel %vm1692_vm4, %v8369_v11, 0.0 }
 0x555   : > { %v8371_v13 = vpop.eup %8370  ;;  %1713 = vadd.xlane.f32.xlu1 %v1712_v12 }
 0x556   : > { %v1715_v14 = vsel %vm1692_vm4, %v8371_v13, 0.0 }
 0x557   : > { %1716 = vadd.xlane.f32.xlu0 %v1715_v14 }
 0x559   : > { %v8373_v15 = vpop.eup %8372 }
 0x55a   : > { %v1718_v16 = vsel %vm1699_vm5, %v8373_v15, 0.0 }
 0x55b   : > { %1719 = vadd.xlane.f32.xlu1 %v1718_v16 }
 0x56c   : > { %1794 = vrot.lane.b32.xlu1 %v8837_v45, %s9778_s7 }
 0x56d   : > { %1792 = vrot.lane.b32.xlu0 %v8829_v39, %s9778_s7 }
 0x570   : > { %1788 = vrot.lane.b32.xlu1 %v8829_v39, %s9774_s30 }
 0x574   : > { %1790 = vrot.lane.b32.xlu1 %v8837_v45, %s9774_s30 }
 0x5e2   : > { %v1714_v17 = vpop.xlane.xlu1 %1713 }
 0x5e3   : > { %8374 = vrcp.f32 %v1714_v17 }
 0x5e4   : > { %v1717_v18 = vpop.xlane.xlu0 %1716 }
 0x5e5   : > { %8376 = vrcp.f32 %v1717_v18 }
 0x5e8   : > { %v1720_v19 = vpop.xlane.xlu1 %1719  ;;  %v1793_v20 = vpop.permute.xlu0 %1792 }
 0x5e9   : > { %8378 = vrcp.f32 %v1720_v19  ;;  %7810 = vmatprep.subr.msk.bf16.mxu1 %vm1628_vm3, %v1793_v20  ;;  %v1803_v38 = vsel %vm1628_vm3, %v1793_v20, 0 }
 0x5ec   : > { %v1795_v30 = vpop.permute.xlu1 %1794 }
 0x5ed   : > { %v8375_v24 = vpop.eup %8374  ;;  %v1806_v41 = vsel %vm1628_vm3, %v1795_v30, 0 }
 0x5ee   : > { %v1722_v27 = vmul.f32 %v8375_v24, %v8369_v11 }
 0x5ef   : > { %v8377_v26 = vpop.eup %8376 }
 0x5f0   : > { %v1724_v28 = vmul.f32 %v8377_v26, %v8371_v13  ;;  %v1789_v37 = vpop.permute.xlu1 %1788 }
 0x5f2   : > { %v1727_v32 = vpack.c.bf16 %v1724_v28, %v1722_v27 }
 0x5f3   : > { %v8379_v34 = vpop.eup %8378 }
 0x5f4   : > { %7640 = vmatprep.mubr.msk.bf16.mxu1 %vm1692_vm4, %v1727_v32  ;;  %v1726_v35 = vmul.f32 %v8379_v34, %v8373_v15  ;;  %v1791_v42 = vpop.permute.xlu1 %1790 }
 0x5f6   : > { %v1728_v36 = vpack.c.bf16 %v1726_v35, %v1726_v35 }
 0x5f8   : > { %7641 = vmatmul.mubr.msk.bf16.vlgmr.msra.gmra.mrb[12].mxu1 %vm1692_vm4, %v1728_v36 }
 0x5f9   : > { %7645 = vmatpush3.bf16.xpose.msra.mxu1 %v1803_v38  ;;  %7648 = vmatprep.mubr.msk.bf16.mxu1 %vm1628_vm3, %v1789_v37 }
 0x5fa   : > { %7811 = vmatprep.subr.msk.bf16.mxu1 %vm1628_vm3, %v1795_v30 }
 0x601   : > { %7647 = vmatpush3.bf16.xpose.msra.mxu1 %v1806_v41 }
 0x608   : > { %7649 = vmatmul.mubr.msk.bf16.vlgmr.msra.gmra.mrb[16].mxu1 %vm1628_vm3, %v1791_v42 }
 0x6cb   : > { %v8879_v43 = vpop.f32.mrb[12].mxu1 }
 0x6cc   : > { %v8881_v44 = vpop.f32.mrb[13].mxu1 }
 0x6cd   : > { %v7643_v46 = vpop.f32.mrb[14].mxu1 }
 0x6ce   : > { %v8883_v47 = vpop.f32.mrb[15].mxu1 }
 0x6db   : > { %v7650_v48 = vpop.f32.mrb[16].mxu1 }
 0x6dc   : > { %v1842_v49 = vpop.f32.mrb[17].mxu1  ;;  %v1858_v55 = vmul.f32 0.25, %v7650_v48 }
 0x6dd   : > { %v1856_v50 = vmul.f32 0.25, %v1842_v49  ;;  %v7651_v51 = vpop.f32.mrb[18].mxu1 }
 0x6de   : > { %v1845_v54 = vpop.f32.mrb[19].mxu1  ;;  %v1865_v59 = vsel %vm1699_vm5, %v1858_v55, -inf }
 0x6df   : > { %v1857_v56 = vmul.f32 0.25, %v1845_v54  ;;  %v1859_v57 = vsel %vm1692_vm4, %v1856_v50, -inf }
 0x6e0   : > { %1860 = vmax.xlane.f32.xlu0 %v1859_v57 }
 0x6e1   : > { %v1862_v58 = vsel %vm1692_vm4, %v1857_v56, -inf }
 0x6e2   : > { %1863 = vmax.xlane.f32.xlu1 %v1862_v58 }
 0x6e4   : > { %1866 = vmax.xlane.f32.xlu0 %v1865_v59 }
 0x76d   : > { %v1861_v60 = vpop.xlane.xlu0 %1860 }
 0x76e   : > { %v1868_v61 = vsub.f32 %v1856_v50, %v1861_v60 }
 0x76f   : > { %v1864_v62 = vpop.xlane.xlu1 %1863 }
 0x770   : > { %v1871_v63 = vmul.f32 1.442695, %v1868_v61  ;;  %v1869_v1 = vsub.f32 %v1857_v56, %v1864_v62 }
 0x771   : > { %v1867_v2 = vpop.xlane.xlu0 %1866 }
 0x772   : > { %8380 = vpow2.f32 %v1871_v63  ;;  %v1873_v3 = vmul.f32 1.442695, %v1869_v1  ;;  %v1870_v4 = vsub.f32 %v1858_v55, %v1867_v2 }
 0x774   : > { %8382 = vpow2.f32 %v1873_v3  ;;  %v1875_v5 = vmul.f32 1.442695, %v1870_v4 }
 0x776   : > { %8384 = vpow2.f32 %v1875_v5 }
 0x77c   : > { %v8381_v6 = vpop.eup %8380 }
 0x77d   : > { %v1877_v7 = vsel %vm1692_vm4, %v8381_v6, 0.0 }
 0x77e   : > { %v8383_v8 = vpop.eup %8382  ;;  %1878 = vadd.xlane.f32.xlu0 %v1877_v7 }
 0x77f   : > { %v1880_v11 = vsel %vm1692_vm4, %v8383_v8, 0.0 }
 0x780   : > { %v8385_v9 = vpop.eup %8384 }
 0x781   : > { %v1883_v10 = vsel %vm1699_vm5, %v8385_v9, 0.0 }
 0x782   : > { %1884 = vadd.xlane.f32.xlu1 %v1883_v10  ;;  %1881 = vadd.xlane.f32.xlu0 %v1880_v11 }
 0x793   : > { %1898 = vrot.lane.b32.xlu1 %v8846_v52, %s9774_s30 }
 0x797   : > { %1962 = vrot.lane.b32.xlu1 %v8829_v39, %s9770_s8 }
 0x798   : > { %1896 = vrot.lane.b32.xlu0 %v8831_v40, %s9774_s30 }
 0x79b   : > { %1964 = vrot.lane.b32.xlu1 %v8837_v45, %s9770_s8 }
 0x79c   : > { %1958 = vrot.lane.b32.xlu0 %v8829_v39, %s9772_s4 }
 0x79f   : > { %1960 = vrot.lane.b32.xlu1 %v8837_v45, %s9772_s4 }
 0x80b   : > { %v1879_v12 = vpop.xlane.xlu0 %1878 }
 0x80c   : > { %8386 = vrcp.f32 %v1879_v12 }
 0x80f   : > { %v1882_v13 = vpop.xlane.xlu0 %1881  ;;  %v1885_v14 = vpop.xlane.xlu1 %1884 }
 0x810   : > { %8388 = vrcp.f32 %v1882_v13 }
 0x811   : > { %8390 = vrcp.f32 %v1885_v14 }
 0x813   : > { %v1897_v15 = vpop.permute.xlu0 %1896  ;;  %v1899_v16 = vpop.permute.xlu1 %1898 }
 0x814   : > { %v1908_v17 = vand.u32 %v1899_v16, %v8850_v53  ;;  %7652 = vmatprep.subr.bf16.mxu0 %v1897_v15 }
 0x815   : > { %7653 = vmatpush3.bf16.msra.mxu0 %v1897_v15 }
 0x816   : > { %7654 = vmatprep.subr.bf16.mxu0 %v1908_v17  ;;  %v8387_v18 = vpop.eup %8386 }
 0x817   : > { %v1963_v19 = vpop.permute.xlu1 %1962  ;;  %v1887_v26 = vmul.f32 %v8387_v18, %v8381_v6  ;;  %v1959_v34 = vpop.permute.xlu0 %1958 }
 0x818   : > { %v1973_v35 = vsel %vm1628_vm3, %v1963_v19, 0 }
 0x819   : > { %7655 = vmatpush3.bf16.msra.mxu0 %v1908_v17 }
 0x81a   : > { %v8389_v20 = vpop.eup %8388  ;;  %7812 = vmatprep.subr.msk.bf16.mxu0 %vm1628_vm3, %v1963_v19 }
 0x81b   : > { %v8391_v24 = vpop.eup %8390  ;;  %v1889_v27 = vmul.f32 %v8389_v20, %v8383_v8  ;;  %v1965_v36 = vpop.permute.xlu1 %1964 }
 0x81c   : > { %v1891_v28 = vmul.f32 %v8391_v24, %v8385_v9  ;;  %v1976_v37 = vsel %vm1628_vm3, %v1965_v36, 0 }
 0x81d   : > { %v1892_v30 = vpack.c.bf16 %v1889_v27, %v1887_v26 }
 0x81e   : > { %v1893_v32 = vpack.c.bf16 %v1891_v28, %v1891_v28 }
 0x81f   : > { %7656 = vmatprep.mubr.msk.bf16.mxu0 %vm1692_vm4, %v1892_v30  ;;  %v1961_v38 = vpop.permute.xlu1 %1960 }
 0x820   : > { %7657 = vmatmul.mubr.msk.bf16.vlgmr.msra.gmra.mrb[4].mxu0 %vm1692_vm4, %v1893_v32 }
 0x821   : > { %7664 = vmatprep.mubr.msk.bf16.mxu0 %vm1628_vm3, %v1959_v34 }
 0x822   : > { %7661 = vmatpush3.bf16.xpose.msra.mxu0 %v1973_v35 }
 0x823   : > { %7813 = vmatprep.subr.msk.bf16.mxu0 %vm1628_vm3, %v1965_v36 }
 0x82a   : > { %7663 = vmatpush3.bf16.xpose.msra.mxu0 %v1976_v37 }
 0x831   : > { %7665 = vmatmul.mubr.msk.bf16.vlgmr.msra.gmra.mrb[8].mxu0 %vm1628_vm3, %v1961_v38 }
 0x8f3   : > { %v8912_v41 = vpop.f32.mrb[4].mxu0 }
 0x8f4   : > { %v8914_v42 = vpop.f32.mrb[5].mxu0 }
 0x8f5   : > { %v7659_v46 = vpop.f32.mrb[6].mxu0 }
 0x8f6   : > { %v8916_v48 = vpop.f32.mrb[7].mxu0 }
 0x8f7   : > { %v7845_v49 = vpack.i.bf16 %v8916_v48, %v8914_v42 }
 0x904   : > { %v7666_v50 = vpop.f32.mrb[8].mxu0 }
 0x905   : > { %v2012_v51 = vpop.f32.mrb[9].mxu0  ;;  %v2028_v57 = vmul.f32 0.25, %v7666_v50 }
 0x906   : > { %v2026_v54 = vmul.f32 0.25, %v2012_v51  ;;  %v7667_v55 = vpop.f32.mrb[10].mxu0 }
 0x907   : > { %v2015_v56 = vpop.f32.mrb[11].mxu0  ;;  %v2035_v61 = vsel %vm1699_vm5, %v2028_v57, -inf }
 0x908   : > { %v2027_v58 = vmul.f32 0.25, %v2015_v56  ;;  %v2029_v59 = vsel %vm1692_vm4, %v2026_v54, -inf }
 0x909   : > { %2030 = vmax.xlane.f32.xlu0 %v2029_v59 }
 0x90a   : > { %v2032_v60 = vsel %vm1692_vm4, %v2027_v58, -inf }
 0x90b   : > { %2033 = vmax.xlane.f32.xlu1 %v2032_v60 }
 0x90d   : > { %2036 = vmax.xlane.f32.xlu0 %v2035_v61 }
 0x996   : > { %v2031_v62 = vpop.xlane.xlu0 %2030 }
 0x997   : > { %v2038_v63 = vsub.f32 %v2026_v54, %v2031_v62 }
 0x998   : > { %v2034_v1 = vpop.xlane.xlu1 %2033 }
 0x999   : > { %v2041_v2 = vmul.f32 1.442695, %v2038_v63  ;;  %v2039_v3 = vsub.f32 %v2027_v58, %v2034_v1 }
 0x99a   : > { %v2037_v4 = vpop.xlane.xlu0 %2036 }
 0x99b   : > { %8392 = vpow2.f32 %v2041_v2  ;;  %v2043_v5 = vmul.f32 1.442695, %v2039_v3  ;;  %v2040_v6 = vsub.f32 %v2028_v57, %v2037_v4 }
 0x99d   : > { %8394 = vpow2.f32 %v2043_v5  ;;  %v2045_v7 = vmul.f32 1.442695, %v2040_v6 }
 0x99f   : > { %8396 = vpow2.f32 %v2045_v7 }
 0x9a5   : > { %v8393_v8 = vpop.eup %8392 }
 0x9a6   : > { %v2047_v9 = vsel %vm1692_vm4, %v8393_v8, 0.0 }
 0x9a7   : > { %v8395_v10 = vpop.eup %8394  ;;  %2048 = vadd.xlane.f32.xlu0 %v2047_v9 }
 0x9a8   : > { %v2050_v13 = vsel %vm1692_vm4, %v8395_v10, 0.0 }
 0x9a9   : > { %v8397_v11 = vpop.eup %8396 }
 0x9aa   : > { %v2053_v12 = vsel %vm1699_vm5, %v8397_v11, 0.0 }
 0x9ab   : > { %2054 = vadd.xlane.f32.xlu1 %v2053_v12  ;;  %2051 = vadd.xlane.f32.xlu0 %v2050_v13 }
 0x9bc   : > { %2066 = vrot.lane.b32.xlu1 %v8846_v52, %s9772_s4 }
 0x9c0   : > { %2130 = vrot.lane.b32.xlu1 %v8829_v39, %s9768_s26 }
 0x9c1   : > { %2064 = vrot.lane.b32.xlu0 %v8831_v40, %s9772_s4 }
 0x9c4   : > { %2132 = vrot.lane.b32.xlu1 %v8837_v45, %s9768_s26 }
 0x9c5   : > { %2126 = vrot.lane.b32.xlu0 %v8829_v39, %s9766_s25 }
 0x9c8   : > { %2128 = vrot.lane.b32.xlu1 %v8837_v45, %s9766_s25 }
 0xa34   : > { %v2049_v14 = vpop.xlane.xlu0 %2048 }
 0xa35   : > { %8398 = vrcp.f32 %v2049_v14 }
 0xa38   : > { %v2052_v15 = vpop.xlane.xlu0 %2051  ;;  %v2055_v16 = vpop.xlane.xlu1 %2054 }
 0xa39   : > { %8400 = vrcp.f32 %v2052_v15 }
 0xa3a   : > { %8402 = vrcp.f32 %v2055_v16 }
 0xa3c   : > { %v2065_v17 = vpop.permute.xlu0 %2064  ;;  %v2067_v18 = vpop.permute.xlu1 %2066 }
 0xa3d   : > { %v2076_v19 = vand.u32 %v2067_v18, %v8850_v53  ;;  %7668 = vmatprep.subr.bf16.mxu1 %v2065_v17 }
 0xa3e   : > { %7669 = vmatpush3.bf16.msra.mxu1 %v2065_v17 }
 0xa3f   : > { %7670 = vmatprep.subr.bf16.mxu1 %v2076_v19  ;;  %v8399_v20 = vpop.eup %8398 }
 0xa40   : > { %v2131_v24 = vpop.permute.xlu1 %2130  ;;  %v2057_v26 = vmul.f32 %v8399_v20, %v8393_v8  ;;  %v2127_v34 = vpop.permute.xlu0 %2126 }
 0xa41   : > { %v2141_v35 = vsel %vm1628_vm3, %v2131_v24, 0 }
 0xa42   : > { %7671 = vmatpush3.bf16.msra.mxu1 %v2076_v19 }
 0xa43   : > { %v8401_v39 = vpop.eup %8400  ;;  %7814 = vmatprep.subr.msk.bf16.mxu1 %vm1628_vm3, %v2131_v24 }
 0xa44   : > { %v8403_v45 = vpop.eup %8402  ;;  %v2059_v27 = vmul.f32 %v8401_v39, %v8395_v10  ;;  %v2133_v36 = vpop.permute.xlu1 %2132 }
 0xa45   : > { %v2061_v28 = vmul.f32 %v8403_v45, %v8397_v11  ;;  %v2144_v37 = vsel %vm1628_vm3, %v2133_v36, 0 }
 0xa46   : > { %v2062_v30 = vpack.c.bf16 %v2059_v27, %v2057_v26 }
 0xa47   : > { %v2063_v32 = vpack.c.bf16 %v2061_v28, %v2061_v28  ;;  %v7902_v28 = vld [vmem:[%s8973_s6] sm:$0xff]  }
 0xa48   : > { %7672 = vmatprep.mubr.msk.bf16.mxu1 %vm1692_vm4, %v2062_v30  ;;  %v2129_v38 = vpop.permute.xlu1 %2128  ;;  %v7903_v30 = vld [vmem:[%s8973_s6 + $0x8] sm:$0xff]  }
 0xa49   : > { %7673 = vmatmul.mubr.msk.bf16.vlgmr.msra.gmra.mrb[20].mxu1 %vm1692_vm4, %v2063_v32  ;;  %v7904_v32 = vld [vmem:[%s8973_s6 + $0x10] sm:$0xff]  }
 0xa4a   : > { %7680 = vmatprep.mubr.msk.bf16.mxu1 %vm1628_vm3, %v2127_v34  ;;  %v7905_v34 = vld [vmem:[%s8973_s6 + $0x18] sm:$0xff]  }
 0xa4b   : > { %7677 = vmatpush3.bf16.xpose.msra.mxu1 %v2141_v35 }
 0xa4c   : > { %7815 = vmatprep.subr.msk.bf16.mxu1 %vm1628_vm3, %v2133_v36 }
 0xa53   : > { %7679 = vmatpush3.bf16.xpose.msra.mxu1 %v2144_v37 }
 0xa5a   : > { %7681 = vmatmul.mubr.msk.bf16.vlgmr.msra.gmra.mrb[24].mxu1 %vm1628_vm3, %v2129_v38 }
 0xa5b   : > { %2601 = vmatprep.mubr.bf16.mxu1 %v8544_v0 }
 0xb1c   : > { %v7674_v46 = vpop.f32.mrb[20].mxu1 }
 0xb1d   : > { %v2112_v50 = vpop.f32.mrb[21].mxu1 }
 0xb1e   : > { %v7675_v51 = vpop.f32.mrb[22].mxu1 }
 0xb1f   : > { %v2115_v54 = vpop.f32.mrb[23].mxu1 }
 0xb20   : > { %v7850_v55 = vpack.i.bf16 %v2115_v54, %v2112_v50 }
 0xb2d   : > { %v7682_v56 = vpop.f32.mrb[24].mxu1 }
 0xb2e   : > { %v2180_v57 = vpop.f32.mrb[25].mxu1  ;;  %v2196_v61 = vmul.f32 0.25, %v7682_v56 }
 0xb2f   : > { %v2194_v58 = vmul.f32 0.25, %v2180_v57  ;;  %v7683_v59 = vpop.f32.mrb[26].mxu1 }
 0xb30   : > { %v2183_v60 = vpop.f32.mrb[27].mxu1  ;;  %v2203_v2 = vsel %vm1699_vm5, %v2196_v61, -inf }
 0xb31   : > { %v2195_v62 = vmul.f32 0.25, %v2183_v60  ;;  %v2197_v63 = vsel %vm1692_vm4, %v2194_v58, -inf }
 0xb32   : > { %2198 = vmax.xlane.f32.xlu0 %v2197_v63 }
 0xb33   : > { %v2200_v1 = vsel %vm1692_vm4, %v2195_v62, -inf }
 0xb34   : > { %2201 = vmax.xlane.f32.xlu1 %v2200_v1 }
 0xb36   : > { %2204 = vmax.xlane.f32.xlu0 %v2203_v2 }
 0xbbf   : > { %v2199_v3 = vpop.xlane.xlu0 %2198 }
 0xbc0   : > { %v2206_v4 = vsub.f32 %v2194_v58, %v2199_v3 }
 0xbc1   : > { %v2202_v5 = vpop.xlane.xlu1 %2201 }
 0xbc2   : > { %v2209_v6 = vmul.f32 1.442695, %v2206_v4  ;;  %v2207_v7 = vsub.f32 %v2195_v62, %v2202_v5 }
 0xbc3   : > { %v2205_v8 = vpop.xlane.xlu0 %2204 }
 0xbc4   : > { %8404 = vpow2.f32 %v2209_v6  ;;  %v2211_v9 = vmul.f32 1.442695, %v2207_v7  ;;  %v2208_v10 = vsub.f32 %v2196_v61, %v2205_v8 }
 0xbc6   : > { %8406 = vpow2.f32 %v2211_v9  ;;  %v2213_v11 = vmul.f32 1.442695, %v2208_v10 }
 0xbc8   : > { %8408 = vpow2.f32 %v2213_v11 }
 0xbce   : > { %v8405_v12 = vpop.eup %8404 }
 0xbcf   : > { %v2215_v13 = vsel %vm1692_vm4, %v8405_v12, 0.0 }
 0xbd0   : > { %v8407_v14 = vpop.eup %8406  ;;  %2216 = vadd.xlane.f32.xlu0 %v2215_v13 }
 0xbd1   : > { %v2218_v17 = vsel %vm1692_vm4, %v8407_v14, 0.0 }
 0xbd2   : > { %v8409_v15 = vpop.eup %8408 }
 0xbd3   : > { %v2221_v16 = vsel %vm1699_vm5, %v8409_v15, 0.0 }
 0xbd4   : > { %2222 = vadd.xlane.f32.xlu1 %v2221_v16  ;;  %2219 = vadd.xlane.f32.xlu0 %v2218_v17 }
 0xbe5   : > { %2234 = vrot.lane.b32.xlu1 %v8846_v52, %s9766_s25 }
 0xbe9   : > { %7846 = vrot.lane.b32.xlu1 %v7845_v49, %s9768_s26 }
 0xbea   : > { %2232 = vrot.lane.b32.xlu0 %v8831_v40, %s9766_s25  ;;  %s8999_s25 = scalar_lea.vmem %s9750_s12, %s6969_s9  ;;  %s7492_s9 = sshll.u32 %s9836_s2, 7 }
 0xbeb   : > { %v7035_v10 = vld [vmem:[%s8999_s25] ss:$0 sm:$0xff]  ;;  %s1183_s2 = sld [smem:[#allocation3 + %s8695_s20]] }
 0xbed   : > { %2301 = vrot.lane.b32.xlu1 %v8912_v41, %s9768_s26  ;;  %s9027_s26 = scalar_lea.vmem %s9753_s15, %s7492_s9  ;;  %s1189_s9 = sld [smem:[#allocation3 + %s8695_s20]] }
 0xbee   : > { %7851 = vrot.lane.b32.xlu0 %v7850_v55, %s9770_s8 }
 0xbf1   : > { %2313 = vrot.lane.b32.xlu1 %v7674_v46, %s9770_s8  ;;  %p1184_p11 = scmp.lt.s32.totalorder %s1183_s2, 2 }
 0xbf3   : > { %s9838_s2 = smov (!%p1184_p11, %s1183_s2), 2  ;;  %p1190_p12 = scmp.lt.s32.totalorder %s1189_s9, 2 }
 0xbf4   : > { %s6970_s27 = sshll.u32 %s9838_s2, 1 }
 0xbf5   : > { %s9840_s9 = smov (!%p1190_p12, %s1189_s9), 2  ;;  %s9042_s4 = scalar_lea.vmem %s9751_s13, %s6970_s27 }
 0xbf6   : > { %s6971_s30 = sshll.u32 %s9840_s9, 1  ;;  %s1202_s9 = sld [smem:[#allocation3 + %s8695_s20]] }
 0xbf7   : > { %s9048_s11 = scalar_lea.vmem %s9752_s14, %s6971_s30  ;;  %s1215_s30 = sld [smem:[#allocation3 + %s8695_s20]] }
 0xbfc   : > { %p1203_p0 = scmp.lt.s32.totalorder %s1202_s9, 2 }
 0xbfd   : > { %p1216_p1 = scmp.lt.s32.totalorder %s1215_s30, 2 }
 0xbfe   : > { %s9844_s9 = smov (!%p1203_p0, %s1202_s9), 2 }
 0xbff   : > { %s6974_s27 = sshll.u32 %s9844_s9, 2  ;;  %s9846_s30 = smov (!%p1216_p1, %s1215_s30), 2 }
 0xc00   : > { %s6977_s8 = sshll.u32 %s9846_s30, 1  ;;  %s9810_s30 = smov 16  }
 0xc01   : > { %s9090_s10 = scalar_lea.vmem %s9756_s18, %s6977_s8  ;;  %s9811_s8 = smov 80  }
 0xc02   : > { %s1251_s9 = sld [smem:[#allocation4 + %s8695_s20]] }
 0xc08   : > { %p1252_p7 = scmp.lt.s32.totalorder %s1251_s9, 3 }
 0xc0a   : > { %s9858_s9 = smov (!%p1252_p7, %s1251_s9), 3 }
 0xc5d   : > { %v2217_v18 = vpop.xlane.xlu0 %2216 }
 0xc5e   : > { %8410 = vrcp.f32 %v2217_v18 }
 0xc61   : > { %v2220_v19 = vpop.xlane.xlu0 %2219  ;;  %v2223_v20 = vpop.xlane.xlu1 %2222 }
 0xc62   : > { %8412 = vrcp.f32 %v2220_v19 }
 0xc63   : > { %8414 = vrcp.f32 %v2223_v20 }
 0xc65   : > { %v2233_v52 = vpop.permute.xlu0 %2232  ;;  %v2235_v24 = vpop.permute.xlu1 %2234 }
 0xc66   : > { %v2244_v42 = vand.u32 %v2235_v24, %v8850_v53  ;;  %7684 = vmatprep.subr.bf16.mxu0 %v2233_v52 }
 0xc67   : > { %7685 = vmatpush3.bf16.msra.mxu0 %v2233_v52 }
 0xc68   : > { %7686 = vmatprep.subr.bf16.mxu0 %v2244_v42  ;;  %v8411_v40 = vpop.eup %8410 }
 0xc69   : > { %v2225_v49 = vmul.f32 %v8411_v40, %v8405_v12  ;;  %v7847_v50 = vpop.permute.xlu1 %7846  ;;  %v7852_v54 = vpop.permute.xlu0 %7851 }
 0xc6a   : > { %v7849_v55 = vunpack.i.h.bf16 %v7847_v50  ;;  %v7848_v56 = vunpack.i.l.bf16 %v7847_v50  ;;  %v7854_v58 = vunpack.i.h.bf16 %v7852_v54  ;;  %v7853_v59 = vunpack.i.l.bf16 %v7852_v54  ;;  %v7915_v50 = vld [vmem:[%s9027_s26 + $0x30] ss:$8 sps:$4 sm:$0xff]  }
 0xc6b   : > { %7687 = vmatpush3.bf16.msra.mxu0 %v2244_v42 }
 0xc6c   : > { %v8413_v41 = vpop.eup %8412  ;;  %7692 = vmatprep.subr.bf16.mxu0 %v7902_v28  ;;  %v2331_v60 = vsel %vm1628_vm3, %v8883_v47, %v7849_v55  ;;  %v2330_v61 = vsel %vm1628_vm3, %v8881_v44, %v7848_v56 }
 0xc6d   : > { %v8415_v48 = vpop.eup %8414  ;;  %v2227_v39 = vmul.f32 %v8413_v41, %v8407_v14  ;;  %v2302_v51 = vpop.permute.xlu1 %2301  ;;  %v2334_v6 = vsel %vm2333_vm6, %v2330_v61, %v7853_v59  ;;  %v2335_v47 = vsel %vm2333_vm6, %v2331_v60, %v7854_v58 }
 0xc6e   : > { %v2229_v45 = vmul.f32 %v8415_v48, %v8409_v15  ;;  %v2332_v63 = vsel %vm1628_vm3, %v8879_v43, %v2302_v51  ;;  %v7917_v51 = vld [vmem:[%s9027_s26 + $0x34] ss:$8 sps:$4 sm:$0xff]  }
 0xc6f   : > { %v2230_v26 = vpack.c.bf16 %v2227_v39, %v2225_v49 }
 0xc70   : > { %v2231_v27 = vpack.c.bf16 %v2229_v45, %v2229_v45 }
 0xc71   : > { %7688 = vmatprep.mubr.msk.bf16.mxu0 %vm1692_vm4, %v2230_v26  ;;  %v2314_v57 = vpop.permute.xlu1 %2313 }
 0xc72   : > { %7689 = vmatmul.mubr.msk.bf16.vlgmr.msra.gmra.mrb[12].mxu0 %vm1692_vm4, %v2231_v27  ;;  %v2336_v2 = vsel %vm2333_vm6, %v2332_v63, %v2314_v57 }
 0xc73   : > { %7693 = vmatpush3.bf16.msra.mxu0 %v7902_v28 }
 0xc74   : > { %7694 = vmatprep.subr.bf16.mxu0 %v7903_v30 }
 0xc77   : > { %7695 = vmatpush3.bf16.msra.mxu0 %v7903_v30 }
 0xc78   : > { %7696 = vmatprep.subr.bf16.mxu0 %v7904_v32 }
 0xc7b   : > { %7697 = vmatpush3.bf16.msra.mxu0 %v7904_v32 }
 0xc7c   : > { %7698 = vmatprep.subr.bf16.mxu0 %v7905_v34 }
 0xc7f   : > { %7699 = vmatpush3.bf16.msra.mxu0 %v7905_v34  ;;  %v7908_v34 = vld [vmem:[%s9027_s26 + $0x4] ss:$8 sps:$4 sm:$0xff]  }
 0xc80   : > { %2569 = vmatprep.subr.bf16.mxu1 %v7908_v34 }
 0xd45   : > { %v7690_v35 = vpop.f32.mrb[12].mxu0 }
 0xd46   : > { %2325 = vrot.lane.b32.xlu1 %v7690_v35, %s9778_s7  ;;  %v2280_v36 = vpop.f32.mrb[13].mxu0  ;;  %v7906_v35 = vld [vmem:[%s9027_s26] ss:$8 sps:$4 sm:$0xff]  }
 0xd47   : > { %v7691_v37 = vpop.f32.mrb[14].mxu0  ;;  %2570 = vmatpush1.bf16.msra.mxu1 %v7906_v35 }
 0xd48   : > { %v2283_v38 = vpop.f32.mrb[15].mxu0  ;;  %v7909_v37 = vld [vmem:[%s9027_s26 + $0x10] ss:$8 sps:$4 sm:$0xff]  }
 0xd49   : > { %v7855_v46 = vpack.i.bf16 %v2283_v38, %v2280_v36  ;;  %v7911_v36 = vld [vmem:[%s9027_s26 + $0x14] ss:$8 sps:$4 sm:$0xff]   ;;  %v7914_v38 = vld [vmem:[%s9027_s26 + $0x24] ss:$8 sps:$4 sm:$0xff]  }
 0xd4a   : > { %2571 = vmatprep.subr.bf16.mxu1 %v7911_v36 }
 0xd4b   : > { %7856 = vrot.lane.b32.xlu0 %v7855_v46, %s9778_s7  ;;  %2572 = vmatpush1.bf16.msra.mxu1 %v7909_v37  ;;  %v7912_v46 = vld [vmem:[%s9027_s26 + $0x20] ss:$8 sps:$4 sm:$0xff]   ;;  %s7493_s7 = sshll.u32 %s9842_s29, 8  ;;  %s9809_s29 = smov 32  }
 0xd4c   : > { %2573 = vmatprep.subr.bf16.mxu1 %v7914_v38  ;;  %s9059_s2 = scalar_lea.vmem %s9755_s17, %s7493_s7  ;;  %s9081_s7 = scalar_lea.vmem %s9754_s16, %s6974_s27 }
 0xd4d   : > { %s6983_s27 = sshll.u32 %s9858_s9, 2 }
 0xd4f   : > { %2574 = vmatpush1.bf16.msra.mxu1 %v7912_v46 }
 0xd50   : > { %2575 = vmatprep.subr.bf16.mxu1 %v7917_v51 }
 0xd53   : > { %2576 = vmatpush1.bf16.msra.mxu1 %v7915_v50 }
 0xdb8   : > { %v2326_v62 = vpop.permute.xlu1 %2325 }
 0xdb9   : > { %v2340_v5 = vsel %vm2337_vm7, %v2336_v2, %v2326_v62  ;;  %v7036_v2 = vld [vmem:[%s9042_s4] ss:$0 sm:$0xff] }
 0xdba   : > { %v2350_v9 = vpack.c.bf16 %v2340_v5, %v2340_v5 }
 0xdbd   : > { %v7857_v1 = vpop.permute.xlu0 %7856 }
 0xdbe   : > { %v7859_v3 = vunpack.i.h.bf16 %v7857_v1  ;;  %v7858_v4 = vunpack.i.l.bf16 %v7857_v1 }
 0xdc0   : > { %v2338_v44 = vsel %vm2337_vm7, %v2334_v6, %v7858_v4  ;;  %v2339_v7 = vsel %vm2337_vm7, %v2335_v47, %v7859_v3  ;;  %v7037_v47 = vld [vmem:[%s9048_s11] ss:$0 sm:$0xff] }
 0xdc1   : > { %v2349_v8 = vpack.c.bf16 %v2339_v7, %v2338_v44 }
 0xdc3   : > { %7700 = vmatprep.mubr.msk.bf16.mxu0 %vm1376_vm0, %v2349_v8 }
 0xdc4   : > { %7701 = vmatmul.mubr.msk.bf16.vlgmr.msra.gmra.mrb[16].mxu0 %vm1376_vm0, %v2350_v9 }
 0xe97   : > { %v7702_v43 = vpop.f32.mrb[16].mxu0 }
 0xe98   : > { %v2415_v11 = vpop.f32.mrb[17].mxu0  ;;  %v2431_v12 = vadd.f32 %v7702_v43, %v8759_v31 }
 0xe99   : > { %v2429_v13 = vadd.f32 %v2415_v11, %v8756_v29  ;;  %v7703_v14 = vpop.f32.mrb[18].mxu0 }
 0xe9a   : > { %v2418_v15 = vpop.f32.mrb[19].mxu0  ;;  %v9007_v18 = vadd.f32 %v7035_v10, %v2431_v12  ;;  %v7919_v14 = vld [vmem:[%s9059_s2] sm:$0xff]  }
 0xe9b   : > { %v9004_v16 = vadd.f32 %v7035_v10, %v2429_v13  ;;  %v2430_v17 = vadd.f32 %v2418_v15, %v8763_v33  ;;  %v7918_v13 = vld [vmem:[%s9059_s2 + $0x40] sm:$0xff]   ;;  %v7920_v15 = vld [vmem:[%s9059_s2 + $0x48] sm:$0xff]  }
 0xe9c   : > { %v2450_v29 = vsel %vm1446_vm2, %v9007_v18, 0.0  ;;  %7534 = vmatprep.subr.bf16.mxu0 %v7918_v13 }
 0xe9d   : > { %v9009_v19 = vadd.f32 %v7035_v10, %v2430_v17  ;;  %v2444_v20 = vsel %vm1376_vm0, %v9004_v16, 0.0  ;;  %7535 = vmatpush3.bf16.msra.mxu0 %v7919_v14  ;;  %v7921_v17 = vld [vmem:[%s9059_s2 + $0x8] sm:$0xff]  }
 0xe9e   : > { %2445 = vadd.xlane.f32.xlu0 %v2444_v20  ;;  %7536 = vmatprep.subr.bf16.mxu0 %v7920_v15  ;;  %v7922_v20 = vld [vmem:[%s9059_s2 + $0x50] sm:$0xff]  }
 0xe9f   : > { %v2447_v52 = vsel %vm1376_vm0, %v9009_v19, 0.0 }
 0xea0   : > { %2448 = vadd.xlane.f32.xlu1 %v2447_v52  ;;  %v7923_v52 = vld [vmem:[%s9059_s2 + $0x10] sm:$0xff]  }
 0xea1   : > { %7537 = vmatpush3.bf16.msra.mxu0 %v7921_v17 }
 0xea2   : > { %2451 = vadd.xlane.f32.xlu0 %v2450_v29  ;;  %7538 = vmatprep.subr.bf16.mxu0 %v7922_v20  ;;  %v7924_v29 = vld [vmem:[%s9059_s2 + $0x58] sm:$0xff]  }
 0xea5   : > { %7539 = vmatpush3.bf16.msra.mxu0 %v7923_v52 }
 0xea6   : > { %7540 = vmatprep.subr.bf16.mxu0 %v7924_v29 }
 0xf2b   : > { %v2446_v31 = vpop.xlane.xlu0 %2445 }
 0xf2c   : > { %v2453_v24 = vmul.f32 0.015625, %v2446_v31  ;;  %v7925_v31 = vld [vmem:[%s9059_s2 + $0x18] sm:$0xff]  }
 0xf2d   : > { %v2449_v42 = vpop.xlane.xlu1 %2448  ;;  %7541 = vmatpush3.bf16.msra.mxu0 %v7925_v31 }
 0xf2e   : > { %v2456_v33 = vsub.f32 %v9004_v16, %v2453_v24  ;;  %v2454_v40 = vmul.f32 0.015625, %v2449_v42  ;;  %v7926_v24 = vld [vmem:[%s9059_s2 + $0x60] sm:$0xff]  }
 0xf2f   : > { %v2452_v41 = vpop.xlane.xlu0 %2451  ;;  %v7927_v42 = vld [vmem:[%s9059_s2 + $0x20] sm:$0xff]   ;;  %7542 = vmatprep.subr.bf16.mxu0 %v7926_v24 }
 0xf30   : > { %v2457_v48 = vsub.f32 %v9009_v19, %v2454_v40  ;;  %v2455_v49 = vmul.f32 0.015625, %v2452_v41  ;;  %v2459_v39 = vmul.f32 %v2456_v33, %v2456_v33  ;;  %v7929_v40 = vld [vmem:[%s9059_s2 + $0x28] sm:$0xff]   ;;  %v7930_v41 = vld [vmem:[%s9059_s2 + $0x70] sm:$0xff]  }
 0xf31   : > { %7543 = vmatpush3.bf16.msra.mxu0 %v7927_v42 }
 0xf32   : > { %v2458_v45 = vsub.f32 %v9007_v18, %v2455_v49  ;;  %v2462_v26 = vsel %vm1376_vm0, %v2459_v39, 0.0  ;;  %v2460_v27 = vmul.f32 %v2457_v48, %v2457_v48  ;;  %v7932_v49 = vld [vmem:[%s9059_s2 + $0x78] sm:$0xff]  }
 0xf33   : > { %2463 = vadd.xlane.f32.xlu0 %v2462_v26  ;;  %v7933_v39 = vld [vmem:[%s9059_s2 + $0x38] sm:$0xff]  }
 0xf34   : > { %v2461_v28 = vmul.f32 %v2458_v45, %v2458_v45  ;;  %v2465_v32 = vsel %vm1376_vm0, %v2460_v27, 0.0 }
 0xf36   : > { %v2468_v30 = vsel %vm1446_vm2, %v2461_v28, 0.0 }
 0xf37   : > { %2469 = vadd.xlane.f32.xlu1 %v2468_v30  ;;  %2466 = vadd.xlane.f32.xlu0 %v2465_v32 }
 0xfc0   : > { %v2464_v54 = vpop.xlane.xlu0 %2463 }
 0xfc1   : > { %v2471_v55 = vmul.f32 0.015625, %v2464_v54 }
 0xfc3   : > { %v2474_v56 = vadd.f32 1e-06, %v2471_v55 }
 0xfc4   : > { %v2467_v57 = vpop.xlane.xlu0 %2466  ;;  %v2470_v58 = vpop.xlane.xlu1 %2469 }
 0xfc5   : > { %8416 = vrsqrt.f32 %v2474_v56  ;;  %v2472_v59 = vmul.f32 0.015625, %v2467_v57  ;;  %v2473_v60 = vmul.f32 0.015625, %v2470_v58 }
 0xfc7   : > { %v2475_v61 = vadd.f32 1e-06, %v2472_v59  ;;  %v2476_v62 = vadd.f32 1e-06, %v2473_v60 }
 0xfc9   : > { %8418 = vrsqrt.f32 %v2475_v61 }
 0xfca   : > { %8420 = vrsqrt.f32 %v2476_v62 }
 0xfcf   : > { %v8417_v63 = vpop.eup %8416 }
 0xfd0   : > { %v2480_v1 = vmul.f32 %v8417_v63, %v2456_v33  ;;  %v7928_v33 = vld [vmem:[%s9059_s2 + $0x68] sm:$0xff]  }
 0xfd1   : > { %7544 = vmatprep.subr.bf16.mxu0 %v7928_v33 }
 0xfd2   : > { %v2489_v5 = vmul.f32 %v7036_v2, %v2480_v1  ;;  %7545 = vmatpush3.bf16.msra.mxu0 %v7929_v40 }
 0xfd3   : > { %v8419_v3 = vpop.eup %8418  ;;  %7546 = vmatprep.subr.bf16.mxu0 %v7930_v41 }
 0xfd4   : > { %v8421_v4 = vpop.eup %8420  ;;  %v2481_v6 = vmul.f32 %v8419_v3, %v2457_v48  ;;  %v2498_v8 = vadd.f32 %v7037_v47, %v2489_v5  ;;  %v7931_v48 = vld [vmem:[%s9059_s2 + $0x30] sm:$0xff]  }
 0xfd5   : > { %v2482_v7 = vmul.f32 %v8421_v4, %v2458_v45  ;;  %v2511_v45 = vld [vmem:[%s9081_s7] sm:$0x3] }
 0xfd6   : > { %v2490_v44 = vmul.f32 %v7036_v2, %v2481_v6  ;;  %7547 = vmatpush3.bf16.msra.mxu0 %v7931_v48  ;;  %v2516_v26 = vrot.slane %v2511_v45, %v8821_v23  ;;  %v2520_v27 = vrot.slane %v2511_v45, %v8825_v25 }
 0xfd7   : > { %v2491_v10 = vmul.f32 %v7036_v2, %v2482_v7  ;;  %7548 = vmatprep.subr.bf16.mxu0 %v7932_v49 }
 0xfd8   : > { %v2499_v9 = vadd.f32 %v7037_v47, %v2490_v44 }
 0xfd9   : > { %v2500_v11 = vadd.f32 %v7037_v47, %v2491_v10 }
 0xfda   : > { %v2509_v43 = vpack.c.bf16 %v2499_v9, %v2498_v8  ;;  %7549 = vmatpush3.bf16.msra.mxu0 %v7933_v39 }
 0xfdb   : > { %v2510_v12 = vpack.c.bf16 %v2500_v11, %v2500_v11 }
 0xfdc   : > { %7046 = vmatmul.mubr.msk.bf16.vlgmr.msra.gmra.mrb[28].mxu1 %vm1376_vm0, %v2509_v43 }
 0xfdd   : > { %2611 = vmatprep.mubr.bf16.mxu1 %v8544_v0 }
 0xfe4   : > { %7047 = vmatmul.mubr.msk.bf16.gmra.mrb[32].mxu1 %vm1376_vm0, %v2510_v12 }
 0xfe5   : > { %3027 = vmatprep.mubr.bf16.mxu1 %v8544_v0 }
0x10af   : > { %v2603_v28 = vpop.f32.mrb[28].mxu1 }
0x10b0   : > { %v2604_v30 = vadd.f32 %v2603_v28, %v2516_v26  ;;  %v2605_v32 = vpop.f32.mrb[29].mxu1 }
0x10b1   : > { %v2606_v34 = vadd.f32 %v2605_v32, %v2520_v27  ;;  %v2607_v35 = vpop.f32.mrb[30].mxu1 }
0x10b2   : > { %v2620_v36 = vmul.f32 %v2604_v30, %v2604_v30  ;;  %v2608_v37 = vadd.f32 %v2607_v35, %v2516_v26  ;;  %v2609_v38 = vpop.f32.mrb[31].mxu1 }
0x10b3   : > { %v2621_v46 = vmul.f32 %v2606_v34, %v2606_v34  ;;  %v2610_v50 = vadd.f32 %v2609_v38, %v2520_v27 }
0x10b4   : > { %v2626_v51 = vmul.f32 %v2620_v36, %v2604_v30  ;;  %v2622_v54 = vmul.f32 %v2608_v37, %v2608_v37 }
0x10b5   : > { %v2627_v55 = vmul.f32 %v2621_v46, %v2606_v34  ;;  %v2623_v56 = vmul.f32 %v2610_v50, %v2610_v50 }
0x10b6   : > { %v2632_v57 = vmul.f32 0.044715, %v2626_v51  ;;  %v2628_v58 = vmul.f32 %v2622_v54, %v2608_v37 }
0x10b7   : > { %v2633_v59 = vmul.f32 0.044715, %v2627_v55  ;;  %v2629_v60 = vmul.f32 %v2623_v56, %v2610_v50  ;;  %v2613_v61 = vpop.f32.mrb[32].mxu1 }
0x10b8   : > { %v2638_v62 = vadd.f32 %v2632_v57, %v2604_v30  ;;  %v2634_v63 = vmul.f32 0.044715, %v2628_v58  ;;  %v2614_v1 = vadd.f32 %v2613_v61, %v2516_v26  ;;  %v2615_v2 = vpop.f32.mrb[33].mxu1 }
0x10b9   : > { %v2639_v3 = vadd.f32 %v2633_v59, %v2606_v34  ;;  %v2635_v4 = vmul.f32 0.044715, %v2629_v60  ;;  %v2616_v5 = vadd.f32 %v2615_v2, %v2520_v27  ;;  %v2617_v6 = vpop.f32.mrb[34].mxu1 }
0x10ba   : > { %v2644_v47 = vmul.f32 0.7978846, %v2638_v62  ;;  %v2640_v44 = vadd.f32 %v2634_v63, %v2608_v37  ;;  %v2624_v7 = vmul.f32 %v2614_v1, %v2614_v1  ;;  %v2618_v8 = vpop.f32.mrb[35].mxu1 }
0x10bb   : > { %v2645_v9 = vmul.f32 0.7978846, %v2639_v3  ;;  %v2641_v43 = vadd.f32 %v2635_v4, %v2610_v50  ;;  %v2625_v10 = vmul.f32 %v2616_v5, %v2616_v5 }
0x10bc   : > { %8422 = vtanh.f32 %v2644_v47  ;;  %v2646_v11 = vmul.f32 0.7978846, %v2640_v44  ;;  %v2630_v12 = vmul.f32 %v2624_v7, %v2614_v1 }
0x10bd   : > { %8424 = vtanh.f32 %v2645_v9  ;;  %v2647_v13 = vmul.f32 0.7978846, %v2641_v43  ;;  %v2631_v14 = vmul.f32 %v2625_v10, %v2616_v5 }
0x10be   : > { %8426 = vtanh.f32 %v2646_v11  ;;  %v2636_v15 = vmul.f32 0.044715, %v2630_v12 }
0x10bf   : > { %8428 = vtanh.f32 %v2647_v13  ;;  %v2637_v17 = vmul.f32 0.044715, %v2631_v14 }
0x10c0   : > { %v2642_v20 = vadd.f32 %v2636_v15, %v2614_v1 }
0x10c1   : > { %v2643_v52 = vadd.f32 %v2637_v17, %v2616_v5 }
0x10c2   : > { %v2648_v29 = vmul.f32 0.7978846, %v2642_v20 }
0x10c3   : > { %v2649_v31 = vmul.f32 0.7978846, %v2643_v52 }
0x10c4   : > { %8430 = vtanh.f32 %v2648_v29 }
0x10c5   : > { %8432 = vtanh.f32 %v2649_v31 }
0x10c6   : > { %v8423_v24 = vpop.eup %8422 }
0x10c7   : > { %v8425_v42 = vpop.eup %8424  ;;  %v2656_v33 = vadd.f32 1.0, %v8423_v24 }
0x10c8   : > { %v8427_v40 = vpop.eup %8426  ;;  %v2657_v41 = vadd.f32 1.0, %v8425_v42 }
0x10c9   : > { %v8429_v48 = vpop.eup %8428  ;;  %v2662_v49 = vmul.f32 0.5, %v2656_v33  ;;  %v2658_v39 = vadd.f32 1.0, %v8427_v40 }
0x10ca   : > { %v2659_v45 = vadd.f32 1.0, %v8429_v48  ;;  %v2663_v26 = vmul.f32 0.5, %v2657_v41 }
0x10cb   : > { %v2664_v27 = vmul.f32 0.5, %v2658_v39  ;;  %v2668_v32 = vmul.f32 %v2662_v49, %v2604_v30  ;;  %v7936_v49 = vld [vmem:[%s8783_s5 + $0x44] ss:$8 sps:$4 sm:$0xff]   ;;  %v7934_v39 = vld [vmem:[%s8783_s5 + $0x40] ss:$8 sps:$4 sm:$0xff]  }
0x10cc   : > { %v2665_v28 = vmul.f32 0.5, %v2659_v45  ;;  %v2669_v38 = vmul.f32 %v2663_v26, %v2606_v34  ;;  %v7048_v34 = vld [vmem:[%s9090_s10] ss:$0 sm:$0xff]  ;;  %2995 = vmatprep.subr.bf16.mxu1 %v7936_v49  ;;  %v7939_v45 = vld [vmem:[%s8783_s5 + $0x54] ss:$8 sps:$4 sm:$0xff]  }
0x10cd   : > { %v2670_v35 = vmul.f32 %v2664_v27, %v2608_v37  ;;  %2996 = vmatpush1.bf16.msra.mxu1 %v7934_v39  ;;  %v7937_v26 = vld [vmem:[%s8783_s5 + $0x50] ss:$8 sps:$4 sm:$0xff]   ;;  %v7942_v27 = vld [vmem:[%s8783_s5 + $0x64] ss:$8 sps:$4 sm:$0xff]  }
0x10ce   : > { %v8431_v36 = vpop.eup %8430  ;;  %v2671_v46 = vmul.f32 %v2665_v28, %v2610_v50  ;;  %2997 = vmatprep.subr.bf16.mxu1 %v7939_v45  ;;  %v7940_v28 = vld [vmem:[%s8783_s5 + $0x60] ss:$8 sps:$4 sm:$0xff]  }
0x10cf   : > { %v8433_v51 = vpop.eup %8432  ;;  %v2706_v54 = vpack.c.bf16 %v2670_v35, %v2668_v32  ;;  %v2660_v55 = vadd.f32 1.0, %v8431_v36  ;;  %v7945_v32 = vld [vmem:[%s8783_s5 + $0x74] ss:$8 sps:$4 sm:$0xff]   ;;  %v7943_v35 = vld [vmem:[%s8783_s5 + $0x70] ss:$8 sps:$4 sm:$0xff]   ;;  %s9805_s5 = smov 48  }
0x10d0   : > { %v2707_v56 = vpack.c.bf16 %v2671_v46, %v2669_v38  ;;  %v2661_v57 = vadd.f32 1.0, %v8433_v51 }
0x10d1   : > { %v2666_v58 = vmul.f32 0.5, %v2660_v55  ;;  %2998 = vmatpush1.bf16.msra.mxu1 %v7937_v26 }
0x10d2   : > { %2845 = vmatprep.mubr.bf16.mxu0 %v2707_v56  ;;  %v2667_v59 = vmul.f32 0.5, %v2661_v57  ;;  %2999 = vmatprep.subr.bf16.mxu1 %v7942_v27 }
0x10d3   : > { %2846 = vmatmul.mubr.bf16.vlgmr.msra.gmra.mrb[20].mxu0 %v2706_v54  ;;  %v2672_v61 = vmul.f32 %v2666_v58, %v2614_v1 }
0x10d4   : > { %v2673_v60 = vmul.f32 %v2667_v59, %v2616_v5 }
0x10d5   : > { %v2708_v63 = vpack.c.bf16 %v2672_v61, %v2672_v61  ;;  %3000 = vmatpush1.bf16.msra.mxu1 %v7940_v28 }
0x10d6   : > { %v2709_v62 = vpack.c.bf16 %v2673_v60, %v2673_v60  ;;  %3001 = vmatprep.subr.bf16.mxu1 %v7945_v32  ;;  %v7067_v60 = vld [vmem:[%s8798_s3 + $0x1] ss:$0 sm:$0xff]  ;;  %s9806_s3 = smov 64  }
0x10d8   : > { %2853 = vmatprep.mubr.bf16.mxu0 %v2709_v62 }
0x10d9   : > { %3002 = vmatpush1.bf16.msra.mxu1 %v7943_v35 }
0x10db   : > { %2854 = vmatmul.mubr.bf16.gmra.mrb[24].mxu0 %v2708_v63  ;;  %v7068_v63 = vld [vmem:[%s8804_s1 + $0x1] ss:$0 sm:$0xff]  ;;  %s9807_s1 = smov 112  }
0x11a6   : > { %v7550_v30 = vpop.f32.mrb[20].mxu0 }
0x11a7   : > { %v7551_v37 = vpop.f32.mrb[21].mxu0 }
0x11a8   : > { %v7552_v50 = vadd.f32 %v7551_v37, %v7550_v30  ;;  %v7553_v2 = vpop.f32.mrb[22].mxu0 }
0x11a9   : > { %v7554_v1 = vpop.f32.mrb[23].mxu0 }
0x11aa   : > { %v2848_v3 = vadd.f32 %v7552_v50, %v7048_v34  ;;  %v7555_v4 = vadd.f32 %v7554_v1, %v7553_v2 }
0x11ac   : > { %v9094_v5 = vadd.f32 %v2848_v3, %v9004_v16  ;;  %v2851_v6 = vadd.f32 %v7555_v4, %v7048_v34 }
0x11ae   : > { %v9097_v47 = vadd.f32 %v2851_v6, %v9009_v19  ;;  %v7556_v44 = vpop.f32.mrb[24].mxu0  ;;  %v2868_v7 = vsel %vm1376_vm0, %v9094_v5, 0.0 }
0x11af   : > { %2869 = vadd.xlane.f32.xlu0 %v2868_v7  ;;  %v7557_v8 = vpop.f32.mrb[25].mxu0 }
0x11b0   : > { %v7558_v9 = vadd.f32 %v7557_v8, %v7556_v44  ;;  %v7559_v43 = vpop.f32.mrb[26].mxu0  ;;  %v2871_v10 = vsel %vm1376_vm0, %v9097_v47, 0.0  ;;  %v7077_v8 = vld [vmem:[%s8818_s0 + $0x2] sm:$0x3]  ;;  %s9808_s0 = smov 96  }
0x11b1   : > { %2872 = vadd.xlane.f32.xlu1 %v2871_v10  ;;  %v7560_v11 = vpop.f32.mrb[27].mxu0  ;;  %v2946_v10 = vrot.slane %v7077_v8, %v8825_v25 }
0x11b2   : > { %v2856_v12 = vadd.f32 %v7558_v9, %v7048_v34  ;;  %v2942_v9 = vrot.slane %v7077_v8, %v8821_v23 }
0x11b4   : > { %v9104_v16 = vadd.f32 %v2856_v12, %v9007_v18 }
0x11b6   : > { %v2874_v19 = vsel %vm1446_vm2, %v9104_v16, 0.0 }
0x11b7   : > { %2875 = vadd.xlane.f32.xlu0 %v2874_v19 }
0x123c   : > { %v2870_v13 = vpop.xlane.xlu0 %2869 }
0x123d   : > { %v2877_v14 = vmul.f32 0.015625, %v2870_v13 }
0x123e   : > { %v2873_v15 = vpop.xlane.xlu1 %2872 }
0x123f   : > { %v2880_v17 = vsub.f32 %v9094_v5, %v2877_v14  ;;  %v2878_v20 = vmul.f32 0.015625, %v2873_v15 }
0x1241   : > { %v2881_v52 = vsub.f32 %v9097_v47, %v2878_v20  ;;  %v2883_v29 = vmul.f32 %v2880_v17, %v2880_v17 }
0x1243   : > { %v2886_v31 = vsel %vm1376_vm0, %v2883_v29, 0.0  ;;  %v2884_v18 = vmul.f32 %v2881_v52, %v2881_v52 }
0x1244   : > { %2887 = vadd.xlane.f32.xlu1 %v2886_v31  ;;  %v2876_v24 = vpop.xlane.xlu0 %2875 }
0x1245   : > { %v2879_v42 = vmul.f32 0.015625, %v2876_v24  ;;  %v2889_v33 = vsel %vm1376_vm0, %v2884_v18, 0.0 }
0x1246   : > { %2890 = vadd.xlane.f32.xlu0 %v2889_v33 }
0x1247   : > { %v2882_v40 = vsub.f32 %v9104_v16, %v2879_v42 }
0x1249   : > { %v2885_v41 = vmul.f32 %v2882_v40, %v2882_v40 }
0x124b   : > { %v2892_v48 = vsel %vm1446_vm2, %v2885_v41, 0.0 }
0x124c   : > { %2893 = vadd.xlane.f32.xlu1 %v2892_v48 }
0x12d1   : > { %v2888_v36 = vpop.xlane.xlu1 %2887 }
0x12d2   : > { %v2895_v38 = vmul.f32 0.015625, %v2888_v36 }
0x12d3   : > { %v2891_v46 = vpop.xlane.xlu0 %2890 }
0x12d4   : > { %v2898_v51 = vadd.f32 1e-06, %v2895_v38  ;;  %v2896_v54 = vmul.f32 0.015625, %v2891_v46 }
0x12d6   : > { %8434 = vrsqrt.f32 %v2898_v51  ;;  %v2899_v55 = vadd.f32 1e-06, %v2896_v54 }
0x12d8   : > { %8436 = vrsqrt.f32 %v2899_v55 }
0x12d9   : > { %v2894_v56 = vpop.xlane.xlu1 %2893 }
0x12da   : > { %v2897_v57 = vmul.f32 0.015625, %v2894_v56 }
0x12dc   : > { %v2900_v58 = vadd.f32 1e-06, %v2897_v57 }
0x12de   : > { %8438 = vrsqrt.f32 %v2900_v58 }
0x12e0   : > { %v8435_v59 = vpop.eup %8434 }
0x12e1   : > { %v2904_v61 = vmul.f32 %v8435_v59, %v2880_v17 }
0x12e2   : > { %v8437_v62 = vpop.eup %8436 }
0x12e3   : > { %v2913_v30 = vmul.f32 %v7067_v60, %v2904_v61  ;;  %v2905_v34 = vmul.f32 %v8437_v62, %v2881_v52 }
0x12e5   : > { %v2922_v37 = vadd.f32 %v7068_v63, %v2913_v30  ;;  %v2914_v50 = vmul.f32 %v7067_v60, %v2905_v34 }
0x12e7   : > { %v2923_v2 = vadd.f32 %v7068_v63, %v2914_v50 }
0x12e8   : > { %v8439_v1 = vpop.eup %8438 }
0x12e9   : > { %v2934_v3 = vpack.c.bf16 %v2923_v2, %v2922_v37  ;;  %v2906_v4 = vmul.f32 %v8439_v1, %v2882_v40 }
0x12eb   : > { %7086 = vmatmul.mubr.msk.bf16.vlgmr.msra.gmra.mrb[36].mxu1 %vm1376_vm0, %v2934_v3  ;;  %v2915_v6 = vmul.f32 %v7067_v60, %v2906_v4 }
0x12ec   : > { %3037 = vmatprep.mubr.bf16.mxu1 %v8544_v0 }
0x12ed   : > { %v2924_v44 = vadd.f32 %v7068_v63, %v2915_v6 }
0x12ef   : > { %v2935_v7 = vpack.c.bf16 %v2924_v44, %v2924_v44 }
0x12f3   : > { %7087 = vmatmul.mubr.msk.bf16.gmra.mrb[40].mxu1 %vm1376_vm0, %v2935_v7 }
0x13be   : > { %v3029_v43 = vpop.f32.mrb[36].mxu1 }
0x13bf   : > { %v3031_v11 = vpop.f32.mrb[37].mxu1  ;;  %v3030_v19 = vadd.f32 %v3029_v43, %v2942_v9 }
0x13c0   : > { %v3033_v12 = vpop.f32.mrb[38].mxu1  ;;  %v3032_v15 = vadd.f32 %v3031_v11, %v2946_v10 }
0x13c1   : > { %v3034_v13 = vadd.f32 %v3033_v12, %v2942_v9  ;;  %v3035_v14 = vpop.f32.mrb[39].mxu1 }
0x13c2   : > { %v3036_v17 = vadd.f32 %v3035_v14, %v2946_v10 }
0x13c3   : > { %v9130_v20 = vpack.c.bf16 %v3034_v13, %v3030_v19 }
0x13c4   : > { %v9132_v52 = vpack.c.bf16 %v3036_v17, %v3032_v15 }
0x13c5   : > { %3215 = vrot.lane.b32.xlu1 %v9130_v20, %s9805_s5  ;;  %3052 = vrot.lane.b32.xlu0 %v9130_v20, %s9806_s3 }
0x13c6   : > { %7708 = vmatprep.mubr.msk.bf16.mxu1 %vm1628_vm3, %v9130_v20  ;;  %v3039_v29 = vpop.f32.mrb[40].mxu1 }
0x13c7   : > { %v3040_v31 = vadd.f32 %v3039_v29, %v2942_v9  ;;  %v3041_v18 = vpop.f32.mrb[41].mxu1 }
0x13c8   : > { %v3043_v24 = vpop.f32.mrb[42].mxu1  ;;  %v3042_v26 = vadd.f32 %v3041_v18, %v2946_v10 }
0x13c9   : > { %v9140_v42 = vpack.c.bf16 %v3040_v31, %v3040_v31  ;;  %3211 = vrot.lane.b32.xlu0 %v9130_v20, %s9807_s1  ;;  %v3044_v33 = vpop.f32.mrb[43].mxu1 }
0x13ca   : > { %v9168_v35 = vpack.c.bf16 %v3042_v26, %v3042_v26 }
0x13cb   : > { %3054 = vrot.lane.b32.xlu1 %v9140_v42, %s9806_s3  ;;  %s1226_s3 = sld [smem:[#allocation3 + %s8695_s20]] }
0x13cc   : > { %v3161_v46 = vand.u32 %v9168_v35, %v8850_v53 }
0x13cd   : > { %3213 = vrot.lane.b32.xlu0 %v9140_v42, %s9807_s1 }
0x13cf   : > { %3217 = vrot.lane.b32.xlu1 %v9140_v42, %s9805_s5 }
0x13d1   : > { %3381 = vrot.lane.b32.xlu0 %v9130_v20, %s9808_s0  ;;  %p1227_p5 = scmp.lt.s32.totalorder %s1226_s3, 2 }
0x13d3   : > { %3385 = vrot.lane.b32.xlu1 %v9130_v20, %s9809_s29  ;;  %s9854_s3 = smov (!%p1227_p5, %s1226_s3), 2 }
0x13d7   : > { %3387 = vrot.lane.b32.xlu1 %v9140_v42, %s9809_s29 }
0x13db   : > { %3383 = vrot.lane.b32.xlu1 %v9140_v42, %s9808_s0 }
0x1437   : > { %v3053_v40 = vpop.permute.xlu0 %3052  ;;  %v3216_v41 = vpop.permute.xlu1 %3215 }
0x1438   : > { %v3063_v48 = vsel %vm1628_vm3, %v3053_v40, 0  ;;  %v3226_v49 = vsel %vm1628_vm3, %v3216_v41, 0  ;;  %7816 = vmatprep.subr.msk.bf16.mxu1 %vm1628_vm3, %v3053_v40  ;;  %7818 = vmatprep.subr.msk.bf16.mxu0 %vm1628_vm3, %v3216_v41 }
0x1439   : > { %7705 = vmatpush3.bf16.xpose.msra.mxu1 %v3063_v48  ;;  %7721 = vmatpush3.bf16.xpose.msra.mxu0 %v3226_v49 }
0x143b   : > { %v3212_v39 = vpop.permute.xlu0 %3211 }
0x143c   : > { %7724 = vmatprep.mubr.msk.bf16.mxu0 %vm1628_vm3, %v3212_v39 }
0x143d   : > { %v3055_v45 = vpop.permute.xlu1 %3054 }
0x143e   : > { %7817 = vmatprep.subr.msk.bf16.mxu1 %vm1628_vm3, %v3055_v45  ;;  %v3066_v27 = vsel %vm1628_vm3, %v3055_v45, 0 }
0x143f   : > { %v3214_v36 = vpop.permute.xlu0 %3213 }
0x1441   : > { %7707 = vmatpush3.bf16.xpose.msra.mxu1 %v3066_v27  ;;  %v3218_v28 = vpop.permute.xlu1 %3217 }
0x1442   : > { %v3229_v32 = vsel %vm1628_vm3, %v3218_v28, 0  ;;  %7712 = vmatprep.subr.bf16.mxu1 %v9132_v52  ;;  %7819 = vmatprep.subr.msk.bf16.mxu0 %vm1628_vm3, %v3218_v28 }
0x1443   : > { %7723 = vmatpush3.bf16.xpose.msra.mxu0 %v3229_v32  ;;  %v3382_v51 = vpop.permute.xlu0 %3381 }
0x1445   : > { %v3386_v38 = vpop.permute.xlu1 %3385 }
0x1446   : > { %7820 = vmatprep.subr.msk.bf16.mxu0 %vm1628_vm3, %v3386_v38  ;;  %v3396_v54 = vsel %vm1628_vm3, %v3386_v38, 0 }
0x1448   : > { %7709 = vmatmul.mubr.msk.bf16.vlgmr.msra.gmra.mrb[44].mxu1 %vm1628_vm3, %v9140_v42 }
0x1449   : > { %7713 = vmatpush3.bf16.msra.mxu1 %v9132_v52  ;;  %v3388_v55 = vpop.permute.xlu1 %3387 }
0x144a   : > { %7714 = vmatprep.subr.bf16.mxu1 %v3161_v46  ;;  %7725 = vmatmul.mubr.msk.bf16.vlgmr.msra.gmra.mrb[28].mxu0 %vm1628_vm3, %v3214_v36  ;;  %v3399_v56 = vsel %vm1628_vm3, %v3388_v55, 0 }
0x144b   : > { %7737 = vmatpush3.bf16.xpose.msra.mxu0 %v3396_v54  ;;  %7740 = vmatprep.mubr.msk.bf16.mxu0 %vm1628_vm3, %v3382_v51 }
0x144c   : > { %7821 = vmatprep.subr.msk.bf16.mxu0 %vm1628_vm3, %v3388_v55 }
0x144d   : > { %7715 = vmatpush3.bf16.msra.mxu1 %v3161_v46  ;;  %v3384_v57 = vpop.permute.xlu1 %3383 }
0x1453   : > { %7739 = vmatpush3.bf16.xpose.msra.mxu0 %v3399_v56 }
0x145a   : > { %7741 = vmatmul.mubr.msk.bf16.vlgmr.msra.gmra.mrb[32].mxu0 %vm1628_vm3, %v3384_v57 }
0x151b   : > { %v7710_v58 = vpop.f32.mrb[44].mxu1 }
0x151c   : > { %v3102_v59 = vpop.f32.mrb[45].mxu1  ;;  %v3118_v34 = vmul.f32 0.25, %v7710_v58 }
0x151d   : > { %v3116_v60 = vmul.f32 0.25, %v3102_v59  ;;  %v7711_v61 = vpop.f32.mrb[46].mxu1  ;;  %v7726_v62 = vpop.f32.mrb[28].mxu0 }
0x151e   : > { %v3105_v63 = vpop.f32.mrb[47].mxu1  ;;  %v3265_v30 = vpop.f32.mrb[29].mxu0  ;;  %v3281_v3 = vmul.f32 0.25, %v7726_v62  ;;  %v3125_v44 = vsel %vm1699_vm5, %v3118_v34, -inf }
0x151f   : > { %v3117_v37 = vmul.f32 0.25, %v3105_v63  ;;  %v7727_v50 = vpop.f32.mrb[30].mxu0  ;;  %v3119_v2 = vsel %vm1692_vm4, %v3116_v60, -inf  ;;  %v3279_v6 = vmul.f32 0.25, %v3265_v30 }
0x1520   : > { %3120 = vmax.xlane.f32.xlu0 %v3119_v2  ;;  %v3268_v1 = vpop.f32.mrb[31].mxu0  ;;  %v3288_v7 = vsel %vm1699_vm5, %v3281_v3, -inf }
0x1521   : > { %v3122_v4 = vsel %vm1692_vm4, %v3117_v37, -inf  ;;  %v3280_v8 = vmul.f32 0.25, %v3268_v1  ;;  %v3282_v9 = vsel %vm1692_vm4, %v3279_v6, -inf }
0x1522   : > { %3123 = vmax.xlane.f32.xlu1 %v3122_v4 }
0x1523   : > { %v3285_v43 = vsel %vm1692_vm4, %v3280_v8, -inf }
0x1524   : > { %3126 = vmax.xlane.f32.xlu0 %v3125_v44 }
0x1526   : > { %3289 = vmax.xlane.f32.xlu1 %v3288_v7 }
0x1528   : > { %3283 = vmax.xlane.f32.xlu0 %v3282_v9 }
0x152c   : > { %3286 = vmax.xlane.f32.xlu0 %v3285_v43 }
0x152d   : > { %v7742_v10 = vpop.f32.mrb[32].mxu0 }
0x152e   : > { %v3435_v11 = vpop.f32.mrb[33].mxu0  ;;  %v3451_v14 = vmul.f32 0.25, %v7742_v10 }
0x152f   : > { %v3449_v12 = vmul.f32 0.25, %v3435_v11  ;;  %v7743_v19 = vpop.f32.mrb[34].mxu0 }
0x1530   : > { %v3438_v13 = vpop.f32.mrb[35].mxu0  ;;  %v3458_v31 = vsel %vm1699_vm5, %v3451_v14, -inf }
0x1531   : > { %v3450_v15 = vmul.f32 0.25, %v3438_v13  ;;  %v3452_v17 = vsel %vm1692_vm4, %v3449_v12, -inf }
0x1532   : > { %3453 = vmax.xlane.f32.xlu0 %v3452_v17 }
0x1533   : > { %v3455_v29 = vsel %vm1692_vm4, %v3450_v15, -inf }
0x1534   : > { %3456 = vmax.xlane.f32.xlu1 %v3455_v29 }
0x1536   : > { %3459 = vmax.xlane.f32.xlu0 %v3458_v31 }
0x15ad   : > { %v3121_v18 = vpop.xlane.xlu0 %3120 }
0x15ae   : > { %v3128_v24 = vsub.f32 %v3116_v60, %v3121_v18 }
0x15af   : > { %v3124_v33 = vpop.xlane.xlu1 %3123 }
0x15b0   : > { %v3131_v48 = vmul.f32 1.442695, %v3128_v24  ;;  %v3129_v27 = vsub.f32 %v3117_v37, %v3124_v33 }
0x15b1   : > { %v3127_v40 = vpop.xlane.xlu0 %3126 }
0x15b2   : > { %v3130_v41 = vsub.f32 %v3118_v34, %v3127_v40  ;;  %v3133_v38 = vmul.f32 1.442695, %v3129_v27 }
0x15b3   : > { %v3290_v49 = vpop.xlane.xlu1 %3289 }
0x15b4   : > { %v3135_v39 = vmul.f32 1.442695, %v3130_v41  ;;  %v3293_v45 = vsub.f32 %v3281_v3, %v3290_v49 }
0x15b5   : > { %v3284_v26 = vpop.xlane.xlu0 %3283 }
0x15b6   : > { %8440 = vpow2.f32 %v3135_v39  ;;  %v3298_v28 = vmul.f32 1.442695, %v3293_v45  ;;  %v3291_v32 = vsub.f32 %v3279_v6, %v3284_v26 }
0x15b7   : > { %8442 = vpow2.f32 %v3131_v48 }
0x15b8   : > { %8444 = vpow2.f32 %v3298_v28  ;;  %v3294_v36 = vmul.f32 1.442695, %v3291_v32 }
0x15b9   : > { %v3287_v62 = vpop.xlane.xlu0 %3286 }
0x15ba   : > { %8446 = vpow2.f32 %v3294_v36  ;;  %v3292_v34 = vsub.f32 %v3280_v8, %v3287_v62 }
0x15bb   : > { %8448 = vpow2.f32 %v3133_v38 }
0x15bc   : > { %v3296_v2 = vmul.f32 1.442695, %v3292_v34 }
0x15be   : > { %8450 = vpow2.f32 %v3296_v2 }
0x15bf   : > { %v3454_v63 = vpop.xlane.xlu0 %3453 }
0x15c0   : > { %v9191_v46 = vpop.eup %8440  ;;  %v3461_v4 = vsub.f32 %v3449_v12, %v3454_v63 }
0x15c1   : > { %v9193_v51 = vpop.eup %8442  ;;  %v3143_v54 = vsel %vm1699_vm5, %v9191_v46, 0.0  ;;  %v3457_v30 = vpop.xlane.xlu1 %3456 }
0x15c2   : > { %v9197_v55 = vpop.eup %8444  ;;  %3144 = vadd.xlane.f32.xlu1 %v3143_v54  ;;  %v3137_v58 = vsel %vm1692_vm4, %v9193_v51, 0.0  ;;  %v3462_v50 = vsub.f32 %v3450_v15, %v3457_v30  ;;  %v3464_v44 = vmul.f32 1.442695, %v3461_v4 }
0x15c3   : > { %v3306_v56 = vsel %vm1699_vm5, %v9197_v55, 0.0  ;;  %v3460_v37 = vpop.xlane.xlu0 %3459 }
0x15c4   : > { %v9201_v57 = vpop.eup %8446  ;;  %3307 = vadd.xlane.f32.xlu0 %v3306_v56  ;;  %v3463_v1 = vsub.f32 %v3451_v14, %v3460_v37  ;;  %v3466_v3 = vmul.f32 1.442695, %v3462_v50 }
0x15c5   : > { %v3300_v59 = vsel %vm1692_vm4, %v9201_v57, 0.0  ;;  %v8449_v60 = vpop.eup %8448 }
0x15c6   : > { %3138 = vadd.xlane.f32.xlu1 %v3137_v58  ;;  %v3140_v61 = vsel %vm1692_vm4, %v8449_v60, 0.0  ;;  %v3468_v6 = vmul.f32 1.442695, %v3463_v1  ;;  %8452 = vpow2.f32 %v3466_v3 }
0x15c8   : > { %3301 = vadd.xlane.f32.xlu0 %v3300_v59  ;;  %8454 = vpow2.f32 %v3468_v6  ;;  %v8451_v7 = vpop.eup %8450 }
0x15c9   : > { %8456 = vpow2.f32 %v3464_v44  ;;  %v3303_v43 = vsel %vm1692_vm4, %v8451_v7, 0.0 }
0x15cc   : > { %3141 = vadd.xlane.f32.xlu0 %v3140_v61 }
0x15d0   : > { %v9214_v9 = vpop.eup %8452 }
0x15d1   : > { %v3473_v8 = vsel %vm1692_vm4, %v9214_v9, 0.0 }
0x15d2   : > { %v9217_v10 = vpop.eup %8454 }
0x15d3   : > { %v3476_v11 = vsel %vm1699_vm5, %v9217_v10, 0.0  ;;  %v9223_v12 = vpop.eup %8456 }
0x15d4   : > { %v3470_v19 = vsel %vm1692_vm4, %v9223_v12, 0.0 }
0x15d7   : > { %3321 = vrot.lane.b32.xlu1 %v9168_v35, %s9807_s1 }
0x15db   : > { %3487 = vrot.lane.b32.xlu1 %v9132_v52, %s9808_s0 }
0x15e2   : > { %3319 = vrot.lane.b32.xlu0 %v9132_v52, %s9807_s1  ;;  %s1255_s1 = scalar_lea.vmem %s9762_s24, %s6983_s27 }
0x15ff   : > { %3304 = vadd.xlane.f32.xlu1 %v3303_v43 }
0x1601   : > { %3474 = vadd.xlane.f32.xlu0 %v3473_v8 }
0x1603   : > { %3477 = vadd.xlane.f32.xlu1 %v3476_v11 }
0x1607   : > { %3471 = vadd.xlane.f32.xlu1 %v3470_v19 }
0x1617   : > { %3553 = vrot.lane.b32.xlu0 %v9130_v20, %s9810_s30 }
0x1618   : > { %3489 = vrot.lane.b32.xlu1 %v9168_v35, %s9808_s0 }
0x161b   : > { %3549 = vrot.lane.b32.xlu0 %v9130_v20, %s9811_s8 }
0x161c   : > { %3555 = vrot.lane.b32.xlu1 %v9140_v42, %s9810_s30 }
0x1620   : > { %3551 = vrot.lane.b32.xlu1 %v9140_v42, %s9811_s8 }
0x164f   : > { %v3145_v13 = vpop.xlane.xlu1 %3144 }
0x1650   : > { %8458 = vrcp.f32 %v3145_v13 }
0x1651   : > { %v3308_v14 = vpop.xlane.xlu0 %3307 }
0x1653   : > { %v3139_v15 = vpop.xlane.xlu1 %3138 }
0x1654   : > { %8460 = vrcp.f32 %v3139_v15 }
0x1655   : > { %v3302_v17 = vpop.xlane.xlu0 %3301 }
0x1657   : > { %v3322_v48 = vpop.permute.xlu1 %3321 }
0x1658   : > { %v3331_v39 = vand.u32 %v3322_v48, %v8850_v53 }
0x1659   : > { %v3142_v29 = vpop.xlane.xlu0 %3141 }
0x165a   : > { %8462 = vrcp.f32 %v3142_v29  ;;  %v8459_v18 = vpop.eup %8458 }
0x165b   : > { %v3151_v20 = vmul.f32 %v8459_v18, %v9191_v46  ;;  %v3488_v45 = vpop.permute.xlu1 %3487  ;;  %8464 = vrcp.f32 %v3308_v14 }
0x165c   : > { %8466 = vrcp.f32 %v3302_v17 }
0x165d   : > { %v3320_v31 = vpop.permute.xlu0 %3319  ;;  %v3153_v49 = vpack.c.bf16 %v3151_v20, %v3151_v20 }
0x165e   : > { %7728 = vmatprep.subr.bf16.mxu1 %v3320_v31  ;;  %v8461_v24 = vpop.eup %8460 }
0x165f   : > { %v3147_v40 = vmul.f32 %v8461_v24, %v9193_v51 }
0x1664   : > { %v8463_v33 = vpop.eup %8462 }
0x1665   : > { %v3149_v41 = vmul.f32 %v8463_v33, %v8449_v60  ;;  %v8465_v32 = vpop.eup %8464 }
0x1666   : > { %v8467_v38 = vpop.eup %8466  ;;  %v3314_v51 = vmul.f32 %v8465_v32, %v9197_v55 }
0x1667   : > { %v3152_v42 = vpack.c.bf16 %v3149_v41, %v3147_v40  ;;  %v3310_v54 = vmul.f32 %v8467_v38, %v9201_v57 }
0x1668   : > { %v3316_v60 = vpack.c.bf16 %v3314_v51, %v3314_v51 }
0x1669   : > { %7716 = vmatprep.mubr.msk.bf16.mxu1 %vm1692_vm4, %v3152_v42 }
0x166a   : > { %7717 = vmatmul.mubr.msk.bf16.vlgmr.msra.gmra.mrb[48].mxu1 %vm1692_vm4, %v3153_v49 }
0x166b   : > { %7729 = vmatpush3.bf16.msra.mxu1 %v3320_v31 }
0x166c   : > { %7730 = vmatprep.subr.bf16.mxu1 %v3331_v39 }
0x166f   : > { %7731 = vmatpush3.bf16.msra.mxu1 %v3331_v39 }
0x1670   : > { %7744 = vmatprep.subr.bf16.mxu1 %v3488_v45 }
0x168c   : > { %v3305_v26 = vpop.xlane.xlu1 %3304 }
0x168d   : > { %8468 = vrcp.f32 %v3305_v26 }
0x168e   : > { %v3475_v27 = vpop.xlane.xlu0 %3474 }
0x1690   : > { %v3478_v28 = vpop.xlane.xlu1 %3477 }
0x1691   : > { %8470 = vrcp.f32 %v3478_v28 }
0x1692   : > { %8472 = vrcp.f32 %v3475_v27  ;;  %v3554_v37 = vpop.permute.xlu0 %3553 }
0x1693   : > { %v3564_v3 = vsel %vm1628_vm3, %v3554_v37, 0 }
0x1694   : > { %v3472_v36 = vpop.xlane.xlu1 %3471 }
0x1695   : > { %8474 = vrcp.f32 %v3472_v36 }
0x1696   : > { %v3550_v1 = vpop.permute.xlu0 %3549 }
0x1697   : > { %v8469_v46 = vpop.eup %8468 }
0x1698   : > { %v3312_v56 = vmul.f32 %v8469_v46, %v8451_v7  ;;  %v3490_v58 = vpop.permute.xlu1 %3489 }
0x1699   : > { %v3499_v63 = vand.u32 %v3490_v58, %v8850_v53 }
0x169a   : > { %v3315_v59 = vpack.c.bf16 %v3312_v56, %v3310_v54 }
0x169b   : > { %v8471_v61 = vpop.eup %8470 }
0x169c   : > { %7732 = vmatprep.mubr.msk.bf16.mxu1 %vm1692_vm4, %v3315_v59  ;;  %v8473_v62 = vpop.eup %8472  ;;  %v3484_v34 = vmul.f32 %v8471_v61, %v9217_v10  ;;  %v3556_v4 = vpop.permute.xlu1 %3555 }
0x169d   : > { %7733 = vmatmul.mubr.msk.bf16.vlgmr.msra.gmra.mrb[52].mxu1 %vm1692_vm4, %v3316_v60  ;;  %v3482_v57 = vmul.f32 %v8473_v62, %v9214_v9  ;;  %v3567_v6 = vsel %vm1628_vm3, %v3556_v4, 0 }
0x169e   : > { %7745 = vmatpush3.bf16.msra.mxu1 %v3488_v45  ;;  %v3486_v2 = vpack.c.bf16 %v3484_v34, %v3484_v34 }
0x169f   : > { %v8475_v30 = vpop.eup %8474  ;;  %7746 = vmatprep.subr.bf16.mxu1 %v3499_v63 }
0x16a0   : > { %v3480_v55 = vmul.f32 %v8475_v30, %v9223_v12  ;;  %v3552_v44 = vpop.permute.xlu1 %3551 }
0x16a2   : > { %7747 = vmatpush3.bf16.msra.mxu1 %v3499_v63  ;;  %v3485_v50 = vpack.c.bf16 %v3482_v57, %v3480_v55 }
0x16a3   : > { %7822 = vmatprep.subr.msk.bf16.mxu1 %vm1628_vm3, %v3554_v37 }
0x16a4   : > { %7748 = vmatprep.mubr.msk.bf16.mxu1 %vm1692_vm4, %v3485_v50 }
0x16a5   : > { %7749 = vmatmul.mubr.msk.bf16.vlgmr.msra.gmra.mrb[56].mxu1 %vm1692_vm4, %v3486_v2 }
0x16a6   : > { %7756 = vmatprep.mubr.msk.bf16.mxu1 %vm1628_vm3, %v3550_v1 }
0x16ab   : > { %7753 = vmatpush3.bf16.xpose.msra.mxu1 %v3564_v3 }
0x16ac   : > { %7823 = vmatprep.subr.msk.bf16.mxu1 %vm1628_vm3, %v3556_v4 }
0x16b3   : > { %7755 = vmatpush3.bf16.xpose.msra.mxu1 %v3567_v6  ;;  %v7947_v6 = vld [vmem:[%s8973_s6 + $0x28] sm:$0xff]  }
0x16ba   : > { %7757 = vmatmul.mubr.msk.bf16.vlgmr.msra.gmra.mrb[60].mxu1 %vm1628_vm3, %v3552_v44  ;;  %v7948_v44 = vld [vmem:[%s8973_s6 + $0x30] sm:$0xff]  }
0x16bb   : > { %4028 = vmatprep.mubr.bf16.mxu1 %v8544_v0 }
0x173d   : > { %v9259_v7 = vpop.f32.mrb[48].mxu1 }
0x173e   : > { %v9261_v9 = vpop.f32.mrb[49].mxu1 }
0x173f   : > { %v7719_v43 = vpop.f32.mrb[50].mxu1 }
0x1740   : > { %v9263_v10 = vpop.f32.mrb[51].mxu1  ;;  %v7949_v43 = vld [vmem:[%s8973_s6 + $0x38] sm:$0xff]  }
0x1770   : > { %v7734_v8 = vpop.f32.mrb[52].mxu1 }
0x1771   : > { %v3367_v11 = vpop.f32.mrb[53].mxu1 }
0x1772   : > { %v7735_v12 = vpop.f32.mrb[54].mxu1 }
0x1773   : > { %v3370_v19 = vpop.f32.mrb[55].mxu1 }
0x1774   : > { %v7860_v13 = vpack.i.bf16 %v3370_v19, %v3367_v11 }
0x1778   : > { %v7750_v14 = vpop.f32.mrb[56].mxu1 }
0x1779   : > { %v3535_v15 = vpop.f32.mrb[57].mxu1 }
0x177a   : > { %v7751_v17 = vpop.f32.mrb[58].mxu1 }
0x177b   : > { %v3538_v29 = vpop.f32.mrb[59].mxu1 }
0x177c   : > { %v7865_v31 = vpack.i.bf16 %v3538_v29, %v3535_v15 }
0x178d   : > { %v7758_v18 = vpop.f32.mrb[60].mxu1 }
0x178e   : > { %v3603_v24 = vpop.f32.mrb[61].mxu1  ;;  %v3619_v41 = vmul.f32 0.25, %v7758_v18 }
0x178f   : > { %v3617_v33 = vmul.f32 0.25, %v3603_v24  ;;  %v7759_v20 = vpop.f32.mrb[62].mxu1 }
0x1790   : > { %v3606_v40 = vpop.f32.mrb[63].mxu1  ;;  %v3626_v39 = vsel %vm1699_vm5, %v3619_v41, -inf }
0x1791   : > { %v3618_v48 = vmul.f32 0.25, %v3606_v40  ;;  %v3620_v42 = vsel %vm1692_vm4, %v3617_v33, -inf }
0x1792   : > { %3621 = vmax.xlane.f32.xlu0 %v3620_v42 }
0x1793   : > { %v3623_v49 = vsel %vm1692_vm4, %v3618_v48, -inf }
0x1794   : > { %3624 = vmax.xlane.f32.xlu1 %v3623_v49 }
0x1796   : > { %3627 = vmax.xlane.f32.xlu0 %v3626_v39 }
0x181f   : > { %v3622_v45 = vpop.xlane.xlu0 %3621 }
0x1820   : > { %v3629_v26 = vsub.f32 %v3617_v33, %v3622_v45 }
0x1821   : > { %v3625_v27 = vpop.xlane.xlu1 %3624 }
0x1822   : > { %v3632_v28 = vmul.f32 1.442695, %v3629_v26  ;;  %v3630_v32 = vsub.f32 %v3618_v48, %v3625_v27 }
0x1823   : > { %v3628_v36 = vpop.xlane.xlu0 %3627 }
0x1824   : > { %8476 = vpow2.f32 %v3632_v28  ;;  %v3634_v38 = vmul.f32 1.442695, %v3630_v32  ;;  %v3631_v46 = vsub.f32 %v3619_v41, %v3628_v36 }
0x1826   : > { %8478 = vpow2.f32 %v3634_v38  ;;  %v3636_v51 = vmul.f32 1.442695, %v3631_v46  ;;  %v7119_v38 = vld [vmem:[%s8999_s25 + $0x1] ss:$0 sm:$0xff] }
0x1828   : > { %8480 = vpow2.f32 %v3636_v51 }
0x182e   : > { %v8477_v54 = vpop.eup %8476 }
0x182f   : > { %v3638_v56 = vsel %vm1692_vm4, %v8477_v54, 0.0 }
0x1830   : > { %v8479_v58 = vpop.eup %8478  ;;  %3639 = vadd.xlane.f32.xlu0 %v3638_v56 }
0x1831   : > { %v3641_v61 = vsel %vm1692_vm4, %v8479_v58, 0.0 }
0x1832   : > { %v8481_v59 = vpop.eup %8480 }
0x1833   : > { %v3644_v60 = vsel %vm1699_vm5, %v8481_v59, 0.0 }
0x1834   : > { %3645 = vadd.xlane.f32.xlu1 %v3644_v60  ;;  %3642 = vadd.xlane.f32.xlu0 %v3641_v61 }
0x1845   : > { %3657 = vrot.lane.b32.xlu1 %v9168_v35, %s9811_s8 }
0x1849   : > { %7861 = vrot.lane.b32.xlu1 %v7860_v13, %s9810_s30 }
0x184a   : > { %3655 = vrot.lane.b32.xlu0 %v9132_v52, %s9811_s8 }
0x184d   : > { %3724 = vrot.lane.b32.xlu1 %v7734_v8, %s9810_s30 }
0x184e   : > { %7866 = vrot.lane.b32.xlu0 %v7865_v31, %s9809_s29 }
0x1851   : > { %3736 = vrot.lane.b32.xlu1 %v7750_v14, %s9809_s29 }
0x18bd   : > { %v3640_v62 = vpop.xlane.xlu0 %3639 }
0x18be   : > { %8482 = vrcp.f32 %v3640_v62 }
0x18c1   : > { %v3643_v63 = vpop.xlane.xlu0 %3642  ;;  %v3646_v30 = vpop.xlane.xlu1 %3645 }
0x18c2   : > { %8484 = vrcp.f32 %v3643_v63 }
0x18c3   : > { %8486 = vrcp.f32 %v3646_v30 }
0x18c5   : > { %v3656_v34 = vpop.permute.xlu0 %3655  ;;  %v3658_v37 = vpop.permute.xlu1 %3657 }
0x18c6   : > { %v3667_v35 = vand.u32 %v3658_v37, %v8850_v53  ;;  %7760 = vmatprep.subr.bf16.mxu0 %v3656_v34  ;;  %v7946_v53 = vld [vmem:[%s8973_s6 + $0x20] sm:$0xff]  }
0x18c7   : > { %7761 = vmatpush3.bf16.msra.mxu0 %v3656_v34 }
0x18c8   : > { %7762 = vmatprep.subr.bf16.mxu0 %v3667_v35  ;;  %v8483_v52 = vpop.eup %8482 }
0x18c9   : > { %v3648_v50 = vmul.f32 %v8483_v52, %v8477_v54  ;;  %v7862_v14 = vpop.permute.xlu1 %7861  ;;  %v7867_v17 = vpop.permute.xlu0 %7866 }
0x18ca   : > { %v7864_v29 = vunpack.i.h.bf16 %v7862_v14  ;;  %v7863_v31 = vunpack.i.l.bf16 %v7862_v14  ;;  %v7869_v24 = vunpack.i.h.bf16 %v7867_v17  ;;  %v7868_v33 = vunpack.i.l.bf16 %v7867_v17 }
0x18cb   : > { %7763 = vmatpush3.bf16.msra.mxu0 %v3667_v35 }
0x18cc   : > { %v8485_v55 = vpop.eup %8484  ;;  %7768 = vmatprep.subr.bf16.mxu0 %v7946_v53  ;;  %v3754_v20 = vsel %vm1628_vm3, %v9263_v10, %v7864_v29  ;;  %v3753_v40 = vsel %vm1628_vm3, %v9261_v9, %v7863_v31 }
0x18cd   : > { %v8487_v57 = vpop.eup %8486  ;;  %v3650_v2 = vmul.f32 %v8485_v55, %v8479_v58  ;;  %v3725_v15 = vpop.permute.xlu1 %3724  ;;  %v3756_v27 = vsel %vm2333_vm6, %v3753_v40, %v7868_v33  ;;  %v3757_v28 = vsel %vm2333_vm6, %v3754_v20, %v7869_v24  ;;  %v7122_v40 = vld [vmem:[%s9042_s4 + $0x1] ss:$0 sm:$0xff] }
0x18ce   : > { %v3652_v1 = vmul.f32 %v8487_v57, %v8481_v59  ;;  %v3755_v48 = vsel %vm1628_vm3, %v9259_v7, %v3725_v15 }
0x18cf   : > { %v3653_v3 = vpack.c.bf16 %v3650_v2, %v3648_v50 }
0x18d0   : > { %v3654_v4 = vpack.c.bf16 %v3652_v1, %v3652_v1  ;;  %v7952_v1 = vld [vmem:[%s9027_s26 + $0x44] ss:$8 sps:$4 sm:$0xff]  }
0x18d1   : > { %7764 = vmatprep.mubr.msk.bf16.mxu0 %vm1692_vm4, %v3653_v3  ;;  %v3737_v18 = vpop.permute.xlu1 %3736  ;;  %v7950_v3 = vld [vmem:[%s9027_s26 + $0x40] ss:$8 sps:$4 sm:$0xff]   ;;  %3996 = vmatprep.subr.bf16.mxu1 %v7952_v1 }
0x18d2   : > { %7765 = vmatmul.mubr.msk.bf16.vlgmr.msra.gmra.mrb[36].mxu0 %vm1692_vm4, %v3654_v4  ;;  %v3758_v49 = vsel %vm2333_vm6, %v3755_v48, %v3737_v18  ;;  %3997 = vmatpush1.bf16.msra.mxu1 %v7950_v3  ;;  %v7955_v4 = vld [vmem:[%s9027_s26 + $0x54] ss:$8 sps:$4 sm:$0xff]  }
0x18d3   : > { %7769 = vmatpush3.bf16.msra.mxu0 %v7946_v53  ;;  %v7953_v53 = vld [vmem:[%s9027_s26 + $0x50] ss:$8 sps:$4 sm:$0xff]   ;;  %3998 = vmatprep.subr.bf16.mxu1 %v7955_v4 }
0x18d4   : > { %7770 = vmatprep.subr.bf16.mxu0 %v7947_v6 }
0x18d6   : > { %3999 = vmatpush1.bf16.msra.mxu1 %v7953_v53 }
0x18d7   : > { %7771 = vmatpush3.bf16.msra.mxu0 %v7947_v6  ;;  %v7958_v6 = vld [vmem:[%s9027_s26 + $0x64] ss:$8 sps:$4 sm:$0xff]  }
0x18d8   : > { %7772 = vmatprep.subr.bf16.mxu0 %v7948_v44  ;;  %4000 = vmatprep.subr.bf16.mxu1 %v7958_v6 }
0x18db   : > { %7773 = vmatpush3.bf16.msra.mxu0 %v7948_v44  ;;  %v7956_v44 = vld [vmem:[%s9027_s26 + $0x60] ss:$8 sps:$4 sm:$0xff]  }
0x18dc   : > { %7774 = vmatprep.subr.bf16.mxu0 %v7949_v43  ;;  %4001 = vmatpush1.bf16.msra.mxu1 %v7956_v44 }
0x18df   : > { %7775 = vmatpush3.bf16.msra.mxu0 %v7949_v43  ;;  %v7959_v43 = vld [vmem:[%s9027_s26 + $0x70] ss:$8 sps:$4 sm:$0xff]  }
0x19a5   : > { %v7766_v8 = vpop.f32.mrb[36].mxu0 }
0x19a6   : > { %3748 = vrot.lane.b32.xlu1 %v7766_v8, %s9805_s5  ;;  %v3703_v11 = vpop.f32.mrb[37].mxu0  ;;  %v7961_v8 = vld [vmem:[%s9027_s26 + $0x74] ss:$8 sps:$4 sm:$0xff]   ;;  %s1238_s26 = sld [smem:[#allocation3 + %s8695_s20]] }
0x19a7   : > { %v7767_v12 = vpop.f32.mrb[38].mxu0  ;;  %4002 = vmatprep.subr.bf16.mxu1 %v7961_v8 }
0x19a8   : > { %v3706_v19 = vpop.f32.mrb[39].mxu0  ;;  %4003 = vmatpush1.bf16.msra.mxu1 %v7959_v43 }
0x19a9   : > { %v7870_v13 = vpack.i.bf16 %v3706_v19, %v3703_v11 }
0x19ab   : > { %7871 = vrot.lane.b32.xlu0 %v7870_v13, %s9805_s5  ;;  %s1221_s5 = sld [smem:[#allocation3 + %s8695_s20]] }
0x19ac   : > { %p1239_p6 = scmp.lt.s32.totalorder %s1238_s26, 2 }
0x19ae   : > { %s9856_s26 = smov (!%p1239_p6, %s1238_s26), 2 }
0x19af   : > { %s6980_s25 = sshll.u32 %s9856_s26, 3 }
0x19b1   : > { %p1222_p4 = scmp.lt.s32.totalorder %s1221_s5, 2 }
0x19b3   : > { %s9852_s5 = smov (!%p1222_p4, %s1221_s5), 2 }
0x19b4   : > { %s1224_s29 = scalar_lea.vmem %s9757_s19, %s9852_s5 }
0x1a18   : > { %v3749_v41 = vpop.permute.xlu1 %3748 }
0x1a19   : > { %v3761_v26 = vsel %vm2337_vm7, %v3758_v49, %v3749_v41  ;;  %v7123_v49 = vld [vmem:[%s9048_s11 + $0x1] ss:$0 sm:$0xff]  ;;  %s1231_s11 = sld [smem:[#allocation3 + %s8695_s20]] }
0x1a1a   : > { %v3772_v36 = vpack.c.bf16 %v3761_v26, %v3761_v26 }
0x1a1d   : > { %v7872_v42 = vpop.permute.xlu0 %7871 }
0x1a1e   : > { %v7874_v39 = vunpack.i.h.bf16 %v7872_v42  ;;  %v7873_v45 = vunpack.i.l.bf16 %v7872_v42 }
0x1a1f   : > { %p1232_p2 = scmp.lt.s32.totalorder %s1231_s11, 2 }
0x1a20   : > { %v3759_v10 = vsel %vm2337_vm7, %v3756_v27, %v7873_v45  ;;  %v3760_v9 = vsel %vm2337_vm7, %v3757_v28, %v7874_v39  ;;  %v7962_v28 = vld [vmem:[%s9059_s2 + $0xc0] sm:$0xff]  }
0x1a21   : > { %v3771_v32 = vpack.c.bf16 %v3760_v9, %v3759_v10  ;;  %v7963_v10 = vld [vmem:[%s9059_s2 + $0x80] sm:$0xff]   ;;  %7600 = vmatprep.subr.bf16.mxu0 %v7962_v28  ;;  %v7964_v9 = vld [vmem:[%s9059_s2 + $0xc8] sm:$0xff]   ;;  %s9848_s11 = smov (!%p1232_p2, %s1231_s11), 2 }
0x1a22   : > { %s7494_s4 = sshll.u32 %s9848_s11, 8  ;;  %s9812_s11 = sld [smem:[#allocation18_spill]] }
0x1a23   : > { %7776 = vmatprep.mubr.msk.bf16.mxu0 %vm1376_vm0, %v3771_v32  ;;  %v7965_v32 = vld [vmem:[%s9059_s2 + $0x88] sm:$0xff]   ;;  %s9362_s6 = scalar_lea.vmem %s9759_s21, %s7494_s4 }
0x1a24   : > { %7777 = vmatmul.mubr.msk.bf16.vlgmr.msra.gmra.mrb[40].mxu0 %vm1376_vm0, %v3772_v36  ;;  %v7966_v36 = vld [vmem:[%s9059_s2 + $0xd0] sm:$0xff]  }
0x1a25   : > { %7601 = vmatpush3.bf16.msra.mxu0 %v7963_v10 }
0x1a26   : > { %7602 = vmatprep.subr.bf16.mxu0 %v7964_v9 }
0x1a28   : > { %s1229_s4 = scalar_lea.vmem %s9812_s11, %s9854_s3 }
0x1a29   : > { %7603 = vmatpush3.bf16.msra.mxu0 %v7965_v32 }
0x1a2a   : > { %7604 = vmatprep.subr.bf16.mxu0 %v7966_v36 }
0x1af7   : > { %v7778_v7 = vpop.f32.mrb[40].mxu0 }
0x1af8   : > { %v3853_v46 = vadd.f32 %v7778_v7, %v9104_v16  ;;  %v3837_v51 = vpop.f32.mrb[41].mxu0  ;;  %v7967_v7 = vld [vmem:[%s9059_s2 + $0x90] sm:$0xff]  }
0x1af9   : > { %v3851_v54 = vadd.f32 %v3837_v51, %v9094_v5  ;;  %v7779_v56 = vpop.f32.mrb[42].mxu0  ;;  %7605 = vmatpush3.bf16.msra.mxu0 %v7967_v7  ;;  %v7970_v51 = vld [vmem:[%s9059_s2 + $0xe0] sm:$0xff]  }
0x1afa   : > { %v3864_v58 = vadd.f32 %v7119_v38, %v3853_v46  ;;  %v3840_v59 = vpop.f32.mrb[43].mxu0  ;;  %v7969_v46 = vld [vmem:[%s9059_s2 + $0x98] sm:$0xff]   ;;  %v7972_v56 = vld [vmem:[%s9059_s2 + $0xe8] sm:$0xff]  }
0x1afb   : > { %v9305_v60 = vadd.f32 %v7119_v38, %v3851_v54  ;;  %v3852_v61 = vadd.f32 %v3840_v59, %v9097_v47  ;;  %v7971_v54 = vld [vmem:[%s9059_s2 + $0xa0] sm:$0xff]   ;;  %v7974_v59 = vld [vmem:[%s9059_s2 + $0xf0] sm:$0xff]  }
0x1afc   : > { %v3875_v2 = vsel %vm1446_vm2, %v3864_v58, 0.0 }
0x1afd   : > { %v3863_v62 = vadd.f32 %v7119_v38, %v3852_v61  ;;  %v3869_v63 = vsel %vm1376_vm0, %v9305_v60, 0.0  ;;  %v7968_v38 = vld [vmem:[%s9059_s2 + $0xd8] sm:$0xff]   ;;  %v7975_v61 = vld [vmem:[%s9059_s2 + $0xb0] sm:$0xff]  }
0x1afe   : > { %3870 = vadd.xlane.f32.xlu0 %v3869_v63  ;;  %7606 = vmatprep.subr.bf16.mxu0 %v7968_v38  ;;  %v7977_v63 = vld [vmem:[%s9059_s2 + $0xb8] sm:$0xff]  }
0x1aff   : > { %v3872_v30 = vsel %vm1376_vm0, %v3863_v62, 0.0  ;;  %7607 = vmatpush3.bf16.msra.mxu0 %v7969_v46 }
0x1b00   : > { %3873 = vadd.xlane.f32.xlu1 %v3872_v30  ;;  %7608 = vmatprep.subr.bf16.mxu0 %v7970_v51 }
0x1b03   : > { %7609 = vmatpush3.bf16.msra.mxu0 %v7971_v54 }
0x1b04   : > { %7610 = vmatprep.subr.bf16.mxu0 %v7972_v56 }
0x1b8b   : > { %v3871_v16 = vpop.xlane.xlu0 %3870 }
0x1b8c   : > { %v3878_v34 = vmul.f32 0.015625, %v3871_v16 }
0x1b8d   : > { %v3874_v5 = vpop.xlane.xlu1 %3873 }
0x1b8e   : > { %v3881_v37 = vsub.f32 %v9305_v60, %v3878_v34  ;;  %v3879_v35 = vmul.f32 0.015625, %v3874_v5 }
0x1b90   : > { %v3882_v52 = vsub.f32 %v3863_v62, %v3879_v35  ;;  %v3884_v47 = vmul.f32 %v3881_v37, %v3881_v37  ;;  %v7976_v62 = vld [vmem:[%s9059_s2 + $0xf8] sm:$0xff]  }
0x1b92   : > { %v3887_v55 = vsel %vm1376_vm0, %v3884_v47, 0.0  ;;  %v3885_v57 = vmul.f32 %v3882_v52, %v3882_v52 }
0x1b93   : > { %3888 = vadd.xlane.f32.xlu0 %v3887_v55  ;;  %v7132_v55 = vld [vmem:[%s9081_s7 + $0x2] sm:$0x3] }
0x1b94   : > { %v3890_v50 = vsel %vm1376_vm0, %v3885_v57, 0.0  ;;  %v3943_v57 = vrot.slane %v7132_v55, %v8821_v23 }
0x1b97   : > { %3891 = vadd.xlane.f32.xlu0 %v3890_v50  ;;  %v3947_v50 = vrot.slane %v7132_v55, %v8825_v25 }
0x1b9b   : > { %3876 = vadd.xlane.f32.xlu0 %v3875_v2 }
0x1c20   : > { %v3889_v11 = vpop.xlane.xlu0 %3888 }
0x1c21   : > { %v3896_v12 = vmul.f32 0.015625, %v3889_v11 }
0x1c23   : > { %v3899_v19 = vadd.f32 1e-06, %v3896_v12 }
0x1c24   : > { %v3892_v13 = vpop.xlane.xlu0 %3891 }
0x1c25   : > { %8488 = vrsqrt.f32 %v3899_v19  ;;  %v3897_v14 = vmul.f32 0.015625, %v3892_v13 }
0x1c27   : > { %v3900_v15 = vadd.f32 1e-06, %v3897_v14 }
0x1c28   : > { %v3877_v17 = vpop.xlane.xlu0 %3876 }
0x1c29   : > { %8490 = vrsqrt.f32 %v3900_v15  ;;  %v3880_v29 = vmul.f32 0.015625, %v3877_v17 }
0x1c2b   : > { %v3883_v31 = vsub.f32 %v3864_v58, %v3880_v29  ;;  %v7973_v58 = vld [vmem:[%s9059_s2 + $0xa8] sm:$0xff]   ;;  %s1244_s2 = sld [smem:[#allocation4 + %s8695_s20]]  ;;  %s6984_s20 = sshll.u32 %s8704_s28, 2 }
0x1c2c   : > { %7611 = vmatpush3.bf16.msra.mxu0 %v7973_v58 }
0x1c2d   : > { %v3886_v18 = vmul.f32 %v3883_v31, %v3883_v31  ;;  %7612 = vmatprep.subr.bf16.mxu0 %v7974_v59 }
0x1c2f   : > { %v8489_v24 = vpop.eup %8488  ;;  %v3893_v33 = vsel %vm1446_vm2, %v3886_v18, 0.0 }
0x1c30   : > { %v3905_v20 = vmul.f32 %v8489_v24, %v3881_v37  ;;  %3894 = vadd.xlane.f32.xlu1 %v3893_v33  ;;  %7613 = vmatpush3.bf16.msra.mxu0 %v7975_v61 }
0x1c31   : > { %7614 = vmatprep.subr.bf16.mxu0 %v7976_v62  ;;  %p1245_p3 = scmp.lt.s32.totalorder %s1244_s2, 3 }
0x1c32   : > { %v3914_v48 = vmul.f32 %v7122_v40, %v3905_v20 }
0x1c33   : > { %v8491_v41 = vpop.eup %8490  ;;  %s9850_s2 = smov (!%p1245_p3, %s1244_s2), 3 }
0x1c34   : > { %v3906_v42 = vmul.f32 %v8491_v41, %v3882_v52  ;;  %v3923_v45 = vadd.f32 %v7123_v49, %v3914_v48  ;;  %7615 = vmatpush3.bf16.msra.mxu0 %v7977_v63  ;;  %s7495_s7 = sshll.u32 %s9850_s2, 11 }
0x1c36   : > { %v3915_v39 = vmul.f32 %v7122_v40, %v3906_v42 }
0x1c38   : > { %v3924_v26 = vadd.f32 %v7123_v49, %v3915_v39 }
0x1c3a   : > { %v3935_v27 = vpack.c.bf16 %v3924_v26, %v3923_v45 }
0x1c3c   : > { %7141 = vmatmul.mubr.msk.bf16.vlgmr.msra.gmra.mrb[64].mxu1 %vm1376_vm0, %v3935_v27 }
0x1c3d   : > { %4038 = vmatprep.mubr.bf16.mxu1 %v8544_v0 }
0x1cbd   : > { %v3895_v30 = vpop.xlane.xlu1 %3894 }
0x1cbe   : > { %v3898_v16 = vmul.f32 0.015625, %v3895_v30 }
0x1cc0   : > { %v3901_v34 = vadd.f32 1e-06, %v3898_v16 }
0x1cc2   : > { %8492 = vrsqrt.f32 %v3901_v34 }
0x1ccc   : > { %v8493_v5 = vpop.eup %8492 }
0x1ccd   : > { %v3907_v37 = vmul.f32 %v8493_v5, %v3883_v31 }
0x1ccf   : > { %v3916_v35 = vmul.f32 %v7122_v40, %v3907_v37 }
0x1cd1   : > { %v3925_v52 = vadd.f32 %v7123_v49, %v3916_v35 }
0x1cd3   : > { %v3936_v47 = vpack.c.bf16 %v3925_v52, %v3925_v52 }
0x1cd5   : > { %7142 = vmatmul.mubr.msk.bf16.gmra.mrb[68].mxu1 %vm1376_vm0, %v3936_v47 }
0x1cd6   : > { %4588 = vmatprep.mubr.bf16.mxu1 %v8544_v0 }
0x1d0f   : > { %v4030_v2 = vpop.f32.mrb[64].mxu1 }
0x1d10   : > { %v4031_v1 = vadd.f32 %v4030_v2, %v3943_v57  ;;  %v4032_v3 = vpop.f32.mrb[65].mxu1 }
0x1d11   : > { %v4033_v4 = vadd.f32 %v4032_v3, %v3947_v50  ;;  %v4034_v53 = vpop.f32.mrb[66].mxu1 }
0x1d12   : > { %v4047_v6 = vmul.f32 %v4031_v1, %v4031_v1  ;;  %v4035_v44 = vadd.f32 %v4034_v53, %v3943_v57  ;;  %v4036_v43 = vpop.f32.mrb[67].mxu1 }
0x1d13   : > { %v4048_v8 = vmul.f32 %v4033_v4, %v4033_v4  ;;  %v4037_v11 = vadd.f32 %v4036_v43, %v3947_v50 }
0x1d14   : > { %v4053_v12 = vmul.f32 %v4047_v6, %v4031_v1  ;;  %v4049_v19 = vmul.f32 %v4035_v44, %v4035_v44 }
0x1d15   : > { %v4054_v13 = vmul.f32 %v4048_v8, %v4033_v4  ;;  %v4050_v14 = vmul.f32 %v4037_v11, %v4037_v11 }
0x1d16   : > { %v4059_v15 = vmul.f32 0.044715, %v4053_v12  ;;  %v4055_v17 = vmul.f32 %v4049_v19, %v4035_v44 }
0x1d17   : > { %v4060_v29 = vmul.f32 0.044715, %v4054_v13  ;;  %v4056_v31 = vmul.f32 %v4050_v14, %v4037_v11 }
0x1d18   : > { %v4065_v18 = vadd.f32 %v4059_v15, %v4031_v1  ;;  %v4061_v24 = vmul.f32 0.044715, %v4055_v17  ;;  %v7176_v17 = vld [vmem:[%s9090_s10 + $0x1] ss:$0 sm:$0xff]  ;;  %s9386_s10 = scalar_lea.vmem %s9761_s23, %s7495_s7  ;;  %s1242_s7 = scalar_lea.vmem %s9760_s22, %s6980_s25 }
0x1d19   : > { %v4066_v33 = vadd.f32 %v4060_v29, %v4033_v4  ;;  %v4062_v20 = vmul.f32 0.044715, %v4056_v31 }
0x1d1a   : > { %v4071_v40 = vmul.f32 0.7978846, %v4065_v18  ;;  %v4067_v41 = vadd.f32 %v4061_v24, %v4035_v44 }
0x1d1b   : > { %v4072_v48 = vmul.f32 0.7978846, %v4066_v33  ;;  %v4068_v42 = vadd.f32 %v4062_v20, %v4037_v11 }
0x1d1c   : > { %8494 = vtanh.f32 %v4071_v40  ;;  %v4073_v49 = vmul.f32 0.7978846, %v4067_v41 }
0x1d1d   : > { %8496 = vtanh.f32 %v4072_v48  ;;  %v4074_v39 = vmul.f32 0.7978846, %v4068_v42 }
0x1d1e   : > { %8498 = vtanh.f32 %v4073_v49 }
0x1d1f   : > { %8500 = vtanh.f32 %v4074_v39 }
0x1d26   : > { %v8495_v45 = vpop.eup %8494 }
0x1d27   : > { %v8497_v26 = vpop.eup %8496  ;;  %v4083_v27 = vadd.f32 1.0, %v8495_v45 }
0x1d28   : > { %v8499_v28 = vpop.eup %8498  ;;  %v4084_v10 = vadd.f32 1.0, %v8497_v26 }
0x1d29   : > { %v8501_v9 = vpop.eup %8500  ;;  %v4089_v32 = vmul.f32 0.5, %v4083_v27  ;;  %v4085_v36 = vadd.f32 1.0, %v8499_v28 }
0x1d2a   : > { %v4086_v7 = vadd.f32 1.0, %v8501_v9  ;;  %v4090_v38 = vmul.f32 0.5, %v4084_v10  ;;  %v4322_v10 = vld [vmem:[%s9362_s6 + $0x20] sm:$0xff] }
0x1d2b   : > { %v4091_v46 = vmul.f32 0.5, %v4085_v36  ;;  %v4095_v54 = vmul.f32 %v4089_v32, %v4031_v1  ;;  %v4320_v32 = vld [vmem:[%s9362_s6 + $0x10] sm:$0xff] }
0x1d2c   : > { %v4092_v51 = vmul.f32 0.5, %v4086_v7  ;;  %v4096_v58 = vmul.f32 %v4090_v38, %v4033_v4  ;;  %v4324_v36 = vld [vmem:[%s9362_s6 + $0x30] sm:$0xff] }
0x1d2d   : > { %v4097_v56 = vmul.f32 %v4091_v46, %v4035_v44  ;;  %v7200_v38 = vcombine.high %v4320_v32, %v4324_v36  ;;  %v7199_v46 = vcombine.low %v4320_v32, %v4324_v36  ;;  %v4321_v32 = vld [vmem:[%s9362_s6 + $0x18] sm:$0xff] }
0x1d2e   : > { %v4098_v59 = vmul.f32 %v4092_v51, %v4037_v11  ;;  %v4326_v51 = vld [vmem:[%s9362_s6 + $0x40] sm:$0xff]  ;;  %v4325_v36 = vld [vmem:[%s9362_s6 + $0x38] sm:$0xff] }
0x1d2f   : > { %v4134_v61 = vpack.c.bf16 %v4097_v56, %v4095_v54  ;;  %4638 = vmatprep.subr.bf16.mxu0 %v7200_v38  ;;  %v4330_v54 = vld [vmem:[%s9362_s6 + $0x60] sm:$0xff] }
0x1d30   : > { %v4135_v62 = vpack.c.bf16 %v4098_v59, %v4096_v58  ;;  %v7204_v56 = vcombine.high %v4326_v51, %v4330_v54  ;;  %v4328_v58 = vld [vmem:[%s9362_s6 + $0x50] sm:$0xff] }
0x1d31   : > { %v4332_v59 = vld [vmem:[%s9362_s6 + $0x70] sm:$0xff] }
0x1d32   : > { %4274 = vmatprep.mubr.bf16.mxu0 %v4135_v62  ;;  %v7208_v62 = vcombine.high %v4328_v58, %v4332_v59 }
0x1d33   : > { %4275 = vmatmul.mubr.bf16.vlgmr.msra.gmra.mrb[44].mxu0 %v4134_v61  ;;  %v7203_v61 = vcombine.low %v4326_v51, %v4330_v54  ;;  %v4329_v54 = vld [vmem:[%s9362_s6 + $0x58] sm:$0xff] }
0x1d34   : > { %4639 = vmatpush1.bf16.msra.mxu0 %v7199_v46  ;;  %v7996_v46 = vld [vmem:[%s9386_s10 + $0x60] ss:$16 sps:$4 sm:$0xff]  }
0x1d35   : > { %4640 = vmatprep.subr.bf16.mxu0 %v7208_v62  ;;  %v7201_v62 = vcombine.low %v4321_v32, %v4325_v36 }
0x1da8   : > { %v4040_v63 = vpop.f32.mrb[68].mxu1 }
0x1da9   : > { %v4041_v30 = vadd.f32 %v4040_v63, %v3943_v57  ;;  %v4042_v16 = vpop.f32.mrb[69].mxu1  ;;  %v7207_v63 = vcombine.low %v4328_v58, %v4332_v59  ;;  %v8004_v58 = vld [vmem:[%s9386_s10 + $0x84] ss:$16 sps:$4 sm:$0xff]   ;;  %v7202_v59 = vcombine.high %v4321_v32, %v4325_v36  ;;  %v8037_v32 = vld [vmem:[%s9386_s10 + $0x12c] ss:$16 sps:$4 sm:$0xff]  }
0x1daa   : > { %v4043_v34 = vadd.f32 %v4042_v16, %v3947_v50  ;;  %v4044_v5 = vpop.f32.mrb[70].mxu1  ;;  %v4338_v16 = vld [vmem:[%s9362_s6 + $0xa0] sm:$0xff]  ;;  %v8035_v36 = vld [vmem:[%s9386_s10 + $0x128] ss:$16 sps:$4 sm:$0xff]  }
0x1dab   : > { %v4051_v37 = vmul.f32 %v4041_v30, %v4041_v30  ;;  %v4045_v35 = vpop.f32.mrb[71].mxu1  ;;  %4641 = vmatpush1.bf16.msra.mxu0 %v7207_v63  ;;  %v4336_v5 = vld [vmem:[%s9362_s6 + $0x90] sm:$0xff]  ;;  %v4337_v63 = vld [vmem:[%s9362_s6 + $0x98] sm:$0xff] }
0x1dac   : > { %v4052_v52 = vmul.f32 %v4043_v34, %v4043_v34 }
0x1dad   : > { %v4057_v47 = vmul.f32 %v4051_v37, %v4041_v30  ;;  %v4340_v37 = vld [vmem:[%s9362_s6 + $0xb0] sm:$0xff] }
0x1dae   : > { %v4058_v55 = vmul.f32 %v4052_v52, %v4043_v34  ;;  %v7216_v52 = vcombine.high %v4336_v5, %v4340_v37 }
0x1daf   : > { %v4063_v2 = vmul.f32 0.044715, %v4057_v47  ;;  %v7215_v47 = vcombine.low %v4336_v5, %v4340_v37  ;;  %v8008_v5 = vld [vmem:[%s9386_s10 + $0xa0] ss:$16 sps:$4 sm:$0xff]  }
0x1db0   : > { %v4064_v3 = vmul.f32 0.044715, %v4058_v55  ;;  %4642 = vmatprep.subr.bf16.mxu0 %v7216_v52  ;;  %v4342_v55 = vld [vmem:[%s9362_s6 + $0xc0] sm:$0xff]  ;;  %v4349_v52 = vld [vmem:[%s9362_s6 + $0xf8] sm:$0xff] }
0x1db1   : > { %v4069_v1 = vadd.f32 %v4063_v2, %v4041_v30  ;;  %v4346_v2 = vld [vmem:[%s9362_s6 + $0xe0] sm:$0xff]  ;;  %4643 = vmatpush1.bf16.msra.mxu0 %v7215_v47 }
0x1db2   : > { %v4070_v53 = vadd.f32 %v4064_v3, %v4043_v34  ;;  %v7220_v3 = vcombine.high %v4342_v55, %v4346_v2  ;;  %v8016_v47 = vld [vmem:[%s9386_s10 + $0xc4] ss:$16 sps:$4 sm:$0xff]  }
0x1db3   : > { %v4075_v4 = vmul.f32 0.7978846, %v4069_v1  ;;  %v4344_v1 = vld [vmem:[%s9362_s6 + $0xd0] sm:$0xff] }
0x1db4   : > { %v4076_v6 = vmul.f32 0.7978846, %v4070_v53  ;;  %v4348_v53 = vld [vmem:[%s9362_s6 + $0xf0] sm:$0xff] }
0x1db5   : > { %8502 = vtanh.f32 %v4075_v4  ;;  %v7219_v4 = vcombine.low %v4342_v55, %v4346_v2 }
0x1db6   : > { %8504 = vtanh.f32 %v4076_v6  ;;  %v7224_v6 = vcombine.high %v4344_v1, %v4348_v53 }
0x1db8   : > { %4644 = vmatprep.subr.bf16.mxu0 %v7224_v6  ;;  %v8020_v6 = vld [vmem:[%s9386_s10 + $0xe0] ss:$16 sps:$4 sm:$0xff]  }
0x1dbf   : > { %v8503_v44 = vpop.eup %8502 }
0x1dc0   : > { %v8505_v43 = vpop.eup %8504  ;;  %v4087_v57 = vadd.f32 1.0, %v8503_v44  ;;  %v7223_v44 = vcombine.low %v4344_v1, %v4348_v53  ;;  %v8014_v1 = vld [vmem:[%s9386_s10 + $0xc0] ss:$16 sps:$4 sm:$0xff]   ;;  %v8022_v53 = vld [vmem:[%s9386_s10 + $0xe4] ss:$16 sps:$4 sm:$0xff]  }
0x1dc1   : > { %v4088_v8 = vadd.f32 1.0, %v8505_v43  ;;  %v4319_v43 = vld [vmem:[%s9362_s6 + $0x8] sm:$0xff] }
0x1dc2   : > { %v4093_v50 = vmul.f32 0.5, %v4087_v57  ;;  %v4323_v57 = vld [vmem:[%s9362_s6 + $0x28] sm:$0xff]  ;;  %4645 = vmatpush1.bf16.msra.mxu0 %v7223_v44  ;;  %v8028_v44 = vld [vmem:[%s9386_s10 + $0x104] ss:$16 sps:$4 sm:$0xff]  }
0x1dc3   : > { %v4094_v11 = vmul.f32 0.5, %v4088_v8  ;;  %v7197_v8 = vcombine.low %v4319_v43, %v4323_v57 }
0x1dc4   : > { %v4099_v12 = vmul.f32 %v4093_v50, %v4041_v30  ;;  %v4334_v30 = vld [vmem:[%s9362_s6 + $0x80] sm:$0xff]  ;;  %v7198_v50 = vcombine.high %v4319_v43, %v4323_v57  ;;  %v7981_v43 = vld [vmem:[%s9386_s10 + $0x8] ss:$16 sps:$4 sm:$0xff]   ;;  %v7989_v57 = vld [vmem:[%s9386_s10 + $0x2c] ss:$16 sps:$4 sm:$0xff]  }
0x1dc5   : > { %v4100_v19 = vmul.f32 %v4094_v11, %v4043_v34  ;;  %v7212_v34 = vcombine.high %v4334_v30, %v4338_v16  ;;  %v7211_v35 = vcombine.low %v4334_v30, %v4338_v16  ;;  %v7980_v11 = vld [vmem:[%s9386_s10 + $0x4] ss:$16 sps:$4 sm:$0xff]   ;;  %v4341_v30 = vld [vmem:[%s9362_s6 + $0xb8] sm:$0xff] }
0x1dc6   : > { %v4136_v14 = vpack.c.bf16 %v4099_v12, %v4099_v12  ;;  %6286 = vmatprep.subr.bf16.mxu0 %v7980_v11  ;;  %v8010_v16 = vld [vmem:[%s9386_s10 + $0xa4] ss:$16 sps:$4 sm:$0xff]   ;;  %v7218_v55 = vcombine.high %v4337_v63, %v4341_v30  ;;  %v7217_v2 = vcombine.low %v4337_v63, %v4341_v30  ;;  %v7987_v11 = vld [vmem:[%s9386_s10 + $0x28] ss:$16 sps:$4 sm:$0xff]   ;;  %v8068_v30 = vld [vmem:[%s9386_s10 + $0x1e0] ss:$16 sps:$4 sm:$0xff]  }
0x1dc7   : > { %v4137_v13 = vpack.c.bf16 %v4100_v19, %v4100_v19  ;;  %v8065_v63 = vld [vmem:[%s9386_s10 + $0x1c8] ss:$16 sps:$4 sm:$0xff]  }
0x1dc9   : > { %4281 = vmatprep.mubr.bf16.mxu0 %v4137_v13 }
0x1dca   : > { %4282 = vmatmul.mubr.bf16.gmra.mrb[48].mxu0 %v4136_v14  ;;  %v7193_v14 = vld [vmem:[%s1224_s29] ss:$0 sm:$0xff]  ;;  %s9813_s29 = sld [smem:[#allocation19_spill]] }
0x1dcb   : > { %4670 = vmatprep.mubr.bf16.mxu0 %v8544_v0 }
0x1dd0   : > { %s1260_s30 = scalar_lea.vmem %s9813_s29, %s6984_s20 }
0x1e06   : > { %v7616_v15 = vpop.f32.mrb[44].mxu0 }
0x1e07   : > { %v7617_v29 = vpop.f32.mrb[45].mxu0 }
0x1e08   : > { %v7618_v31 = vadd.f32 %v7617_v29, %v7616_v15  ;;  %v7619_v18 = vpop.f32.mrb[46].mxu0 }
0x1e09   : > { %v7620_v24 = vpop.f32.mrb[47].mxu0  ;;  %v4331_v18 = vld [vmem:[%s9362_s6 + $0x68] sm:$0xff] }
0x1e0a   : > { %v4277_v33 = vadd.f32 %v7618_v31, %v7176_v17  ;;  %v7194_v17 = vld [vmem:[%s1229_s4] ss:$0 sm:$0xff]  ;;  %v4327_v31 = vld [vmem:[%s9362_s6 + $0x48] sm:$0xff] }
0x1e0c   : > { %v4288_v20 = vadd.f32 %v4277_v33, %v9305_v60  ;;  %v4318_v60 = vld [vmem:[%s9362_s6] sm:$0xff] }
0x1e0d   : > { %v7196_v9 = vcombine.high %v4318_v60, %v4322_v10  ;;  %v7195_v7 = vcombine.low %v4318_v60, %v4322_v10  ;;  %v7990_v10 = vld [vmem:[%s9386_s10 + $0x40] ss:$16 sps:$4 sm:$0xff]  }
0x1e0e   : > { %v4291_v40 = vsel %vm1376_vm0, %v4288_v20, 0.0 }
0x1e0f   : > { %4292 = vadd.xlane.f32.xlu0 %v4291_v40  ;;  %4556 = vmatprep.subr.bf16.mxu1 %v7196_v9  ;;  %v4335_v40 = vld [vmem:[%s9362_s6 + $0x88] sm:$0xff] }
0x1e10   : > { %4557 = vmatpush1.bf16.msra.mxu1 %v7195_v7  ;;  %v7998_v7 = vld [vmem:[%s9386_s10 + $0x64] ss:$16 sps:$4 sm:$0xff]  }
0x1e11   : > { %4558 = vmatprep.subr.bf16.mxu1 %v7204_v56  ;;  %v4333_v56 = vld [vmem:[%s9362_s6 + $0x78] sm:$0xff] }
0x1e12   : > { %v7209_v37 = vcombine.low %v4329_v54, %v4333_v56 }
0x1e14   : > { %4559 = vmatpush1.bf16.msra.mxu1 %v7203_v61  ;;  %v8002_v61 = vld [vmem:[%s9386_s10 + $0x80] ss:$16 sps:$4 sm:$0xff]  }
0x1e15   : > { %4560 = vmatprep.subr.bf16.mxu1 %v7212_v34  ;;  %v7210_v34 = vcombine.high %v4329_v54, %v4333_v56  ;;  %v8055_v54 = vld [vmem:[%s9386_s10 + $0x18c] ss:$16 sps:$4 sm:$0xff]   ;;  %v8053_v56 = vld [vmem:[%s9386_s10 + $0x188] ss:$16 sps:$4 sm:$0xff]  }
0x1e18   : > { %4561 = vmatpush1.bf16.msra.mxu1 %v7211_v35  ;;  %v4345_v35 = vld [vmem:[%s9362_s6 + $0xd8] sm:$0xff] }
0x1e19   : > { %4562 = vmatprep.subr.bf16.mxu1 %v7220_v3  ;;  %v7226_v3 = vcombine.high %v4345_v35, %v4349_v52 }
0x1e1c   : > { %4563 = vmatpush1.bf16.msra.mxu1 %v7219_v4  ;;  %v7983_v4 = vld [vmem:[%s9386_s10 + $0xc] ss:$16 sps:$4 sm:$0xff]  }
0x1e1d   : > { %4597 = vmatprep.subr.bf16.mxu1 %v7198_v50  ;;  %v8034_v50 = vld [vmem:[%s9386_s10 + $0x124] ss:$16 sps:$4 sm:$0xff]  }
0x1e9c   : > { %v4293_v41 = vpop.xlane.xlu0 %4292 }
0x1e9d   : > { %v4294_v48 = vmul.f32 0.015625, %v4293_v41  ;;  %v7622_v42 = vpop.f32.mrb[48].mxu0  ;;  %v4339_v41 = vld [vmem:[%s9362_s6 + $0xa8] sm:$0xff] }
0x1e9e   : > { %v7623_v49 = vpop.f32.mrb[49].mxu0  ;;  %v7214_v60 = vcombine.high %v4335_v40, %v4339_v41  ;;  %v7213_v9 = vcombine.low %v4335_v40, %v4339_v41  ;;  %v8013_v40 = vld [vmem:[%s9386_s10 + $0xac] ss:$16 sps:$4 sm:$0xff]   ;;  %v8050_v41 = vld [vmem:[%s9386_s10 + $0x180] ss:$16 sps:$4 sm:$0xff]  }
0x1e9f   : > { %v9353_v39 = vsub.f32 %v4288_v20, %v4294_v48  ;;  %v7625_v45 = vpop.f32.mrb[50].mxu0  ;;  %v7978_v20 = vld [vmem:[%s9386_s10] ss:$16 sps:$4 sm:$0xff]   ;;  %v7986_v48 = vld [vmem:[%s9386_s10 + $0x24] ss:$16 sps:$4 sm:$0xff]   ;;  %v7206_v49 = vcombine.high %v4327_v31, %v4331_v18 }
0x1ea0   : > { %v7626_v26 = vpop.f32.mrb[51].mxu0  ;;  %v7205_v45 = vcombine.low %v4327_v31, %v4331_v18  ;;  %v7999_v31 = vld [vmem:[%s9386_s10 + $0x68] ss:$16 sps:$4 sm:$0xff]   ;;  %v8007_v18 = vld [vmem:[%s9386_s10 + $0x8c] ss:$16 sps:$4 sm:$0xff]  }
0x1ea1   : > { %v4296_v27 = vmul.f32 %v9353_v39, %v9353_v39  ;;  %v4343_v26 = vld [vmem:[%s9362_s6 + $0xc8] sm:$0xff] }
0x1ea3   : > { %v4297_v28 = vsel %vm1376_vm0, %v4296_v27, 0.0  ;;  %v4347_v27 = vld [vmem:[%s9362_s6 + $0xe8] sm:$0xff] }
0x1ea4   : > { %4298 = vadd.xlane.f32.xlu1 %v4297_v28  ;;  %v7992_v28 = vld [vmem:[%s9386_s10 + $0x44] ss:$16 sps:$4 sm:$0xff]   ;;  %v7222_v38 = vcombine.high %v4343_v26, %v4347_v27  ;;  %v7221_v51 = vcombine.low %v4343_v26, %v4347_v27  ;;  %v8017_v26 = vld [vmem:[%s9386_s10 + $0xc8] ss:$16 sps:$4 sm:$0xff]   ;;  %v8025_v27 = vld [vmem:[%s9386_s10 + $0xec] ss:$16 sps:$4 sm:$0xff]  }
0x1f31   : > { %v4299_v12 = vpop.xlane.xlu1 %4298 }
0x1f32   : > { %v4300_v19 = vmul.f32 0.015625, %v4299_v12  ;;  %v7995_v12 = vld [vmem:[%s9386_s10 + $0x4c] ss:$16 sps:$4 sm:$0xff]  }
0x1f34   : > { %v4301_v13 = vadd.f32 1e-06, %v4300_v19  ;;  %v8032_v19 = vld [vmem:[%s9386_s10 + $0x120] ss:$16 sps:$4 sm:$0xff]  }
0x1f36   : > { %8506 = vrsqrt.f32 %v4301_v13  ;;  %v8040_v13 = vld [vmem:[%s9386_s10 + $0x144] ss:$16 sps:$4 sm:$0xff]  }
0x1f40   : > { %v8507_v15 = vpop.eup %8506 }
0x1f41   : > { %v4303_v29 = vmul.f32 %v8507_v15, %v9353_v39  ;;  %v7984_v39 = vld [vmem:[%s9386_s10 + $0x20] ss:$16 sps:$4 sm:$0xff]   ;;  %v8001_v15 = vld [vmem:[%s9386_s10 + $0x6c] ss:$16 sps:$4 sm:$0xff]  }
0x1f43   : > { %v4310_v24 = vmul.f32 %v7193_v14, %v4303_v29  ;;  %v7993_v14 = vld [vmem:[%s9386_s10 + $0x48] ss:$16 sps:$4 sm:$0xff]   ;;  %v8046_v29 = vld [vmem:[%s9386_s10 + $0x164] ss:$16 sps:$4 sm:$0xff]  }
0x1f45   : > { %v4317_v33 = vadd.f32 %v7194_v17, %v4310_v24  ;;  %v8038_v17 = vld [vmem:[%s9386_s10 + $0x140] ss:$16 sps:$4 sm:$0xff]  }
0x1f46   : > { %v8044_v24 = vld [vmem:[%s9386_s10 + $0x160] ss:$16 sps:$4 sm:$0xff]  }
0x1f47   : > { %v9404_v42 = vpack.c.bf16 %v4317_v33, %v4317_v33  ;;  %v8052_v33 = vld [vmem:[%s9386_s10 + $0x184] ss:$16 sps:$4 sm:$0xff]  }
0x1f49   : > { %7227 = vmatmul.mubr.msk.bf16.vlgmr.msra.gmra.mrb[72].mxu1 %vm1376_vm0, %v9404_v42  ;;  %7229 = vmatmul.mubr.msk.bf16.vlgmr.msra.gmra.mrb[52].mxu0 %vm1376_vm0, %v9404_v42 }
0x1f4a   : > { %4598 = vmatpush1.bf16.msra.mxu1 %v7197_v8  ;;  %4629 = vmatprep.mubr.bf16.mxu1 %v8544_v0  ;;  %v8026_v8 = vld [vmem:[%s9386_s10 + $0x100] ss:$16 sps:$4 sm:$0xff]  }
0x1f4b   : > { %4599 = vmatprep.subr.bf16.mxu1 %v7206_v49  ;;  %6287 = vmatpush1.bf16.msra.mxu0 %v7978_v20  ;;  %v8005_v20 = vld [vmem:[%s9386_s10 + $0x88] ss:$16 sps:$4 sm:$0xff]   ;;  %v8019_v49 = vld [vmem:[%s9386_s10 + $0xcc] ss:$16 sps:$4 sm:$0xff]  }
0x1f4c   : > { %6288 = vmatprep.subr.bf16.mxu0 %v7986_v48  ;;  %v8058_v48 = vld [vmem:[%s9386_s10 + $0x1a4] ss:$16 sps:$4 sm:$0xff]  }
0x1f4e   : > { %4600 = vmatpush1.bf16.msra.mxu1 %v7205_v45  ;;  %v8064_v45 = vld [vmem:[%s9386_s10 + $0x1c4] ss:$16 sps:$4 sm:$0xff]  }
0x1f4f   : > { %4601 = vmatprep.subr.bf16.mxu1 %v7214_v60  ;;  %6289 = vmatpush1.bf16.msra.mxu0 %v7984_v39  ;;  %v8056_v39 = vld [vmem:[%s9386_s10 + $0x1a0] ss:$16 sps:$4 sm:$0xff]   ;;  %v8023_v60 = vld [vmem:[%s9386_s10 + $0xe8] ss:$16 sps:$4 sm:$0xff]  }
0x1f50   : > { %6290 = vmatprep.subr.bf16.mxu0 %v7992_v28  ;;  %v8062_v28 = vld [vmem:[%s9386_s10 + $0x1c0] ss:$16 sps:$4 sm:$0xff]  }
0x1f52   : > { %4602 = vmatpush1.bf16.msra.mxu1 %v7213_v9  ;;  %v8029_v9 = vld [vmem:[%s9386_s10 + $0x108] ss:$16 sps:$4 sm:$0xff]  }
0x1f53   : > { %4603 = vmatprep.subr.bf16.mxu1 %v7222_v38  ;;  %6291 = vmatpush1.bf16.msra.mxu0 %v7990_v10  ;;  %v8031_v10 = vld [vmem:[%s9386_s10 + $0x10c] ss:$16 sps:$4 sm:$0xff]   ;;  %v8041_v38 = vld [vmem:[%s9386_s10 + $0x148] ss:$16 sps:$4 sm:$0xff]  }
0x1f54   : > { %6292 = vmatprep.subr.bf16.mxu0 %v7998_v7  ;;  %v8043_v7 = vld [vmem:[%s9386_s10 + $0x14c] ss:$16 sps:$4 sm:$0xff]  }
0x1f56   : > { %4604 = vmatpush1.bf16.msra.mxu1 %v7221_v51  ;;  %v8047_v51 = vld [vmem:[%s9386_s10 + $0x168] ss:$16 sps:$4 sm:$0xff]  }
0x1f57   : > { %4679 = vmatprep.subr.bf16.mxu1 %v7202_v59  ;;  %6293 = vmatpush1.bf16.msra.mxu0 %v7996_v46  ;;  %v8049_v46 = vld [vmem:[%s9386_s10 + $0x16c] ss:$16 sps:$4 sm:$0xff]   ;;  %v8059_v59 = vld [vmem:[%s9386_s10 + $0x1a8] ss:$16 sps:$4 sm:$0xff]  }
0x1f58   : > { %6294 = vmatprep.subr.bf16.mxu0 %v8004_v58  ;;  %v8061_v58 = vld [vmem:[%s9386_s10 + $0x1ac] ss:$16 sps:$4 sm:$0xff]  }
0x1f59   : > { %7228 = vmatmul.mubr.msk.bf16.vlgmr.msra.gmra.mrb[76].mxu1 %vm1376_vm0, %v9404_v42 }
0x1f5a   : > { %4680 = vmatpush1.bf16.msra.mxu1 %v7201_v62  ;;  %4711 = vmatprep.mubr.bf16.mxu1 %v8544_v0  ;;  %v7225_v0 = vcombine.low %v4345_v35, %v4349_v52  ;;  %v8070_v62 = vld [vmem:[%s9386_s10 + $0x1e4] ss:$16 sps:$4 sm:$0xff]  }
0x1f5b   : > { %4681 = vmatprep.subr.bf16.mxu1 %v7210_v34  ;;  %6295 = vmatpush1.bf16.msra.mxu0 %v8002_v61  ;;  %v8067_v61 = vld [vmem:[%s9386_s10 + $0x1cc] ss:$16 sps:$4 sm:$0xff]   ;;  %v8076_v34 = vld [vmem:[%s9386_s10 + $0x204] ss:$16 sps:$4 sm:$0xff]  }
0x1f5c   : > { %6296 = vmatprep.subr.bf16.mxu0 %v8010_v16  ;;  %v8073_v16 = vld [vmem:[%s9386_s10 + $0x1ec] ss:$16 sps:$4 sm:$0xff]   ;;  %v9493_v35 = vld [vmem:[%s1242_s7] sm:$0xff] }
0x1f5d   : > { %v4516_v52 = vrot.slane %v9493_v35, %v8821_v23 }
0x1f5e   : > { %4682 = vmatpush1.bf16.msra.mxu1 %v7209_v37  ;;  %v8079_v37 = vld [vmem:[%s9386_s10 + $0x20c] ss:$16 sps:$4 sm:$0xff]  }
0x1f5f   : > { %4683 = vmatprep.subr.bf16.mxu1 %v7218_v55  ;;  %6297 = vmatpush1.bf16.msra.mxu0 %v8008_v5  ;;  %v8071_v5 = vld [vmem:[%s9386_s10 + $0x1e8] ss:$16 sps:$4 sm:$0xff]  }
0x1f60   : > { %6298 = vmatprep.subr.bf16.mxu0 %v8016_v47  ;;  %v4520_v47 = vrot.slane %v9493_v35, %v8825_v25 }
0x1f62   : > { %4684 = vmatpush1.bf16.msra.mxu1 %v7217_v2 }
0x1f63   : > { %4685 = vmatprep.subr.bf16.mxu1 %v7226_v3  ;;  %6299 = vmatpush1.bf16.msra.mxu0 %v8014_v1 }
0x1f64   : > { %6300 = vmatprep.subr.bf16.mxu0 %v8022_v53 }
0x1f66   : > { %4686 = vmatpush1.bf16.msra.mxu1 %v7225_v0 }
0x1f67   : > { %6450 = vmatprep.subr.bf16.mxu1 %v7983_v4  ;;  %6301 = vmatpush1.bf16.msra.mxu0 %v8020_v6 }
0x1f68   : > { %6302 = vmatprep.subr.bf16.mxu0 %v8028_v44 }
0x1f69   : > { %7230 = vmatmul.mubr.msk.bf16.vlgmr.msra.gmra.mrb[80].mxu1 %vm1376_vm0, %v9404_v42  ;;  %v8011_v42 = vld [vmem:[%s9386_s10 + $0xa8] ss:$16 sps:$4 sm:$0xff]  }
0x1f6a   : > { %6451 = vmatpush1.bf16.msra.mxu1 %v7981_v43 }
0x1f6b   : > { %6452 = vmatprep.subr.bf16.mxu1 %v7989_v57  ;;  %6303 = vmatpush1.bf16.msra.mxu0 %v8026_v8  ;;  %v8074_v8 = vld [vmem:[%s9386_s10 + $0x200] ss:$16 sps:$4 sm:$0xff]  }
0x1f6c   : > { %6304 = vmatprep.subr.bf16.mxu0 %v8034_v50  ;;  %v8077_v50 = vld [vmem:[%s9386_s10 + $0x208] ss:$16 sps:$4 sm:$0xff]  }
0x1f6e   : > { %6453 = vmatpush1.bf16.msra.mxu1 %v7987_v11 }
0x1f6f   : > { %6454 = vmatprep.subr.bf16.mxu1 %v7995_v12  ;;  %6305 = vmatpush1.bf16.msra.mxu0 %v8032_v19  ;;  %v8082_v12 = vld [vmem:[%s9386_s10 + $0x224] ss:$16 sps:$4 sm:$0xff]   ;;  %v8085_v19 = vld [vmem:[%s9386_s10 + $0x22c] ss:$16 sps:$4 sm:$0xff]  }
0x1f70   : > { %6306 = vmatprep.subr.bf16.mxu0 %v8040_v13  ;;  %v8080_v13 = vld [vmem:[%s9386_s10 + $0x220] ss:$16 sps:$4 sm:$0xff]  }
0x1f72   : > { %6455 = vmatpush1.bf16.msra.mxu1 %v7993_v14  ;;  %v8083_v14 = vld [vmem:[%s9386_s10 + $0x228] ss:$16 sps:$4 sm:$0xff]  }
0x1f73   : > { %6456 = vmatprep.subr.bf16.mxu1 %v8001_v15  ;;  %6307 = vmatpush1.bf16.msra.mxu0 %v8038_v17  ;;  %v8088_v15 = vld [vmem:[%s9386_s10 + $0x244] ss:$16 sps:$4 sm:$0xff]   ;;  %v8091_v17 = vld [vmem:[%s9386_s10 + $0x24c] ss:$16 sps:$4 sm:$0xff]  }
0x1f74   : > { %6308 = vmatprep.subr.bf16.mxu0 %v8046_v29  ;;  %v4527_v29 = vsub.s32 3, %v8813_v22 }
0x1f76   : > { %6457 = vmatpush1.bf16.msra.mxu1 %v7999_v31  ;;  %v8086_v31 = vld [vmem:[%s9386_s10 + $0x240] ss:$16 sps:$4 sm:$0xff]  }
0x1f77   : > { %6458 = vmatprep.subr.bf16.mxu1 %v8007_v18  ;;  %6309 = vmatpush1.bf16.msra.mxu0 %v8044_v24  ;;  %v8089_v18 = vld [vmem:[%s9386_s10 + $0x248] ss:$16 sps:$4 sm:$0xff]   ;;  %v8094_v24 = vld [vmem:[%s9386_s10 + $0x264] ss:$16 sps:$4 sm:$0xff]  }
0x1f78   : > { %6310 = vmatprep.subr.bf16.mxu0 %v8052_v33  ;;  %v8097_v33 = vld [vmem:[%s9386_s10 + $0x26c] ss:$16 sps:$4 sm:$0xff]  }
0x1f7a   : > { %6459 = vmatpush1.bf16.msra.mxu1 %v8005_v20  ;;  %v4528_v20 = vrot.slane %v9493_v35, %v4527_v29 }
0x1f7b   : > { %6460 = vmatprep.subr.bf16.mxu1 %v8013_v40  ;;  %6311 = vmatpush1.bf16.msra.mxu0 %v8050_v41  ;;  %v8092_v41 = vld [vmem:[%s9386_s10 + $0x260] ss:$16 sps:$4 sm:$0xff]  }
0x1f7c   : > { %6312 = vmatprep.subr.bf16.mxu0 %v8058_v48  ;;  %v8095_v48 = vld [vmem:[%s9386_s10 + $0x268] ss:$16 sps:$4 sm:$0xff]  }
0x1f7e   : > { %6461 = vmatpush1.bf16.msra.mxu1 %v8011_v42 }
0x1f7f   : > { %6462 = vmatprep.subr.bf16.mxu1 %v8019_v49  ;;  %6313 = vmatpush1.bf16.msra.mxu0 %v8056_v39  ;;  %v8100_v49 = vld [vmem:[%s9386_s10 + $0x284] ss:$16 sps:$4 sm:$0xff]   ;;  %v8103_v39 = vld [vmem:[%s9386_s10 + $0x28c] ss:$16 sps:$4 sm:$0xff]  }
0x1f80   : > { %6314 = vmatprep.subr.bf16.mxu0 %v8064_v45 }
0x1f82   : > { %6463 = vmatpush1.bf16.msra.mxu1 %v8017_v26 }
0x1f83   : > { %6464 = vmatprep.subr.bf16.mxu1 %v8025_v27  ;;  %6315 = vmatpush1.bf16.msra.mxu0 %v8062_v28 }
0x1f84   : > { %6316 = vmatprep.subr.bf16.mxu0 %v8070_v62  ;;  %v8119_v62 = vld [vmem:[%s9386_s10 + $0x2e8] ss:$16 sps:$4 sm:$0xff]  }
0x1f86   : > { %6465 = vmatpush1.bf16.msra.mxu1 %v8023_v60  ;;  %v8098_v60 = vld [vmem:[%s9386_s10 + $0x280] ss:$16 sps:$4 sm:$0xff]  }
0x1f87   : > { %6466 = vmatprep.subr.bf16.mxu1 %v8031_v10  ;;  %6317 = vmatpush1.bf16.msra.mxu0 %v8068_v30  ;;  %v8101_v10 = vld [vmem:[%s9386_s10 + $0x288] ss:$16 sps:$4 sm:$0xff]   ;;  %v8124_v30 = vld [vmem:[%s9386_s10 + $0x304] ss:$16 sps:$4 sm:$0xff]  }
0x1f88   : > { %6327 = vmatprep.subr.bf16.mxu0 %v8076_v34 }
0x1f8a   : > { %6467 = vmatpush1.bf16.msra.mxu1 %v8029_v9  ;;  %v8106_v9 = vld [vmem:[%s9386_s10 + $0x2a4] ss:$16 sps:$4 sm:$0xff]  }
0x1f8b   : > { %6468 = vmatprep.subr.bf16.mxu1 %v8037_v32  ;;  %v8109_v32 = vld [vmem:[%s9386_s10 + $0x2ac] ss:$16 sps:$4 sm:$0xff]  }
0x1f8e   : > { %6469 = vmatpush1.bf16.msra.mxu1 %v8035_v36  ;;  %v8104_v36 = vld [vmem:[%s9386_s10 + $0x2a0] ss:$16 sps:$4 sm:$0xff]  }
0x1f8f   : > { %6470 = vmatprep.subr.bf16.mxu1 %v8043_v7  ;;  %v8107_v7 = vld [vmem:[%s9386_s10 + $0x2a8] ss:$16 sps:$4 sm:$0xff]  }
0x1f92   : > { %6471 = vmatpush1.bf16.msra.mxu1 %v8041_v38  ;;  %v8112_v38 = vld [vmem:[%s9386_s10 + $0x2c4] ss:$16 sps:$4 sm:$0xff]  }
0x1f93   : > { %6472 = vmatprep.subr.bf16.mxu1 %v8049_v46  ;;  %v8115_v46 = vld [vmem:[%s9386_s10 + $0x2cc] ss:$16 sps:$4 sm:$0xff]  }
0x1f96   : > { %6473 = vmatpush1.bf16.msra.mxu1 %v8047_v51  ;;  %v8110_v51 = vld [vmem:[%s9386_s10 + $0x2c0] ss:$16 sps:$4 sm:$0xff]  }
0x1f97   : > { %6474 = vmatprep.subr.bf16.mxu1 %v8055_v54  ;;  %v8113_v54 = vld [vmem:[%s9386_s10 + $0x2c8] ss:$16 sps:$4 sm:$0xff]  }
0x1f9a   : > { %6475 = vmatpush1.bf16.msra.mxu1 %v8053_v56  ;;  %v8118_v56 = vld [vmem:[%s9386_s10 + $0x2e4] ss:$16 sps:$4 sm:$0xff]  }
0x1f9b   : > { %6476 = vmatprep.subr.bf16.mxu1 %v8061_v58  ;;  %v8121_v58 = vld [vmem:[%s9386_s10 + $0x2ec] ss:$16 sps:$4 sm:$0xff]  }
0x1f9e   : > { %6477 = vmatpush1.bf16.msra.mxu1 %v8059_v59 }
0x1f9f   : > { %6478 = vmatprep.subr.bf16.mxu1 %v8067_v61  ;;  %v8116_v61 = vld [vmem:[%s9386_s10 + $0x2e0] ss:$16 sps:$4 sm:$0xff]  }
0x1fa2   : > { %6479 = vmatpush1.bf16.msra.mxu1 %v8065_v63 }
0x1fa3   : > { %6480 = vmatprep.subr.bf16.mxu1 %v8073_v16  ;;  %v8127_v16 = vld [vmem:[%s9386_s10 + $0x30c] ss:$16 sps:$4 sm:$0xff]  }
0x1fa6   : > { %6481 = vmatpush1.bf16.msra.mxu1 %v8071_v5 }
0x1fa7   : > { %6491 = vmatprep.subr.bf16.mxu1 %v8079_v37  ;;  %v8122_v37 = vld [vmem:[%s9386_s10 + $0x300] ss:$16 sps:$4 sm:$0xff]  }
0x201c   : > { %v4590_v55 = vpop.f32.mrb[72].mxu1  ;;  %v9499_v2 = vpop.f32.mrb[52].mxu0 }
0x201d   : > { %v4591_v3 = vadd.f32 %v4590_v55, %v4516_v52  ;;  %v4592_v1 = vpop.f32.mrb[73].mxu1  ;;  %v9501_v53 = vpop.f32.mrb[53].mxu0  ;;  %v8125_v52 = vld [vmem:[%s9386_s10 + $0x308] ss:$16 sps:$4 sm:$0xff]   ;;  %v8133_v55 = vld [vmem:[%s9386_s10 + $0x32c] ss:$16 sps:$4 sm:$0xff]  }
0x201e   : > { %v4593_v0 = vadd.f32 %v4592_v1, %v4520_v47  ;;  %v4594_v4 = vpop.f32.mrb[74].mxu1  ;;  %v4676_v6 = vpop.f32.mrb[54].mxu0  ;;  %v8130_v47 = vld [vmem:[%s9386_s10 + $0x324] ss:$16 sps:$4 sm:$0xff]   ;;  %v8131_v1 = vld [vmem:[%s9386_s10 + $0x328] ss:$16 sps:$4 sm:$0xff]  }
0x201f   : > { %v4595_v44 = vpop.f32.mrb[75].mxu1  ;;  %v4677_v43 = vpop.f32.mrb[55].mxu0  ;;  %v4976_v11 = vpack.c.bf16 %v4591_v3, %v4591_v3  ;;  %v8128_v3 = vld [vmem:[%s9386_s10 + $0x320] ss:$16 sps:$4 sm:$0xff]   ;;  %v8139_v4 = vld [vmem:[%s9386_s10 + $0x34c] ss:$16 sps:$4 sm:$0xff]  }
0x2020   : > { %v4977_v57 = vpack.c.bf16 %v4593_v0, %v4593_v0  ;;  %v8136_v0 = vld [vmem:[%s9386_s10 + $0x344] ss:$16 sps:$4 sm:$0xff]   ;;  %v8134_v6 = vld [vmem:[%s9386_s10 + $0x340] ss:$16 sps:$4 sm:$0xff]   ;;  %v8137_v44 = vld [vmem:[%s9386_s10 + $0x348] ss:$16 sps:$4 sm:$0xff]  }
0x2021   : > { %v8142_v43 = vld [vmem:[%s9386_s10 + $0x364] ss:$16 sps:$4 sm:$0xff]  }
0x2022   : > { %6318 = vmatprep.mubr.bf16.mxu0 %v4977_v57  ;;  %6482 = vmatprep.mubr.bf16.mxu1 %v4977_v57  ;;  %v8145_v57 = vld [vmem:[%s9386_s10 + $0x36c] ss:$16 sps:$4 sm:$0xff]  }
0x2023   : > { %6319 = vmatmul.mubr.bf16.vlgmr.msra.gmra.mrb[56].mxu0 %v4976_v11  ;;  %6483 = vmatmul.mubr.bf16.vlgmr.msra.gmra.mrb[84].mxu1 %v4976_v11  ;;  %v8148_v11 = vld [vmem:[%s9386_s10 + $0x384] ss:$16 sps:$4 sm:$0xff]  }
0x2024   : > { %6328 = vmatpush1.bf16.msra.mxu0 %v8074_v8  ;;  %6492 = vmatpush1.bf16.msra.mxu1 %v8077_v50  ;;  %v8140_v8 = vld [vmem:[%s9386_s10 + $0x360] ss:$16 sps:$4 sm:$0xff]   ;;  %v8143_v50 = vld [vmem:[%s9386_s10 + $0x368] ss:$16 sps:$4 sm:$0xff]  }
0x2025   : > { %6329 = vmatprep.subr.bf16.mxu0 %v8082_v12  ;;  %6493 = vmatprep.subr.bf16.mxu1 %v8085_v19  ;;  %v8151_v12 = vld [vmem:[%s9386_s10 + $0x38c] ss:$16 sps:$4 sm:$0xff]   ;;  %v8146_v19 = vld [vmem:[%s9386_s10 + $0x380] ss:$16 sps:$4 sm:$0xff]  }
0x2028   : > { %6330 = vmatpush1.bf16.msra.mxu0 %v8080_v13  ;;  %6494 = vmatpush1.bf16.msra.mxu1 %v8083_v14  ;;  %v8149_v13 = vld [vmem:[%s9386_s10 + $0x388] ss:$16 sps:$4 sm:$0xff]   ;;  %v8154_v14 = vld [vmem:[%s9386_s10 + $0x3a4] ss:$16 sps:$4 sm:$0xff]  }
0x2029   : > { %6331 = vmatprep.subr.bf16.mxu0 %v8088_v15  ;;  %6495 = vmatprep.subr.bf16.mxu1 %v8091_v17  ;;  %v8157_v15 = vld [vmem:[%s9386_s10 + $0x3ac] ss:$16 sps:$4 sm:$0xff]   ;;  %v8152_v17 = vld [vmem:[%s9386_s10 + $0x3a0] ss:$16 sps:$4 sm:$0xff]  }
0x202c   : > { %v9519_v40 = vpop.f32.mrb[76].mxu1  ;;  %6332 = vmatpush1.bf16.msra.mxu0 %v8086_v31  ;;  %6496 = vmatpush1.bf16.msra.mxu1 %v8089_v18  ;;  %v8155_v31 = vld [vmem:[%s9386_s10 + $0x3a8] ss:$16 sps:$4 sm:$0xff]   ;;  %v4523_v18 = vsub.s32 2, %v8813_v22 }
0x202d   : > { %v4633_v42 = vpop.f32.mrb[77].mxu1  ;;  %6333 = vmatprep.subr.bf16.mxu0 %v8094_v24  ;;  %6497 = vmatprep.subr.bf16.mxu1 %v8097_v33  ;;  %v8160_v24 = vld [vmem:[%s9386_s10 + $0x3c4] ss:$16 sps:$4 sm:$0xff]   ;;  %v8163_v33 = vld [vmem:[%s9386_s10 + $0x3cc] ss:$16 sps:$4 sm:$0xff]  }
0x202e   : > { %v4634_v45 = vadd.f32 %v4633_v42, %v4528_v20  ;;  %v4635_v26 = vpop.f32.mrb[78].mxu1  ;;  %v4535_v20 = vsub.s32 5, %v8813_v22  ;;  %v4524_v42 = vrot.slane %v9493_v35, %v4523_v18 }
0x202f   : > { %v4636_v27 = vpop.f32.mrb[79].mxu1  ;;  %v8164_v26 = vld [vmem:[%s9386_s10 + $0x3e0] ss:$16 sps:$4 sm:$0xff]  }
0x2030   : > { %v4979_v28 = vpack.c.bf16 %v4634_v45, %v4634_v45  ;;  %6334 = vmatpush1.bf16.msra.mxu0 %v8092_v41  ;;  %6498 = vmatpush1.bf16.msra.mxu1 %v8095_v48  ;;  %v8158_v41 = vld [vmem:[%s9386_s10 + $0x3c0] ss:$16 sps:$4 sm:$0xff]   ;;  %v8161_v48 = vld [vmem:[%s9386_s10 + $0x3c8] ss:$16 sps:$4 sm:$0xff]   ;;  %v4536_v45 = vrot.slane %v9493_v35, %v4535_v20  ;;  %v8235_v20 = vld [vmem:[%s9386_s10 + $0x54c] ss:$16 sps:$4 sm:$0xff]  }
0x2031   : > { %6335 = vmatprep.subr.bf16.mxu0 %v8100_v49  ;;  %6499 = vmatprep.subr.bf16.mxu1 %v8103_v39  ;;  %v8166_v49 = vld [vmem:[%s9386_s10 + $0x3e4] ss:$16 sps:$4 sm:$0xff]   ;;  %v8169_v39 = vld [vmem:[%s9386_s10 + $0x3ec] ss:$16 sps:$4 sm:$0xff]   ;;  %v8167_v27 = vld [vmem:[%s9386_s10 + $0x3e8] ss:$16 sps:$4 sm:$0xff]  }
0x2032   : > { %6359 = vmatprep.mubr.bf16.mxu0 %v4979_v28  ;;  %6523 = vmatprep.mubr.bf16.mxu1 %v4979_v28  ;;  %v4632_v28 = vadd.f32 %v9519_v40, %v4524_v42  ;;  %v8178_v40 = vld [vmem:[%s9386_s10 + $0x424] ss:$16 sps:$4 sm:$0xff]  }
0x2033   : > { %v8238_v42 = vld [vmem:[%s9386_s10 + $0x564] ss:$16 sps:$4 sm:$0xff]  }
0x2034   : > { %6336 = vmatpush1.bf16.msra.mxu0 %v8098_v60  ;;  %6500 = vmatpush1.bf16.msra.mxu1 %v8101_v10  ;;  %v8172_v60 = vld [vmem:[%s9386_s10 + $0x404] ss:$16 sps:$4 sm:$0xff]   ;;  %v8175_v10 = vld [vmem:[%s9386_s10 + $0x40c] ss:$16 sps:$4 sm:$0xff]  }
0x2035   : > { %6337 = vmatprep.subr.bf16.mxu0 %v8106_v9  ;;  %6501 = vmatprep.subr.bf16.mxu1 %v8109_v32  ;;  %v4675_v9 = vadd.f32 %v9501_v53, %v4536_v45  ;;  %v8170_v32 = vld [vmem:[%s9386_s10 + $0x400] ss:$16 sps:$4 sm:$0xff]   ;;  %v8239_v45 = vld [vmem:[%s9386_s10 + $0x568] ss:$16 sps:$4 sm:$0xff]  }
0x2036   : > { %v8176_v53 = vld [vmem:[%s9386_s10 + $0x420] ss:$16 sps:$4 sm:$0xff]  }
0x2038   : > { %6338 = vmatpush1.bf16.msra.mxu0 %v8104_v36  ;;  %6502 = vmatpush1.bf16.msra.mxu1 %v8107_v7  ;;  %v4978_v36 = vpack.c.bf16 %v4632_v28, %v4632_v28  ;;  %v8173_v7 = vld [vmem:[%s9386_s10 + $0x408] ss:$16 sps:$4 sm:$0xff]   ;;  %v8242_v28 = vld [vmem:[%s9386_s10 + $0x580] ss:$16 sps:$4 sm:$0xff]  }
0x2039   : > { %6339 = vmatprep.subr.bf16.mxu0 %v8112_v38  ;;  %6503 = vmatprep.subr.bf16.mxu1 %v8115_v46  ;;  %v4981_v38 = vpack.c.bf16 %v4675_v9, %v4675_v9  ;;  %v8181_v46 = vld [vmem:[%s9386_s10 + $0x42c] ss:$16 sps:$4 sm:$0xff]  }
0x203a   : > { %v8253_v9 = vld [vmem:[%s9386_s10 + $0x5ac] ss:$16 sps:$4 sm:$0xff]  }
0x203c   : > { %v9537_v59 = vpop.f32.mrb[80].mxu1  ;;  %6340 = vmatpush1.bf16.msra.mxu0 %v8110_v51  ;;  %6504 = vmatpush1.bf16.msra.mxu1 %v8113_v54  ;;  %v8179_v51 = vld [vmem:[%s9386_s10 + $0x428] ss:$16 sps:$4 sm:$0xff]   ;;  %v8184_v54 = vld [vmem:[%s9386_s10 + $0x444] ss:$16 sps:$4 sm:$0xff]  }
0x203d   : > { %v9541_v63 = vpop.f32.mrb[81].mxu1  ;;  %6341 = vmatprep.subr.bf16.mxu0 %v8118_v56  ;;  %6505 = vmatprep.subr.bf16.mxu1 %v8121_v58  ;;  %v8187_v56 = vld [vmem:[%s9386_s10 + $0x44c] ss:$16 sps:$4 sm:$0xff]   ;;  %v8182_v58 = vld [vmem:[%s9386_s10 + $0x440] ss:$16 sps:$4 sm:$0xff]  }
0x203e   : > { %v4717_v34 = vpop.f32.mrb[82].mxu1 }
0x203f   : > { %v4718_v5 = vpop.f32.mrb[83].mxu1  ;;  %v8191_v34 = vld [vmem:[%s9386_s10 + $0x468] ss:$16 sps:$4 sm:$0xff]  }
0x2040   : > { %6342 = vmatpush1.bf16.msra.mxu0 %v8116_v61  ;;  %6506 = vmatpush1.bf16.msra.mxu1 %v8119_v62  ;;  %v8185_v61 = vld [vmem:[%s9386_s10 + $0x448] ss:$16 sps:$4 sm:$0xff]   ;;  %v8190_v62 = vld [vmem:[%s9386_s10 + $0x464] ss:$16 sps:$4 sm:$0xff]  }
0x2041   : > { %6343 = vmatprep.subr.bf16.mxu0 %v8124_v30  ;;  %6507 = vmatprep.subr.bf16.mxu1 %v8127_v16  ;;  %v8193_v30 = vld [vmem:[%s9386_s10 + $0x46c] ss:$16 sps:$4 sm:$0xff]   ;;  %v8188_v16 = vld [vmem:[%s9386_s10 + $0x460] ss:$16 sps:$4 sm:$0xff]   ;;  %v8196_v5 = vld [vmem:[%s9386_s10 + $0x484] ss:$16 sps:$4 sm:$0xff]  }
0x2044   : > { %6344 = vmatpush1.bf16.msra.mxu0 %v8122_v37  ;;  %6508 = vmatpush1.bf16.msra.mxu1 %v8125_v52  ;;  %v8199_v37 = vld [vmem:[%s9386_s10 + $0x48c] ss:$16 sps:$4 sm:$0xff]   ;;  %v8194_v52 = vld [vmem:[%s9386_s10 + $0x480] ss:$16 sps:$4 sm:$0xff]  }
0x2045   : > { %6345 = vmatprep.subr.bf16.mxu0 %v8130_v47  ;;  %6509 = vmatprep.subr.bf16.mxu1 %v8133_v55  ;;  %v8197_v47 = vld [vmem:[%s9386_s10 + $0x488] ss:$16 sps:$4 sm:$0xff]   ;;  %v8202_v55 = vld [vmem:[%s9386_s10 + $0x4a4] ss:$16 sps:$4 sm:$0xff]  }
0x2048   : > { %6346 = vmatpush1.bf16.msra.mxu0 %v8128_v3  ;;  %6510 = vmatpush1.bf16.msra.mxu1 %v8131_v1  ;;  %v8205_v3 = vld [vmem:[%s9386_s10 + $0x4ac] ss:$16 sps:$4 sm:$0xff]   ;;  %v8200_v1 = vld [vmem:[%s9386_s10 + $0x4a0] ss:$16 sps:$4 sm:$0xff]  }
0x2049   : > { %6347 = vmatprep.subr.bf16.mxu0 %v8136_v0  ;;  %6511 = vmatprep.subr.bf16.mxu1 %v8139_v4  ;;  %v8203_v0 = vld [vmem:[%s9386_s10 + $0x4a8] ss:$16 sps:$4 sm:$0xff]   ;;  %v8208_v4 = vld [vmem:[%s9386_s10 + $0x4c4] ss:$16 sps:$4 sm:$0xff]  }
0x204c   : > { %6348 = vmatpush1.bf16.msra.mxu0 %v8134_v6  ;;  %6512 = vmatpush1.bf16.msra.mxu1 %v8137_v44  ;;  %v8211_v6 = vld [vmem:[%s9386_s10 + $0x4cc] ss:$16 sps:$4 sm:$0xff]   ;;  %v8206_v44 = vld [vmem:[%s9386_s10 + $0x4c0] ss:$16 sps:$4 sm:$0xff]  }
0x204d   : > { %6349 = vmatprep.subr.bf16.mxu0 %v8142_v43  ;;  %6513 = vmatprep.subr.bf16.mxu1 %v8145_v57  ;;  %v8209_v43 = vld [vmem:[%s9386_s10 + $0x4c8] ss:$16 sps:$4 sm:$0xff]   ;;  %v8214_v57 = vld [vmem:[%s9386_s10 + $0x4e4] ss:$16 sps:$4 sm:$0xff]  }
0x2050   : > { %6350 = vmatpush1.bf16.msra.mxu0 %v8140_v8  ;;  %6514 = vmatpush1.bf16.msra.mxu1 %v8143_v50  ;;  %v8217_v8 = vld [vmem:[%s9386_s10 + $0x4ec] ss:$16 sps:$4 sm:$0xff]   ;;  %v8212_v50 = vld [vmem:[%s9386_s10 + $0x4e0] ss:$16 sps:$4 sm:$0xff]  }
0x2051   : > { %6351 = vmatprep.subr.bf16.mxu0 %v8148_v11  ;;  %6515 = vmatprep.subr.bf16.mxu1 %v8151_v12  ;;  %v8215_v11 = vld [vmem:[%s9386_s10 + $0x4e8] ss:$16 sps:$4 sm:$0xff]   ;;  %v8220_v12 = vld [vmem:[%s9386_s10 + $0x504] ss:$16 sps:$4 sm:$0xff]  }
0x2054   : > { %6352 = vmatpush1.bf16.msra.mxu0 %v8146_v19  ;;  %6516 = vmatpush1.bf16.msra.mxu1 %v8149_v13  ;;  %v8223_v19 = vld [vmem:[%s9386_s10 + $0x50c] ss:$16 sps:$4 sm:$0xff]   ;;  %v8218_v13 = vld [vmem:[%s9386_s10 + $0x500] ss:$16 sps:$4 sm:$0xff]  }
0x2055   : > { %6353 = vmatprep.subr.bf16.mxu0 %v8154_v14  ;;  %6517 = vmatprep.subr.bf16.mxu1 %v8157_v15  ;;  %v8221_v14 = vld [vmem:[%s9386_s10 + $0x508] ss:$16 sps:$4 sm:$0xff]   ;;  %v8226_v15 = vld [vmem:[%s9386_s10 + $0x524] ss:$16 sps:$4 sm:$0xff]  }
0x2058   : > { %6354 = vmatpush1.bf16.msra.mxu0 %v8152_v17  ;;  %6518 = vmatpush1.bf16.msra.mxu1 %v8155_v31  ;;  %v8229_v17 = vld [vmem:[%s9386_s10 + $0x52c] ss:$16 sps:$4 sm:$0xff]   ;;  %v8224_v31 = vld [vmem:[%s9386_s10 + $0x520] ss:$16 sps:$4 sm:$0xff]  }
0x2059   : > { %6355 = vmatprep.subr.bf16.mxu0 %v8160_v24  ;;  %6519 = vmatprep.subr.bf16.mxu1 %v8163_v33  ;;  %v8227_v24 = vld [vmem:[%s9386_s10 + $0x528] ss:$16 sps:$4 sm:$0xff]   ;;  %v8232_v33 = vld [vmem:[%s9386_s10 + $0x544] ss:$16 sps:$4 sm:$0xff]  }
0x205c   : > { %6356 = vmatpush1.bf16.msra.mxu0 %v8158_v41  ;;  %6520 = vmatpush1.bf16.msra.mxu1 %v8161_v48  ;;  %v8230_v41 = vld [vmem:[%s9386_s10 + $0x540] ss:$16 sps:$4 sm:$0xff]   ;;  %v8233_v48 = vld [vmem:[%s9386_s10 + $0x548] ss:$16 sps:$4 sm:$0xff]  }
0x205d   : > { %6357 = vmatprep.subr.bf16.mxu0 %v8166_v49  ;;  %6521 = vmatprep.subr.bf16.mxu1 %v8169_v39  ;;  %v8241_v49 = vld [vmem:[%s9386_s10 + $0x56c] ss:$16 sps:$4 sm:$0xff]   ;;  %v8236_v39 = vld [vmem:[%s9386_s10 + $0x560] ss:$16 sps:$4 sm:$0xff]  }
0x2060   : > { %6358 = vmatpush1.bf16.msra.mxu0 %v8164_v26  ;;  %6522 = vmatpush1.bf16.msra.mxu1 %v8167_v27  ;;  %v8244_v26 = vld [vmem:[%s9386_s10 + $0x584] ss:$16 sps:$4 sm:$0xff]   ;;  %v8247_v27 = vld [vmem:[%s9386_s10 + $0x58c] ss:$16 sps:$4 sm:$0xff]  }
0x2061   : > { %6368 = vmatprep.subr.bf16.mxu0 %v8172_v60  ;;  %6532 = vmatprep.subr.bf16.mxu1 %v8175_v10  ;;  %v8245_v60 = vld [vmem:[%s9386_s10 + $0x588] ss:$16 sps:$4 sm:$0xff]   ;;  %v8250_v10 = vld [vmem:[%s9386_s10 + $0x5a4] ss:$16 sps:$4 sm:$0xff]  }
0x2063   : > { %6360 = vmatmul.mubr.bf16.vlgmr.msra.gmra.mrb[56].mxu0 %v4978_v36  ;;  %6524 = vmatmul.mubr.bf16.vlgmr.msra.gmra.mrb[84].mxu1 %v4978_v36  ;;  %v4531_v36 = vsub.s32 4, %v8813_v22 }
0x2064   : > { %6369 = vmatpush1.bf16.msra.mxu0 %v8170_v32  ;;  %6400 = vmatprep.mubr.bf16.mxu0 %v4981_v38  ;;  %v8248_v32 = vld [vmem:[%s9386_s10 + $0x5a0] ss:$16 sps:$4 sm:$0xff]  }
0x2065   : > { %6533 = vmatpush1.bf16.msra.mxu1 %v8173_v7  ;;  %6564 = vmatprep.mubr.bf16.mxu1 %v4981_v38  ;;  %v8251_v7 = vld [vmem:[%s9386_s10 + $0x5a8] ss:$16 sps:$4 sm:$0xff]   ;;  %v8256_v38 = vld [vmem:[%s9386_s10 + $0x5c4] ss:$16 sps:$4 sm:$0xff]  }
0x2066   : > { %6370 = vmatprep.subr.bf16.mxu0 %v8178_v40  ;;  %6534 = vmatprep.subr.bf16.mxu1 %v8181_v46  ;;  %v8259_v40 = vld [vmem:[%s9386_s10 + $0x5cc] ss:$16 sps:$4 sm:$0xff]   ;;  %v4543_v46 = vsub.s32 7, %v8813_v22 }
0x2068   : > { %6371 = vmatpush1.bf16.msra.mxu0 %v8176_v53  ;;  %v8254_v53 = vld [vmem:[%s9386_s10 + $0x5c0] ss:$16 sps:$4 sm:$0xff]  }
0x2069   : > { %6535 = vmatpush1.bf16.msra.mxu1 %v8179_v51  ;;  %6372 = vmatprep.subr.bf16.mxu0 %v8184_v54  ;;  %v4532_v51 = vrot.slane %v9493_v35, %v4531_v36  ;;  %v8257_v54 = vld [vmem:[%s9386_s10 + $0x5c8] ss:$16 sps:$4 sm:$0xff]  }
0x206a   : > { %6536 = vmatprep.subr.bf16.mxu1 %v8187_v56  ;;  %v8262_v56 = vld [vmem:[%s9386_s10 + $0x5e4] ss:$16 sps:$4 sm:$0xff]   ;;  %v8323_v36 = vld [vmem:[%s9386_s10 + $0x728] ss:$16 sps:$4 sm:$0xff]  }
0x206c   : > { %6373 = vmatpush1.bf16.msra.mxu0 %v8182_v58  ;;  %v8265_v58 = vld [vmem:[%s9386_s10 + $0x5ec] ss:$16 sps:$4 sm:$0xff]  }
0x206d   : > { %6537 = vmatpush1.bf16.msra.mxu1 %v8185_v61  ;;  %6374 = vmatprep.subr.bf16.mxu0 %v8190_v62  ;;  %v4544_v61 = vrot.slane %v9493_v35, %v4543_v46  ;;  %v8260_v62 = vld [vmem:[%s9386_s10 + $0x5e0] ss:$16 sps:$4 sm:$0xff]   ;;  %v8329_v46 = vld [vmem:[%s9386_s10 + $0x748] ss:$16 sps:$4 sm:$0xff]  }
0x206e   : > { %6538 = vmatprep.subr.bf16.mxu1 %v8193_v30  ;;  %v4673_v30 = vadd.f32 %v9499_v2, %v4532_v51  ;;  %v8274_v2 = vld [vmem:[%s9386_s10 + $0x624] ss:$16 sps:$4 sm:$0xff]   ;;  %v8337_v51 = vld [vmem:[%s9386_s10 + $0x76c] ss:$16 sps:$4 sm:$0xff]  }
0x2070   : > { %6375 = vmatpush1.bf16.msra.mxu0 %v8188_v16  ;;  %v8263_v16 = vld [vmem:[%s9386_s10 + $0x5e8] ss:$16 sps:$4 sm:$0xff]  }
0x2071   : > { %6539 = vmatpush1.bf16.msra.mxu1 %v8191_v34  ;;  %6376 = vmatprep.subr.bf16.mxu0 %v8196_v5  ;;  %v8268_v34 = vld [vmem:[%s9386_s10 + $0x604] ss:$16 sps:$4 sm:$0xff]   ;;  %v8271_v5 = vld [vmem:[%s9386_s10 + $0x60c] ss:$16 sps:$4 sm:$0xff]  }
0x2072   : > { %6540 = vmatprep.subr.bf16.mxu1 %v8199_v37  ;;  %v4716_v37 = vadd.f32 %v9541_v63, %v4544_v61  ;;  %v8272_v63 = vld [vmem:[%s9386_s10 + $0x620] ss:$16 sps:$4 sm:$0xff]   ;;  %v8343_v61 = vld [vmem:[%s9386_s10 + $0x78c] ss:$16 sps:$4 sm:$0xff]  }
0x2074   : > { %6377 = vmatpush1.bf16.msra.mxu0 %v8194_v52  ;;  %v8266_v52 = vld [vmem:[%s9386_s10 + $0x600] ss:$16 sps:$4 sm:$0xff]  }
0x2075   : > { %6541 = vmatpush1.bf16.msra.mxu1 %v8197_v47  ;;  %6378 = vmatprep.subr.bf16.mxu0 %v8202_v55  ;;  %v4980_v47 = vpack.c.bf16 %v4673_v30, %v4673_v30  ;;  %v8269_v55 = vld [vmem:[%s9386_s10 + $0x608] ss:$16 sps:$4 sm:$0xff]  }
0x2076   : > { %6542 = vmatprep.subr.bf16.mxu1 %v8205_v3  ;;  %v4983_v3 = vpack.c.bf16 %v4716_v37, %v4716_v37  ;;  %v8341_v30 = vld [vmem:[%s9386_s10 + $0x788] ss:$16 sps:$4 sm:$0xff]   ;;  %v4539_v37 = vsub.s32 6, %v8813_v22 }
0x2078   : > { %6379 = vmatpush1.bf16.msra.mxu0 %v8200_v1  ;;  %v8277_v1 = vld [vmem:[%s9386_s10 + $0x62c] ss:$16 sps:$4 sm:$0xff]  }
0x2079   : > { %6543 = vmatpush1.bf16.msra.mxu1 %v8203_v0  ;;  %6380 = vmatprep.subr.bf16.mxu0 %v8208_v4  ;;  %v8275_v0 = vld [vmem:[%s9386_s10 + $0x628] ss:$16 sps:$4 sm:$0xff]   ;;  %v8280_v4 = vld [vmem:[%s9386_s10 + $0x644] ss:$16 sps:$4 sm:$0xff]  }
0x207a   : > { %6544 = vmatprep.subr.bf16.mxu1 %v8211_v6  ;;  %v8283_v6 = vld [vmem:[%s9386_s10 + $0x64c] ss:$16 sps:$4 sm:$0xff]  }
0x207c   : > { %6381 = vmatpush1.bf16.msra.mxu0 %v8206_v44  ;;  %v8278_v44 = vld [vmem:[%s9386_s10 + $0x640] ss:$16 sps:$4 sm:$0xff]  }
0x207d   : > { %6545 = vmatpush1.bf16.msra.mxu1 %v8209_v43  ;;  %6382 = vmatprep.subr.bf16.mxu0 %v8214_v57  ;;  %v8281_v43 = vld [vmem:[%s9386_s10 + $0x648] ss:$16 sps:$4 sm:$0xff]   ;;  %v8286_v57 = vld [vmem:[%s9386_s10 + $0x664] ss:$16 sps:$4 sm:$0xff]  }
0x207e   : > { %6546 = vmatprep.subr.bf16.mxu1 %v8217_v8  ;;  %v8289_v8 = vld [vmem:[%s9386_s10 + $0x66c] ss:$16 sps:$4 sm:$0xff]  }
0x2080   : > { %6383 = vmatpush1.bf16.msra.mxu0 %v8212_v50  ;;  %v8284_v50 = vld [vmem:[%s9386_s10 + $0x660] ss:$16 sps:$4 sm:$0xff]  }
0x2081   : > { %6547 = vmatpush1.bf16.msra.mxu1 %v8215_v11  ;;  %6384 = vmatprep.subr.bf16.mxu0 %v8220_v12  ;;  %v8287_v11 = vld [vmem:[%s9386_s10 + $0x668] ss:$16 sps:$4 sm:$0xff]   ;;  %v8292_v12 = vld [vmem:[%s9386_s10 + $0x684] ss:$16 sps:$4 sm:$0xff]  }
0x2082   : > { %6548 = vmatprep.subr.bf16.mxu1 %v8223_v19  ;;  %v8295_v19 = vld [vmem:[%s9386_s10 + $0x68c] ss:$16 sps:$4 sm:$0xff]  }
0x2084   : > { %6385 = vmatpush1.bf16.msra.mxu0 %v8218_v13  ;;  %v8290_v13 = vld [vmem:[%s9386_s10 + $0x680] ss:$16 sps:$4 sm:$0xff]  }
0x2085   : > { %6549 = vmatpush1.bf16.msra.mxu1 %v8221_v14  ;;  %6386 = vmatprep.subr.bf16.mxu0 %v8226_v15  ;;  %v8293_v14 = vld [vmem:[%s9386_s10 + $0x688] ss:$16 sps:$4 sm:$0xff]   ;;  %v8298_v15 = vld [vmem:[%s9386_s10 + $0x6a4] ss:$16 sps:$4 sm:$0xff]  }
0x2086   : > { %6550 = vmatprep.subr.bf16.mxu1 %v8229_v17  ;;  %v8301_v17 = vld [vmem:[%s9386_s10 + $0x6ac] ss:$16 sps:$4 sm:$0xff]  }
0x2088   : > { %6387 = vmatpush1.bf16.msra.mxu0 %v8224_v31  ;;  %v8296_v31 = vld [vmem:[%s9386_s10 + $0x6a0] ss:$16 sps:$4 sm:$0xff]  }
0x2089   : > { %6551 = vmatpush1.bf16.msra.mxu1 %v8227_v24  ;;  %6388 = vmatprep.subr.bf16.mxu0 %v8232_v33  ;;  %v8299_v24 = vld [vmem:[%s9386_s10 + $0x6a8] ss:$16 sps:$4 sm:$0xff]   ;;  %v8304_v33 = vld [vmem:[%s9386_s10 + $0x6c4] ss:$16 sps:$4 sm:$0xff]  }
0x208a   : > { %6552 = vmatprep.subr.bf16.mxu1 %v8235_v20  ;;  %v8307_v20 = vld [vmem:[%s9386_s10 + $0x6cc] ss:$16 sps:$4 sm:$0xff]  }
0x208c   : > { %6389 = vmatpush1.bf16.msra.mxu0 %v8230_v41  ;;  %v8302_v41 = vld [vmem:[%s9386_s10 + $0x6c0] ss:$16 sps:$4 sm:$0xff]  }
0x208d   : > { %6553 = vmatpush1.bf16.msra.mxu1 %v8233_v48  ;;  %6390 = vmatprep.subr.bf16.mxu0 %v8238_v42  ;;  %v8305_v48 = vld [vmem:[%s9386_s10 + $0x6c8] ss:$16 sps:$4 sm:$0xff]   ;;  %v8310_v42 = vld [vmem:[%s9386_s10 + $0x6e4] ss:$16 sps:$4 sm:$0xff]  }
0x208e   : > { %6554 = vmatprep.subr.bf16.mxu1 %v8241_v49  ;;  %v8313_v49 = vld [vmem:[%s9386_s10 + $0x6ec] ss:$16 sps:$4 sm:$0xff]  }
0x2090   : > { %6391 = vmatpush1.bf16.msra.mxu0 %v8236_v39  ;;  %v8308_v39 = vld [vmem:[%s9386_s10 + $0x6e0] ss:$16 sps:$4 sm:$0xff]  }
0x2091   : > { %6555 = vmatpush1.bf16.msra.mxu1 %v8239_v45  ;;  %6392 = vmatprep.subr.bf16.mxu0 %v8244_v26  ;;  %v8311_v45 = vld [vmem:[%s9386_s10 + $0x6e8] ss:$16 sps:$4 sm:$0xff]   ;;  %v8316_v26 = vld [vmem:[%s9386_s10 + $0x704] ss:$16 sps:$4 sm:$0xff]  }
0x2092   : > { %6556 = vmatprep.subr.bf16.mxu1 %v8247_v27  ;;  %v8319_v27 = vld [vmem:[%s9386_s10 + $0x70c] ss:$16 sps:$4 sm:$0xff]  }
0x2094   : > { %6393 = vmatpush1.bf16.msra.mxu0 %v8242_v28  ;;  %v8314_v28 = vld [vmem:[%s9386_s10 + $0x700] ss:$16 sps:$4 sm:$0xff]  }
0x2095   : > { %6557 = vmatpush1.bf16.msra.mxu1 %v8245_v60  ;;  %6394 = vmatprep.subr.bf16.mxu0 %v8250_v10  ;;  %v8317_v60 = vld [vmem:[%s9386_s10 + $0x708] ss:$16 sps:$4 sm:$0xff]   ;;  %v8322_v10 = vld [vmem:[%s9386_s10 + $0x724] ss:$16 sps:$4 sm:$0xff]  }
0x2096   : > { %6558 = vmatprep.subr.bf16.mxu1 %v8253_v9  ;;  %v8325_v9 = vld [vmem:[%s9386_s10 + $0x72c] ss:$16 sps:$4 sm:$0xff]  }
0x2098   : > { %6395 = vmatpush1.bf16.msra.mxu0 %v8248_v32  ;;  %v8320_v32 = vld [vmem:[%s9386_s10 + $0x720] ss:$16 sps:$4 sm:$0xff]  }
0x2099   : > { %6559 = vmatpush1.bf16.msra.mxu1 %v8251_v7  ;;  %6396 = vmatprep.subr.bf16.mxu0 %v8256_v38  ;;  %v8328_v7 = vld [vmem:[%s9386_s10 + $0x744] ss:$16 sps:$4 sm:$0xff]   ;;  %v8331_v38 = vld [vmem:[%s9386_s10 + $0x74c] ss:$16 sps:$4 sm:$0xff]  }
0x209a   : > { %6560 = vmatprep.subr.bf16.mxu1 %v8259_v40  ;;  %v8326_v40 = vld [vmem:[%s9386_s10 + $0x740] ss:$16 sps:$4 sm:$0xff]  }
0x209c   : > { %6397 = vmatpush1.bf16.msra.mxu0 %v8254_v53  ;;  %v8334_v53 = vld [vmem:[%s9386_s10 + $0x764] ss:$16 sps:$4 sm:$0xff]  }
0x209d   : > { %6561 = vmatpush1.bf16.msra.mxu1 %v8257_v54  ;;  %6398 = vmatprep.subr.bf16.mxu0 %v8262_v56  ;;  %v8332_v54 = vld [vmem:[%s9386_s10 + $0x760] ss:$16 sps:$4 sm:$0xff]   ;;  %v8335_v56 = vld [vmem:[%s9386_s10 + $0x768] ss:$16 sps:$4 sm:$0xff]  }
0x209e   : > { %6562 = vmatprep.subr.bf16.mxu1 %v8265_v58  ;;  %v8340_v58 = vld [vmem:[%s9386_s10 + $0x784] ss:$16 sps:$4 sm:$0xff]  }
0x20a0   : > { %6399 = vmatpush1.bf16.msra.mxu0 %v8260_v62  ;;  %v8338_v62 = vld [vmem:[%s9386_s10 + $0x780] ss:$16 sps:$4 sm:$0xff]  }
0x20a1   : > { %6563 = vmatpush1.bf16.msra.mxu1 %v8263_v16  ;;  %6409 = vmatprep.subr.bf16.mxu0 %v8268_v34  ;;  %v8346_v16 = vld [vmem:[%s9386_s10 + $0x7a4] ss:$16 sps:$4 sm:$0xff]   ;;  %v8349_v34 = vld [vmem:[%s9386_s10 + $0x7ac] ss:$16 sps:$4 sm:$0xff]  }
0x20a2   : > { %6573 = vmatprep.subr.bf16.mxu1 %v8271_v5  ;;  %v8344_v5 = vld [vmem:[%s9386_s10 + $0x7a0] ss:$16 sps:$4 sm:$0xff]  }
0x20a3   : > { %6401 = vmatmul.mubr.bf16.vlgmr.msra.gmra.mrb[56].mxu0 %v4980_v47 }
0x20a4   : > { %6565 = vmatmul.mubr.bf16.vlgmr.msra.gmra.mrb[84].mxu1 %v4980_v47  ;;  %6410 = vmatpush1.bf16.msra.mxu0 %v8266_v52  ;;  %v8347_v52 = vld [vmem:[%s9386_s10 + $0x7a8] ss:$16 sps:$4 sm:$0xff]   ;;  %v8352_v47 = vld [vmem:[%s9386_s10 + $0x7c4] ss:$16 sps:$4 sm:$0xff]  }
0x20a5   : > { %6441 = vmatprep.mubr.bf16.mxu0 %v4983_v3  ;;  %6574 = vmatpush1.bf16.msra.mxu1 %v8269_v55  ;;  %v8355_v55 = vld [vmem:[%s9386_s10 + $0x7cc] ss:$16 sps:$4 sm:$0xff]  }
0x20a6   : > { %6605 = vmatprep.mubr.bf16.mxu1 %v4983_v3  ;;  %6411 = vmatprep.subr.bf16.mxu0 %v8274_v2  ;;  %v8350_v2 = vld [vmem:[%s9386_s10 + $0x7c0] ss:$16 sps:$4 sm:$0xff]   ;;  %v4540_v3 = vrot.slane %v9493_v35, %v4539_v37 }
0x20a7   : > { %6575 = vmatprep.subr.bf16.mxu1 %v8277_v1  ;;  %v8353_v1 = vld [vmem:[%s9386_s10 + $0x7c8] ss:$16 sps:$4 sm:$0xff]   ;;  %v4984_v35 = vld [vmem:[%s1255_s1] sm:$0xf] }
0x20a8   : > { %6412 = vmatpush1.bf16.msra.mxu0 %v8272_v63  ;;  %v8358_v63 = vld [vmem:[%s9386_s10 + $0x7e4] ss:$16 sps:$4 sm:$0xff]  }
0x20a9   : > { %6576 = vmatpush1.bf16.msra.mxu1 %v8275_v0  ;;  %6413 = vmatprep.subr.bf16.mxu0 %v8280_v4  ;;  %v8361_v0 = vld [vmem:[%s9386_s10 + $0x7ec] ss:$16 sps:$4 sm:$0xff]   ;;  %v8356_v4 = vld [vmem:[%s9386_s10 + $0x7e0] ss:$16 sps:$4 sm:$0xff]  }
0x20aa   : > { %6577 = vmatprep.subr.bf16.mxu1 %v8283_v6  ;;  %v4714_v6 = vadd.f32 %v9537_v59, %v4540_v3 }
0x20ac   : > { %6414 = vmatpush1.bf16.msra.mxu0 %v8278_v44  ;;  %v8359_v44 = vld [vmem:[%s9386_s10 + $0x7e8] ss:$16 sps:$4 sm:$0xff]  }
0x20ad   : > { %6578 = vmatpush1.bf16.msra.mxu1 %v8281_v43  ;;  %6415 = vmatprep.subr.bf16.mxu0 %v8286_v57  ;;  %v4982_v43 = vpack.c.bf16 %v4714_v6, %v4714_v6  ;;  %v8552_v57 = vmov 1966171168  }
0x20ae   : > { %6579 = vmatprep.subr.bf16.mxu1 %v8289_v8  ;;  %v6621_v59 = vunpack.c.l.s4 %v8552_v57  ;;  %v6269_v8 = vrot.slane %v4984_v35, %v8821_v23 }
0x20b0   : > { %6416 = vmatpush1.bf16.msra.mxu0 %v8284_v50  ;;  %v6277_v50 = vrot.slane %v4984_v35, %v4523_v18 }
0x20b1   : > { %6580 = vmatpush1.bf16.msra.mxu1 %v8287_v11  ;;  %6417 = vmatprep.subr.bf16.mxu0 %v8292_v12  ;;  %v6273_v11 = vrot.slane %v4984_v35, %v8825_v25  ;;  %v6622_v12 = vunpack.c.0.s8 %v6621_v59 }
0x20b2   : > { %6581 = vmatprep.subr.bf16.mxu1 %v8295_v19  ;;  %v6281_v19 = vrot.slane %v4984_v35, %v4527_v29 }
0x20b4   : > { %6418 = vmatpush1.bf16.msra.mxu0 %v8290_v13 }
0x20b5   : > { %6582 = vmatpush1.bf16.msra.mxu1 %v8293_v14  ;;  %6419 = vmatprep.subr.bf16.mxu0 %v8298_v15 }
0x20b6   : > { %6583 = vmatprep.subr.bf16.mxu1 %v8301_v17 }
0x20b8   : > { %6420 = vmatpush1.bf16.msra.mxu0 %v8296_v31 }
0x20b9   : > { %6584 = vmatpush1.bf16.msra.mxu1 %v8299_v24  ;;  %6421 = vmatprep.subr.bf16.mxu0 %v8304_v33  ;;  %v6625_v33 = vsub.s32 %v6622_v12, %v8813_v22 }
0x20ba   : > { %6585 = vmatprep.subr.bf16.mxu1 %v8307_v20 }
0x20bc   : > { %6422 = vmatpush1.bf16.msra.mxu0 %v8302_v41 }
0x20bd   : > { %6586 = vmatpush1.bf16.msra.mxu1 %v8305_v48  ;;  %6423 = vmatprep.subr.bf16.mxu0 %v8310_v42 }
0x20be   : > { %6587 = vmatprep.subr.bf16.mxu1 %v8313_v49 }
0x20c0   : > { %6424 = vmatpush1.bf16.msra.mxu0 %v8308_v39 }
0x20c1   : > { %6588 = vmatpush1.bf16.msra.mxu1 %v8311_v45  ;;  %6425 = vmatprep.subr.bf16.mxu0 %v8316_v26 }
0x20c2   : > { %6589 = vmatprep.subr.bf16.mxu1 %v8319_v27 }
0x20c4   : > { %6426 = vmatpush1.bf16.msra.mxu0 %v8314_v28 }
0x20c5   : > { %6590 = vmatpush1.bf16.msra.mxu1 %v8317_v60  ;;  %6427 = vmatprep.subr.bf16.mxu0 %v8322_v10 }
0x20c6   : > { %6591 = vmatprep.subr.bf16.mxu1 %v8325_v9 }
0x20c8   : > { %6428 = vmatpush1.bf16.msra.mxu0 %v8320_v32 }
0x20c9   : > { %6592 = vmatpush1.bf16.msra.mxu1 %v8323_v36  ;;  %6429 = vmatprep.subr.bf16.mxu0 %v8328_v7 }
0x20ca   : > { %6593 = vmatprep.subr.bf16.mxu1 %v8331_v38 }
0x20cc   : > { %6430 = vmatpush1.bf16.msra.mxu0 %v8326_v40 }
0x20cd   : > { %6594 = vmatpush1.bf16.msra.mxu1 %v8329_v46  ;;  %6431 = vmatprep.subr.bf16.mxu0 %v8334_v53 }
0x20ce   : > { %6595 = vmatprep.subr.bf16.mxu1 %v8337_v51 }
0x20d0   : > { %6432 = vmatpush1.bf16.msra.mxu0 %v8332_v54 }
0x20d1   : > { %6596 = vmatpush1.bf16.msra.mxu1 %v8335_v56  ;;  %6433 = vmatprep.subr.bf16.mxu0 %v8340_v58 }
0x20d2   : > { %6597 = vmatprep.subr.bf16.mxu1 %v8343_v61 }
0x20d4   : > { %6434 = vmatpush1.bf16.msra.mxu0 %v8338_v62 }
0x20d5   : > { %6598 = vmatpush1.bf16.msra.mxu1 %v8341_v30  ;;  %6435 = vmatprep.subr.bf16.mxu0 %v8346_v16 }
0x20d6   : > { %6599 = vmatprep.subr.bf16.mxu1 %v8349_v34 }
0x20d8   : > { %6436 = vmatpush1.bf16.msra.mxu0 %v8344_v5 }
0x20d9   : > { %6600 = vmatpush1.bf16.msra.mxu1 %v8347_v52  ;;  %6437 = vmatprep.subr.bf16.mxu0 %v8352_v47 }
0x20da   : > { %6601 = vmatprep.subr.bf16.mxu1 %v8355_v55 }
0x20dc   : > { %6438 = vmatpush1.bf16.msra.mxu0 %v8350_v2 }
0x20dd   : > { %6602 = vmatpush1.bf16.msra.mxu1 %v8353_v1  ;;  %6439 = vmatprep.subr.bf16.mxu0 %v8358_v63 }
0x20de   : > { %6603 = vmatprep.subr.bf16.mxu1 %v8361_v0 }
0x20e0   : > { %6440 = vmatpush1.bf16.msra.mxu0 %v8356_v4 }
0x20e1   : > { %6604 = vmatpush1.bf16.msra.mxu1 %v8359_v44 }
0x20e3   : > { %6442 = vmatmul.mubr.bf16.vlgmr.msra.gmra.mrb[56].mxu0 %v4982_v43 }
0x20e4   : > { %6606 = vmatmul.mubr.bf16.vlgmr.msra.gmra.mrb[84].mxu1 %v4982_v43 }
0x21b6   : > { %v6443_v13 = vpop.f32.mrb[56].mxu0 }
0x21b7   : > { %v7780_v14 = vadd.f32 %v6443_v13, %v6269_v8  ;;  %v6607_v15 = vpop.f32.mrb[84].mxu1  ;;  %v6445_v17 = vpop.f32.mrb[57].mxu0 }
0x21b8   : > { %v7782_v31 = vadd.f32 %v6607_v15, %v6277_v50  ;;  %v7781_v24 = vadd.f32 %v6445_v17, %v6273_v11  ;;  %v6609_v20 = vpop.f32.mrb[85].mxu1  ;;  %v6447_v23 = vpop.f32.mrb[58].mxu0 }
0x21b9   : > { %v7783_v41 = vadd.f32 %v6609_v20, %v6281_v19  ;;  %v6611_v48 = vpop.f32.mrb[86].mxu1  ;;  %v6448_v18 = vpop.f32.mrb[59].mxu0 }
0x21ba   : > { %v6618_v42 = vcombine.low %v7780_v14, %v7781_v24  ;;  %v6612_v25 = vpop.f32.mrb[87].mxu1 }
0x21bb   : > { %v6619_v49 = vcombine.low %v7782_v31, %v7783_v41 }
0x21bc   : > { %v6626_v39 = vrot.slane %v6618_v42, %v6625_v33 }
0x21bd   : > { %v6633_v29 = vrot.slane %v6619_v49, %v6625_v33 }
0x21bf   : > { %v6634_v45 = vcombine.low %v6626_v39, %v6633_v29 }
0x21c1   : > { %v6641_v26 = vrot.slane %v6634_v45, %v6625_v33 }
0x21c3   : > { %6647 = vst.msk [vmem:[%s1260_s30] sm:$0xf] %vm6645_vm8, %v6641_v26 }
0x21c4 PF: > { %s9814_s8 = sld [smem:[#allocation6_spill]] }
0x21ca   : > { %s45_s1 = sadd.s32 1, %s9814_s8  }
0x21cb   : > { %p42_p8 = scmp.ge.s32.totalorder %s45_s1, 10  }
0x21cd   :  { %44 = sbr.rel (!%p42_p8) target bundleno = 38 (0x26), region = 220 }

</bundles_post_ra>
